<compile_context>
chip_gen: v5e
topology: v5e:2x2
jax: 0.10.0
libtpu: 0.0.40
codegen_flags: <defaults>
</compile_context>

<pallas_src>
import functools

import jax
import jax.numpy as jnp
import numpy as np
from jax import lax
from jax.experimental import pallas as pl
from jax.experimental.pallas import tpu as pltpu

_LANE = 128
_NEG_BIG = -1e30


def _round_up(x, m):
    return ((x + m - 1) // m) * m


def _default_tile(n):
    if n <= 512:
        return 128
    if n <= 4096:
        return 512
    return 1024


# --------------------------------------------------------------------------
# Kernel 1: fused projection.  h_ext = x @ [W | W att_src^T | W att_dst^T]
# One MXU call produces the projected features and both attention logits.
# --------------------------------------------------------------------------
def _gat_project_kernel(x_ref, wext_ref, h_ref, a_ref):
    x = x_ref[...].astype(jnp.bfloat16)
    w = wext_ref[...].astype(jnp.bfloat16)
    h_ext = jnp.dot(x, w, preferred_element_type=jnp.float32)   # [TM, C_pad+128]
    c_pad = h_ref.shape[-1]
    h_ref[...] = h_ext[:, :c_pad].astype(h_ref.dtype)           # bf16 features
    a_ref[...] = h_ext[:, c_pad:]                               # f32: col0=a_src, col1=a_dst


# --------------------------------------------------------------------------
# Kernel 2: block-sparse, one-pass-softmax attention aggregation.
# grid = (dst_tiles [parallel], max_nonempty_src_tiles [arbitrary/reduction]).
# Scalar-prefetched (tbl, cnt) pick which src tiles to visit; (l, acc) live in
# VMEM scratch; the last src step finalizes (and optionally fuses log_softmax).
# --------------------------------------------------------------------------
def _gat_attn_kernel(tbl_ref, cnt_ref, adst_ref, asrc_ref, m_ref, h_ref,
                     adj_ref, bias_ref, out_ref, l_sc, acc_sc,
                     *, final, valid_cols):
    i = pl.program_id(0)
    k = pl.program_id(1)

    @pl.when(k == 0)
    def _():
        l_sc[...] = jnp.zeros_like(l_sc)
        acc_sc[...] = jnp.zeros_like(acc_sc)

    # Only real (nonempty) src tiles contribute; padded grid steps are skipped.
    @pl.when(k < cnt_ref[i])
    def _():
        mask = adj_ref[...].astype(jnp.float32) > 0.0   # int8 0/1 adjacency
        e = adst_ref[...] + asrc_ref[...]               # [TM,1] + [1,TK] -> [TM,TK]
        e = jnp.maximum(e, 0.2 * e)                     # LeakyReLU(0.2)
        # One-pass softmax: m_ref >= leaky(adst_i + asrc_j) for every real j.
        p = jnp.where(mask, jnp.exp(e - m_ref[...]), 0.0)
        l_sc[...] += jnp.sum(p, axis=-1, keepdims=True)
        acc_sc[...] += jnp.dot(p.astype(jnp.bfloat16), h_ref[...],
                               preferred_element_type=jnp.float32)

    @pl.when(k == pl.num_programs(1) - 1)
    def _():
        denom = jnp.maximum(l_sc[...], 1e-20)           # guard isolated/padded rows
        if final:
            # Exact divide + fused masked log_softmax over the feature axis.
            out = acc_sc[...] / denom + bias_ref[...]
            col = lax.broadcasted_iota(jnp.int32, out.shape, 1)
            cmask = col < valid_cols
            om = jnp.where(cmask, out, _NEG_BIG)
            mx = jnp.max(om, axis=-1, keepdims=True)
            z = out - mx
            ez = jnp.where(cmask, jnp.exp(z), 0.0)
            lse = jnp.log(jnp.sum(ez, axis=-1, keepdims=True))
            out_ref[...] = (z - lse).astype(out_ref.dtype)
        else:
            out = acc_sc[...] * pl.reciprocal(denom, approx=True) + bias_ref[...]
            out_ref[...] = out.astype(out_ref.dtype)


# --------------------------------------------------------------------------
# Per-layer wrapper
# --------------------------------------------------------------------------
def gat_layer(x_pad, wext, bias_pad, adj_i8, tbl, cnt, n_valid, *,
              tile, final, valid_cols, out_dtype):
    n_pad, c_in_pad = x_pad.shape
    c_ext = wext.shape[1]
    c_pad = c_ext - _LANE
    tm = tk = tile
    nt = n_pad // tm
    max_k = tbl.shape[0] // nt

    h, a_ext = pl.pallas_call(
        _gat_project_kernel,
        out_shape=(jax.ShapeDtypeStruct((n_pad, c_pad), jnp.bfloat16),
                   jax.ShapeDtypeStruct((n_pad, _LANE), jnp.float32)),
        grid=(n_pad // tm,),
        in_specs=[pl.BlockSpec((tm, c_in_pad), lambda i: (i, 0)),
                  pl.BlockSpec((c_in_pad, c_ext), lambda i: (0, 0))],
        out_specs=(pl.BlockSpec((tm, c_pad), lambda i: (i, 0)),
                   pl.BlockSpec((tm, _LANE), lambda i: (i, 0))),
        compiler_params=pltpu.CompilerParams(dimension_semantics=("parallel",)),
    )(x_pad, wext)

    asrc = a_ext[:, 0]                                   # [N_pad] src logits
    adst = a_ext[:, 1].reshape(n_pad, 1)                 # [N_pad, 1] dst logits
    # One-pass softmax bound: leaky_relu is monotone, so for every real src j
    #   leaky(adst_i + asrc_j) <= leaky(adst_i + max_j asrc_j) = m_i.
    asrc_max = jnp.max(asrc[:n_valid])
    t = adst + asrc_max
    m_row = jnp.maximum(t, 0.2 * t)                      # [N_pad, 1]
    asrc_t = asrc.reshape(1, n_pad)

    kernel = functools.partial(_gat_attn_kernel, final=final, valid_cols=valid_cols)
    out = pl.pallas_call(
        kernel,
        out_shape=jax.ShapeDtypeStruct((n_pad, c_pad), out_dtype),
        grid_spec=pltpu.PrefetchScalarGridSpec(
            num_scalar_prefetch=2,                       # tbl (flattened), cnt
            grid=(nt, max_k),
            in_specs=[
                pl.BlockSpec((tm, 1),
                             lambda i, k, tbl, cnt: (i, 0)),                    # adst
                pl.BlockSpec((1, tk),
                             lambda i, k, tbl, cnt: (0, tbl[i * max_k + k])),   # asrc
                pl.BlockSpec((tm, 1),
                             lambda i, k, tbl, cnt: (i, 0)),                    # m
                pl.BlockSpec((tk, c_pad),
                             lambda i, k, tbl, cnt: (tbl[i * max_k + k], 0)),   # h
                pl.BlockSpec((tm, tk),
                             lambda i, k, tbl, cnt: (i, tbl[i * max_k + k])),   # adj (int8)
                pl.BlockSpec((1, c_pad),
                             lambda i, k, tbl, cnt: (0, 0)),                    # bias
            ],
            out_specs=pl.BlockSpec((tm, c_pad), lambda i, k, tbl, cnt: (i, 0)),
            scratch_shapes=[pltpu.VMEM((tm, 1), jnp.float32),     # l
                            pltpu.VMEM((tm, c_pad), jnp.float32)],  # acc
        ),
        compiler_params=pltpu.CompilerParams(
            dimension_semantics=("parallel", "arbitrary")),
    )(tbl, cnt, adst, asrc_t, m_row, h, adj_i8, bias_pad)
    return out


# --------------------------------------------------------------------------
# Full forward
# --------------------------------------------------------------------------
@functools.partial(jax.jit, static_argnames=("out_dim", "tile"))
def gat_forward(x, adj_i8, tbl, cnt, prepped, *, out_dim, tile):
    # TODO(synk): nn.Dropout is identity at inference; no stochastic dropout applied.
    n, c_in = x.shape
    n_pad = adj_i8.shape[0]
    assert n_pad % tile == 0
    c_in_pad = prepped[0]["wext"].shape[0]

    x_pad = jnp.zeros((n_pad, c_in_pad), jnp.bfloat16)
    x_pad = x_pad.at[:n, :c_in].set(x.astype(jnp.bfloat16))

    h = x_pad
    last = len(prepped) - 1
    for li, p in enumerate(prepped):
        assert h.shape[1] == p["wext"].shape[0]
        is_last = li == last
        h = gat_layer(h, p["wext"], p["bias"], adj_i8, tbl, cnt, n,
                      tile=tile, final=is_last,
                      valid_cols=out_dim if is_last else 0,
                      out_dtype=jnp.float32 if is_last else jnp.bfloat16)
    return h[:n, :out_dim]


# --------------------------------------------------------------------------
# Parameter / adjacency preparation
# --------------------------------------------------------------------------
def init_gat_params(key, n_layers, in_dim, n_hidden, out_dim):
    """GATConv(in,hid), (n_layers-1) x GATConv(hid,hid), GATConv(hid,out)."""
    dims = [(in_dim, n_hidden)]
    dims += [(n_hidden, n_hidden)] * (n_layers - 1)
    dims += [(n_hidden, out_dim)]
    params = []
    for (c_in, c_out) in dims:
        key, kw, ks, kd = jax.random.split(key, 4)
        scale = 1.0 / jnp.sqrt(jnp.float32(c_in))
        params.append(dict(
            w=jax.random.normal(kw, (c_in, c_out), jnp.float32) * scale,
            att_src=jax.random.normal(ks, (1, c_out), jnp.float32) * 0.1,
            att_dst=jax.random.normal(kd, (1, c_out), jnp.float32) * 0.1,
            bias=jnp.zeros((1, c_out), jnp.float32),
        ))
    return params


def prepare_gat_params(params):
    """Lane-pad to multiples of 128, fold attention vectors into W, store bf16."""
    prepped = []
    for p in params:
        w, a_s, a_d, b = p["w"], p["att_src"], p["att_dst"], p["bias"]
        c_in, c_out = w.shape
        c_in_pad = _round_up(c_in, _LANE)
        c_pad = _round_up(c_out, _LANE)
        w_p = jnp.zeros((c_in_pad, c_pad), jnp.float32).at[:c_in, :c_out].set(w)
        ws = w @ a_s.reshape(c_out, 1)                # [c_in, 1]  (alpha_src column)
        wd = w @ a_d.reshape(c_out, 1)                # [c_in, 1]  (alpha_dst column)
        extra = jnp.zeros((c_in_pad, _LANE), jnp.float32)
        extra = extra.at[:c_in, 0:1].set(ws).at[:c_in, 1:2].set(wd)
        wext = jnp.concatenate([w_p, extra], axis=1).astype(jnp.bfloat16)
        bias_p = jnp.zeros((1, c_pad), jnp.float32).at[0, :c_out].set(b.reshape(-1))
        prepped.append(dict(wext=wext, bias=bias_p))
    return prepped


def build_dense_adj(edge_index, num_nodes):
    """adj[dst, src] = 1.0 for each edge, plus self-loops (PyG default)."""
    src, dst = edge_index[0], edge_index[1]
    adj = jnp.zeros((num_nodes, num_nodes), jnp.float32)
    adj = adj.at[dst, src].set(1.0)
    adj = jnp.maximum(adj, jnp.eye(num_nodes, dtype=jnp.float32))
    return adj


def prepare_adjacency(adj, tile):
    """Host-side, done once: pad adjacency to int8 [n_pad, n_pad] and build a
    per-dst-tile table of nonempty src-tile indices for block-sparse skipping.

    Returns (adj_i8, tbl_flat[int32, nt*max_k], cnt[int32, nt], n_pad)."""
    adj = np.asarray(adj)
    n = adj.shape[0]
    n_pad = _round_up(n, tile)
    a = np.zeros((n_pad, n_pad), np.int8)
    a[:n, :n] = (adj > 0).astype(np.int8)
    nt = n_pad // tile
    blk = a.reshape(nt, tile, nt, tile).any(axis=(1, 3))   # [dst_tile, src_tile]
    cnt = blk.sum(axis=1).astype(np.int32)
    max_k = max(int(cnt.max()), 1)
    tbl = np.zeros((nt, max_k), np.int32)                  # padding entries -> tile 0
    for i in range(nt):
        idx = np.nonzero(blk[i])[0]
        tbl[i, :idx.size] = idx
    return (jnp.asarray(a), jnp.asarray(tbl.reshape(-1)),
            jnp.asarray(cnt), n_pad)


# --------------------------------------------------------------------------
# Pure-JAX reference (f32) for validation
# --------------------------------------------------------------------------
def gat_reference(x, adj, params):
    for p in params:
        h = x @ p["w"]
        asrc = h @ p["att_src"].reshape(-1, 1)        # [N, 1]
        adst = h @ p["att_dst"].reshape(-1, 1)        # [N, 1]
        e = adst + asrc.T
        e = jnp.where(e >= 0.0, e, 0.2 * e)
        e = jnp.where(adj > 0.0, e, -jnp.inf)
        att = jax.nn.softmax(e, axis=-1)
        att = jnp.where(adj > 0.0, att, 0.0)
        x = att @ h + p["bias"]
    return jax.nn.log_softmax(x, axis=-1)


if __name__ == "__main__":
    key = jax.random.PRNGKey(0)

    num_nodes = 16
    in_dim, n_hidden, out_dim = 8, 32, 4
    n_layers = 2          # -> 3 GATConv layers total
    num_edges = 40

    key, kx, ks, kd, kp = jax.random.split(key, 5)
    x = jax.random.normal(kx, (num_nodes, in_dim), jnp.float32)
    src = jax.random.randint(ks, (num_edges,), 0, num_nodes)
    dst = jax.random.randint(kd, (num_edges,), 0, num_nodes)
    edge_index = jnp.stack([src, dst], axis=0)        # [2, E]

    adj = build_dense_adj(edge_index, num_nodes)
    params = init_gat_params(kp, n_layers, in_dim, n_hidden, out_dim)
    prepped = prepare_gat_params(params)

    tile = _default_tile(num_nodes)
    adj_i8, tbl, cnt, _ = prepare_adjacency(adj, tile)   # padded int8, built once

    out = gat_forward(x, adj_i8, tbl, cnt, prepped, out_dim=out_dim, tile=tile)
    jax.block_until_ready(out)

    assert out.shape == (num_nodes, out_dim)
    # Rows of log_softmax should exponentiate-sum to 1.
    row_sums = jnp.sum(jnp.exp(out), axis=1)
    assert bool(jnp.all(jnp.abs(row_sums - 1.0) < 1e-3))

    # Compare against the f32 pure-JAX reference (bf16 matmuls => loose tol).
    ref = gat_reference(x, adj, params)
    max_err = float(jnp.max(jnp.abs(out - ref)))
    assert max_err < 0.15, f"max |pallas - ref| = {max_err}"

    print("KERNEL_OK")
</pallas_src>

<mosaic_0001>
module attributes {stable_mosaic.version = 11 : i64} {
  func.func @_gat_project_kernel(%arg0: i32, %arg1: memref<128x128xbf16, #tpu.memory_space<vmem>>, %arg2: memref<128x256xbf16, #tpu.memory_space<vmem>>, %arg3: memref<128x128xbf16, #tpu.memory_space<vmem>>, %arg4: memref<128x128xf32, #tpu.memory_space<vmem>>) attributes {dimension_semantics = [#tpu.dimension_semantics<parallel>], iteration_bounds = array<i64: 1>, scalar_prefetch = 0 : i64, scratch_operands = 0 : i64, tpu.core_type = #tpu.core_type<tc>, window_params = [{transform_indices = @transform_0, window_bounds = array<i64: 128, 128>}, {pipeline_mode = #tpu.pipeline_mode<synchronous>, transform_indices = @transform_1, window_bounds = array<i64: 128, 256>}, {transform_indices = @transform_2, window_bounds = array<i64: 128, 128>}, {transform_indices = @transform_3, window_bounds = array<i64: 128, 128>}]} {
    %c0 = arith.constant 0 : index
    %c0_0 = arith.constant 0 : index
    %0 = vector.load %arg1[%c0, %c0_0] : memref<128x128xbf16, #tpu.memory_space<vmem>>, vector<128x128xbf16>
    %c0_1 = arith.constant 0 : index
    %c0_2 = arith.constant 0 : index
    %1 = vector.load %arg2[%c0_1, %c0_2] : memref<128x256xbf16, #tpu.memory_space<vmem>>, vector<128x256xbf16>
    %cst = arith.constant dense<0.000000e+00> : vector<128x256xf32>
    %2 = tpu.matmul %0, %1, %cst {dimension_numbers = #tpu.dot_dimension_numbers<[1], [0], [0], [1], [0, 0, 1, 1], [], []>} : vector<128x128xbf16>, vector<128x256xbf16>, vector<128x256xf32> -> vector<128x256xf32>
    %3 = vector.extract_strided_slice %2 {offsets = [0, 0], sizes = [128, 128], strides = [1, 1]} : vector<128x256xf32> to vector<128x128xf32>
    %4 = arith.truncf %3 : vector<128x128xf32> to vector<128x128xbf16>
    %c0_3 = arith.constant 0 : index
    %c0_4 = arith.constant 0 : index
    %5 = vector.load %arg3[%c0_3, %c0_4] : memref<128x128xbf16, #tpu.memory_space<vmem>>, vector<128x128xbf16>
    tpu.vector_store %arg3[%c0_3, %c0_4], %4 {strides = array<i32>} : memref<128x128xbf16, #tpu.memory_space<vmem>>, vector<128x128xbf16>,
    %6 = vector.extract_strided_slice %2 {offsets = [0, 128], sizes = [128, 128], strides = [1, 1]} : vector<128x256xf32> to vector<128x128xf32>
    %c0_5 = arith.constant 0 : index
    %c0_6 = arith.constant 0 : index
    %7 = vector.load %arg4[%c0_5, %c0_6] : memref<128x128xf32, #tpu.memory_space<vmem>>, vector<128x128xf32>
    tpu.vector_store %arg4[%c0_5, %c0_6], %6 {strides = array<i32>} : memref<128x128xf32, #tpu.memory_space<vmem>>, vector<128x128xf32>,
    return
  }
  func.func @transform_0(%arg0: i32) -> (i32, i32) {
    %c0_i32 = arith.constant 0 : i32
    %c0_i32_0 = arith.constant 0 : i32
    return %arg0, %c0_i32 : i32, i32
  }
  func.func @transform_1(%arg0: i32) -> (i32, i32) {
    %c0_i32 = arith.constant 0 : i32
    %c0_i32_0 = arith.constant 0 : i32
    %c0_i32_1 = arith.constant 0 : i32
    return %c0_i32, %c0_i32_0 : i32, i32
  }
  func.func @transform_2(%arg0: i32) -> (i32, i32) {
    %c0_i32 = arith.constant 0 : i32
    %c0_i32_0 = arith.constant 0 : i32
    return %arg0, %c0_i32 : i32, i32
  }
  func.func @transform_3(%arg0: i32) -> (i32, i32) {
    %c0_i32 = arith.constant 0 : i32
    %c0_i32_0 = arith.constant 0 : i32
    return %arg0, %c0_i32 : i32, i32
  }
}

module attributes {stable_mosaic.version = 11 : i64} {
  func.func @_gat_attn_kernel(%arg0: i32, %arg1: i32, %arg2: memref<1xi32, #tpu.memory_space<smem>>, %arg3: memref<1xi32, #tpu.memory_space<smem>>, %arg4: memref<128x1xf32, #tpu.memory_space<vmem>>, %arg5: memref<1x128xf32, #tpu.memory_space<vmem>>, %arg6: memref<128x1xf32, #tpu.memory_space<vmem>>, %arg7: memref<128x128xbf16, #tpu.memory_space<vmem>>, %arg8: memref<128x128xi8, #tpu.memory_space<vmem>>, %arg9: memref<1x128xf32, #tpu.memory_space<vmem>>, %arg10: memref<128x128xf32, #tpu.memory_space<vmem>>, %arg11: memref<128x1xf32, #tpu.memory_space<vmem>>, %arg12: memref<128x128xf32, #tpu.memory_space<vmem>>) attributes {dimension_semantics = [#tpu.dimension_semantics<parallel>, #tpu.dimension_semantics<arbitrary>], iteration_bounds = array<i64: 1, 1>, scalar_prefetch = 2 : i64, scratch_operands = 2 : i64, tpu.core_type = #tpu.core_type<tc>, window_params = [{transform_indices = @transform_0, window_bounds = array<i64: 128, 1>}, {transform_indices = @transform_1, window_bounds = array<i64: 1, 128>}, {transform_indices = @transform_2, window_bounds = array<i64: 128, 1>}, {transform_indices = @transform_3, window_bounds = array<i64: 128, 128>}, {transform_indices = @transform_4, window_bounds = array<i64: 128, 128>}, {pipeline_mode = #tpu.pipeline_mode<synchronous>, transform_indices = @transform_5, window_bounds = array<i64: 1, 128>}, {transform_indices = @transform_6, window_bounds = array<i64: 128, 128>}]} {
    %c0_i32 = arith.constant 0 : i32
    %0 = arith.cmpi eq, %arg1, %c0_i32 : i32
    %1 = arith.extui %0 : i1 to i32
    %c0_i32_0 = arith.constant 0 : i32
    %2 = arith.cmpi ne, %1, %c0_i32_0 : i32
    scf.if %2 {
      %cst = arith.constant 0.000000e+00 : f32
      %11 = vector.broadcast %cst : f32 to vector<128x1xf32>
      %c0 = arith.constant 0 : index
      %c0_4 = arith.constant 0 : index
      %12 = vector.load %arg11[%c0, %c0_4] : memref<128x1xf32, #tpu.memory_space<vmem>>, vector<128x1xf32>
      tpu.vector_store %arg11[%c0, %c0_4], %11 {strides = array<i32>} : memref<128x1xf32, #tpu.memory_space<vmem>>, vector<128x1xf32>,
      %cst_5 = arith.constant 0.000000e+00 : f32
      %13 = vector.broadcast %cst_5 : f32 to vector<128x128xf32>
      %c0_6 = arith.constant 0 : index
      %c0_7 = arith.constant 0 : index
      %14 = vector.load %arg12[%c0_6, %c0_7] : memref<128x128xf32, #tpu.memory_space<vmem>>, vector<128x128xf32>
      tpu.vector_store %arg12[%c0_6, %c0_7], %13 {strides = array<i32>} : memref<128x128xf32, #tpu.memory_space<vmem>>, vector<128x128xf32>,
    } else {
    }
    %3 = arith.index_cast %arg0 : i32 to index
    %4 = memref.load %arg3[%3] : memref<1xi32, #tpu.memory_space<smem>>
    %5 = arith.cmpi slt, %arg1, %4 : i32
    %6 = arith.extui %5 : i1 to i32
    %c0_i32_1 = arith.constant 0 : i32
    %7 = arith.cmpi ne, %6, %c0_i32_1 : i32
    scf.if %7 {
      %c0 = arith.constant 0 : index
      %c0_4 = arith.constant 0 : index
      %11 = vector.load %arg8[%c0, %c0_4] : memref<128x128xi8, #tpu.memory_space<vmem>>, vector<128x128xi8>
      %12 = arith.sitofp %11 : vector<128x128xi8> to vector<128x128xf32>
      %cst = arith.constant 0.000000e+00 : f32
      %13 = vector.broadcast %cst : f32 to vector<128x128xf32>
      %14 = arith.cmpf ogt, %12, %13 : vector<128x128xf32>
      %c0_5 = arith.constant 0 : index
      %c0_6 = arith.constant 0 : index
      %15 = vector.load %arg4[%c0_5, %c0_6] : memref<128x1xf32, #tpu.memory_space<vmem>>, vector<128x1xf32>
      %c0_7 = arith.constant 0 : index
      %c0_8 = arith.constant 0 : index
      %16 = vector.load %arg5[%c0_7, %c0_8] : memref<1x128xf32, #tpu.memory_space<vmem>>, vector<1x128xf32>
      %17 = vector.broadcast %15 : vector<128x1xf32> to vector<128x128xf32>
      %18 = vector.broadcast %16 : vector<1x128xf32> to vector<128x128xf32>
      %19 = arith.addf %17, %18 : vector<128x128xf32>
      %cst_9 = arith.constant 2.000000e-01 : f32
      %20 = vector.broadcast %cst_9 : f32 to vector<128x128xf32>
      %21 = arith.mulf %20, %19 : vector<128x128xf32>
      %22 = arith.maximumf %19, %21 : vector<128x128xf32>
      %c0_10 = arith.constant 0 : index
      %c0_11 = arith.constant 0 : index
      %23 = vector.load %arg6[%c0_10, %c0_11] : memref<128x1xf32, #tpu.memory_space<vmem>>, vector<128x1xf32>
      %24 = vector.broadcast %23 : vector<128x1xf32> to vector<128x128xf32>
      %25 = arith.subf %22, %24 : vector<128x128xf32>
      %26 = math.exp %25 : vector<128x128xf32>
      %cst_12 = arith.constant 0.000000e+00 : f32
      %27 = vector.broadcast %cst_12 : f32 to vector<128x128xf32>
      %28 = arith.select %14, %26, %27 : vector<128x128xi1>, vector<128x128xf32>
      %c0_13 = arith.constant 0 : index
      %c0_14 = arith.constant 0 : index
      %29 = vector.load %arg11[%c0_13, %c0_14] : memref<128x1xf32, #tpu.memory_space<vmem>>, vector<128x1xf32>
      %cst_15 = arith.constant dense<0.000000e+00> : vector<128xf32>
      %30 = vector.multi_reduction <add>, %28, %cst_15 [1] : vector<128x128xf32> to vector<128xf32>
      %31 = vector.shape_cast %30 : vector<128xf32> to vector<128x1xf32>
      %32 = arith.addf %29, %31 : vector<128x1xf32>
      %c0_16 = arith.constant 0 : index
      %c0_17 = arith.constant 0 : index
      %33 = vector.load %arg11[%c0_16, %c0_17] : memref<128x1xf32, #tpu.memory_space<vmem>>, vector<128x1xf32>
      tpu.vector_store %arg11[%c0_16, %c0_17], %32 {strides = array<i32>} : memref<128x1xf32, #tpu.memory_space<vmem>>, vector<128x1xf32>,
      %c0_18 = arith.constant 0 : index
      %c0_19 = arith.constant 0 : index
      %34 = vector.load %arg12[%c0_18, %c0_19] : memref<128x128xf32, #tpu.memory_space<vmem>>, vector<128x128xf32>
      %35 = arith.truncf %28 : vector<128x128xf32> to vector<128x128xbf16>
      %c0_20 = arith.constant 0 : index
      %c0_21 = arith.constant 0 : index
      %36 = vector.load %arg7[%c0_20, %c0_21] : memref<128x128xbf16, #tpu.memory_space<vmem>>, vector<128x128xbf16>
      %cst_22 = arith.constant dense<0.000000e+00> : vector<128x128xf32>
      %37 = tpu.matmul %35, %36, %cst_22 {dimension_numbers = #tpu.dot_dimension_numbers<[1], [0], [0], [1], [0, 0, 1, 1], [], []>} : vector<128x128xbf16>, vector<128x128xbf16>, vector<128x128xf32> -> vector<128x128xf32>
      %38 = arith.addf %34, %37 : vector<128x128xf32>
      %c0_23 = arith.constant 0 : index
      %c0_24 = arith.constant 0 : index
      %39 = vector.load %arg12[%c0_23, %c0_24] : memref<128x128xf32, #tpu.memory_space<vmem>>, vector<128x128xf32>
      tpu.vector_store %arg12[%c0_23, %c0_24], %38 {strides = array<i32>} : memref<128x128xf32, #tpu.memory_space<vmem>>, vector<128x128xf32>,
    } else {
    }
    %c0_i32_2 = arith.constant 0 : i32
    %8 = arith.cmpi eq, %arg1, %c0_i32_2 : i32
    %9 = arith.extui %8 : i1 to i32
    %c0_i32_3 = arith.constant 0 : i32
    %10 = arith.cmpi ne, %9, %c0_i32_3 : i32
    scf.if %10 {
      %c0 = arith.constant 0 : index
      %c0_4 = arith.constant 0 : index
      %11 = vector.load %arg11[%c0, %c0_4] : memref<128x1xf32, #tpu.memory_space<vmem>>, vector<128x1xf32>
      %cst = arith.constant 9.99999968E-21 : f32
      %12 = vector.broadcast %cst : f32 to vector<128x1xf32>
      %13 = arith.maximumf %11, %12 : vector<128x1xf32>
      %c0_5 = arith.constant 0 : index
      %c0_6 = arith.constant 0 : index
      %14 = vector.load %arg12[%c0_5, %c0_6] : memref<128x128xf32, #tpu.memory_space<vmem>>, vector<128x128xf32>
      %15 = vector.broadcast %13 : vector<128x1xf32> to vector<128x128xf32>
      %16 = arith.divf %14, %15 : vector<128x128xf32>
      %c0_7 = arith.constant 0 : index
      %c0_8 = arith.constant 0 : index
      %17 = vector.load %arg9[%c0_7, %c0_8] : memref<1x128xf32, #tpu.memory_space<vmem>>, vector<1x128xf32>
      %18 = vector.broadcast %17 : vector<1x128xf32> to vector<128x128xf32>
      %19 = arith.addf %16, %18 : vector<128x128xf32>
      %20 = tpu.iota {dimensions = array<i32: 1>} : vector<128x128xi32>
      %c4_i32 = arith.constant 4 : i32
      %21 = vector.broadcast %c4_i32 : i32 to vector<128x128xi32>
      %22 = arith.cmpi slt, %20, %21 : vector<128x128xi32>
      %cst_9 = arith.constant -1.000000e+30 : f32
      %23 = vector.broadcast %cst_9 : f32 to vector<128x128xf32>
      %24 = arith.select %22, %19, %23 : vector<128x128xi1>, vector<128x128xf32>
      %cst_10 = arith.constant dense<0xFF800000> : vector<128xf32>
      %25 = vector.multi_reduction <maximumf>, %24, %cst_10 [1] : vector<128x128xf32> to vector<128xf32>
      %26 = vector.shape_cast %25 : vector<128xf32> to vector<128x1xf32>
      %27 = vector.broadcast %26 : vector<128x1xf32> to vector<128x128xf32>
      %28 = arith.subf %19, %27 : vector<128x128xf32>
      %29 = math.exp %28 : vector<128x128xf32>
      %cst_11 = arith.constant 0.000000e+00 : f32
      %30 = vector.broadcast %cst_11 : f32 to vector<128x128xf32>
      %31 = arith.select %22, %29, %30 : vector<128x128xi1>, vector<128x128xf32>
      %cst_12 = arith.constant dense<0.000000e+00> : vector<128xf32>
      %32 = vector.multi_reduction <add>, %31, %cst_12 [1] : vector<128x128xf32> to vector<128xf32>
      %33 = vector.shape_cast %32 : vector<128xf32> to vector<128x1xf32>
      %34 = math.log %33 : vector<128x1xf32>
      %35 = vector.broadcast %34 : vector<128x1xf32> to vector<128x128xf32>
      %36 = arith.subf %28, %35 : vector<128x128xf32>
      %c0_13 = arith.constant 0 : index
      %c0_14 = arith.constant 0 : index
      %37 = vector.load %arg10[%c0_13, %c0_14] : memref<128x128xf32, #tpu.memory_space<vmem>>, vector<128x128xf32>
      tpu.vector_store %arg10[%c0_13, %c0_14], %36 {strides = array<i32>} : memref<128x128xf32, #tpu.memory_space<vmem>>, vector<128x128xf32>,
    } else {
    }
    return
  }
  func.func @transform_0(%arg0: i32, %arg1: i32, %arg2: memref<1xi32, #tpu.memory_space<smem>>, %arg3: memref<1xi32, #tpu.memory_space<smem>>) -> (i32, i32) {
    %c0_i32 = arith.constant 0 : i32
    %c0_i32_0 = arith.constant 0 : i32
    return %arg0, %c0_i32 : i32, i32
  }
  func.func @transform_1(%arg0: i32, %arg1: i32, %arg2: memref<1xi32, #tpu.memory_space<smem>>, %arg3: memref<1xi32, #tpu.memory_space<smem>>) -> (i32, i32) {
    %c1_i32 = arith.constant 1 : i32
    %0 = arith.muli %arg0, %c1_i32 : i32
    %1 = arith.addi %0, %arg1 : i32
    %2 = arith.index_cast %1 : i32 to index
    %3 = memref.load %arg2[%2] : memref<1xi32, #tpu.memory_space<smem>>
    %c0_i32 = arith.constant 0 : i32
    %c0_i32_0 = arith.constant 0 : i32
    return %c0_i32, %3 : i32, i32
  }
  func.func @transform_2(%arg0: i32, %arg1: i32, %arg2: memref<1xi32, #tpu.memory_space<smem>>, %arg3: memref<1xi32, #tpu.memory_space<smem>>) -> (i32, i32) {
    %c0_i32 = arith.constant 0 : i32
    %c0_i32_0 = arith.constant 0 : i32
    return %arg0, %c0_i32 : i32, i32
  }
  func.func @transform_3(%arg0: i32, %arg1: i32, %arg2: memref<1xi32, #tpu.memory_space<smem>>, %arg3: memref<1xi32, #tpu.memory_space<smem>>) -> (i32, i32) {
    %c1_i32 = arith.constant 1 : i32
    %0 = arith.muli %arg0, %c1_i32 : i32
    %1 = arith.addi %0, %arg1 : i32
    %2 = arith.index_cast %1 : i32 to index
    %3 = memref.load %arg2[%2] : memref<1xi32, #tpu.memory_space<smem>>
    %c0_i32 = arith.constant 0 : i32
    %c0_i32_0 = arith.constant 0 : i32
    return %3, %c0_i32 : i32, i32
  }
  func.func @transform_4(%arg0: i32, %arg1: i32, %arg2: memref<1xi32, #tpu.memory_space<smem>>, %arg3: memref<1xi32, #tpu.memory_space<smem>>) -> (i32, i32) {
    %c1_i32 = arith.constant 1 : i32
    %0 = arith.muli %arg0, %c1_i32 : i32
    %1 = arith.addi %0, %arg1 : i32
    %2 = arith.index_cast %1 : i32 to index
    %3 = memref.load %arg2[%2] : memref<1xi32, #tpu.memory_space<smem>>
    %c0_i32 = arith.constant 0 : i32
    return %arg0, %3 : i32, i32
  }
  func.func @transform_5(%arg0: i32, %arg1: i32, %arg2: memref<1xi32, #tpu.memory_space<smem>>, %arg3: memref<1xi32, #tpu.memory_space<smem>>) -> (i32, i32) {
    %c0_i32 = arith.constant 0 : i32
    %c0_i32_0 = arith.constant 0 : i32
    %c0_i32_1 = arith.constant 0 : i32
    return %c0_i32, %c0_i32_0 : i32, i32
  }
  func.func @transform_6(%arg0: i32, %arg1: i32, %arg2: memref<1xi32, #tpu.memory_space<smem>>, %arg3: memref<1xi32, #tpu.memory_space<smem>>) -> (i32, i32) {
    %c0_i32 = arith.constant 0 : i32
    %c0_i32_0 = arith.constant 0 : i32
    return %arg0, %c0_i32 : i32, i32
  }
}

module attributes {stable_mosaic.version = 11 : i64} {
  func.func @_gat_attn_kernel(%arg0: i32, %arg1: i32, %arg2: memref<1xi32, #tpu.memory_space<smem>>, %arg3: memref<1xi32, #tpu.memory_space<smem>>, %arg4: memref<128x1xf32, #tpu.memory_space<vmem>>, %arg5: memref<1x128xf32, #tpu.memory_space<vmem>>, %arg6: memref<128x1xf32, #tpu.memory_space<vmem>>, %arg7: memref<128x128xbf16, #tpu.memory_space<vmem>>, %arg8: memref<128x128xi8, #tpu.memory_space<vmem>>, %arg9: memref<1x128xf32, #tpu.memory_space<vmem>>, %arg10: memref<128x128xbf16, #tpu.memory_space<vmem>>, %arg11: memref<128x1xf32, #tpu.memory_space<vmem>>, %arg12: memref<128x128xf32, #tpu.memory_space<vmem>>) attributes {dimension_semantics = [#tpu.dimension_semantics<parallel>, #tpu.dimension_semantics<arbitrary>], iteration_bounds = array<i64: 1, 1>, scalar_prefetch = 2 : i64, scratch_operands = 2 : i64, tpu.core_type = #tpu.core_type<tc>, window_params = [{transform_indices = @transform_0, window_bounds = array<i64: 128, 1>}, {transform_indices = @transform_1, window_bounds = array<i64: 1, 128>}, {transform_indices = @transform_2, window_bounds = array<i64: 128, 1>}, {transform_indices = @transform_3, window_bounds = array<i64: 128, 128>}, {transform_indices = @transform_4, window_bounds = array<i64: 128, 128>}, {pipeline_mode = #tpu.pipeline_mode<synchronous>, transform_indices = @transform_5, window_bounds = array<i64: 1, 128>}, {transform_indices = @transform_6, window_bounds = array<i64: 128, 128>}]} {
    %c0_i32 = arith.constant 0 : i32
    %0 = arith.cmpi eq, %arg1, %c0_i32 : i32
    %1 = arith.extui %0 : i1 to i32
    %c0_i32_0 = arith.constant 0 : i32
    %2 = arith.cmpi ne, %1, %c0_i32_0 : i32
    scf.if %2 {
      %cst = arith.constant 0.000000e+00 : f32
      %11 = vector.broadcast %cst : f32 to vector<128x1xf32>
      %c0 = arith.constant 0 : index
      %c0_4 = arith.constant 0 : index
      %12 = vector.load %arg11[%c0, %c0_4] : memref<128x1xf32, #tpu.memory_space<vmem>>, vector<128x1xf32>
      tpu.vector_store %arg11[%c0, %c0_4], %11 {strides = array<i32>} : memref<128x1xf32, #tpu.memory_space<vmem>>, vector<128x1xf32>,
      %cst_5 = arith.constant 0.000000e+00 : f32
      %13 = vector.broadcast %cst_5 : f32 to vector<128x128xf32>
      %c0_6 = arith.constant 0 : index
      %c0_7 = arith.constant 0 : index
      %14 = vector.load %arg12[%c0_6, %c0_7] : memref<128x128xf32, #tpu.memory_space<vmem>>, vector<128x128xf32>
      tpu.vector_store %arg12[%c0_6, %c0_7], %13 {strides = array<i32>} : memref<128x128xf32, #tpu.memory_space<vmem>>, vector<128x128xf32>,
    } else {
    }
    %3 = arith.index_cast %arg0 : i32 to index
    %4 = memref.load %arg3[%3] : memref<1xi32, #tpu.memory_space<smem>>
    %5 = arith.cmpi slt, %arg1, %4 : i32
    %6 = arith.extui %5 : i1 to i32
    %c0_i32_1 = arith.constant 0 : i32
    %7 = arith.cmpi ne, %6, %c0_i32_1 : i32
    scf.if %7 {
      %c0 = arith.constant 0 : index
      %c0_4 = arith.constant 0 : index
      %11 = vector.load %arg8[%c0, %c0_4] : memref<128x128xi8, #tpu.memory_space<vmem>>, vector<128x128xi8>
      %12 = arith.sitofp %11 : vector<128x128xi8> to vector<128x128xf32>
      %cst = arith.constant 0.000000e+00 : f32
      %13 = vector.broadcast %cst : f32 to vector<128x128xf32>
      %14 = arith.cmpf ogt, %12, %13 : vector<128x128xf32>
      %c0_5 = arith.constant 0 : index
      %c0_6 = arith.constant 0 : index
      %15 = vector.load %arg4[%c0_5, %c0_6] : memref<128x1xf32, #tpu.memory_space<vmem>>, vector<128x1xf32>
      %c0_7 = arith.constant 0 : index
      %c0_8 = arith.constant 0 : index
      %16 = vector.load %arg5[%c0_7, %c0_8] : memref<1x128xf32, #tpu.memory_space<vmem>>, vector<1x128xf32>
      %17 = vector.broadcast %15 : vector<128x1xf32> to vector<128x128xf32>
      %18 = vector.broadcast %16 : vector<1x128xf32> to vector<128x128xf32>
      %19 = arith.addf %17, %18 : vector<128x128xf32>
      %cst_9 = arith.constant 2.000000e-01 : f32
      %20 = vector.broadcast %cst_9 : f32 to vector<128x128xf32>
      %21 = arith.mulf %20, %19 : vector<128x128xf32>
      %22 = arith.maximumf %19, %21 : vector<128x128xf32>
      %c0_10 = arith.constant 0 : index
      %c0_11 = arith.constant 0 : index
      %23 = vector.load %arg6[%c0_10, %c0_11] : memref<128x1xf32, #tpu.memory_space<vmem>>, vector<128x1xf32>
      %24 = vector.broadcast %23 : vector<128x1xf32> to vector<128x128xf32>
      %25 = arith.subf %22, %24 : vector<128x128xf32>
      %26 = math.exp %25 : vector<128x128xf32>
      %cst_12 = arith.constant 0.000000e+00 : f32
      %27 = vector.broadcast %cst_12 : f32 to vector<128x128xf32>
      %28 = arith.select %14, %26, %27 : vector<128x128xi1>, vector<128x128xf32>
      %c0_13 = arith.constant 0 : index
      %c0_14 = arith.constant 0 : index
      %29 = vector.load %arg11[%c0_13, %c0_14] : memref<128x1xf32, #tpu.memory_space<vmem>>, vector<128x1xf32>
      %cst_15 = arith.constant dense<0.000000e+00> : vector<128xf32>
      %30 = vector.multi_reduction <add>, %28, %cst_15 [1] : vector<128x128xf32> to vector<128xf32>
      %31 = vector.shape_cast %30 : vector<128xf32> to vector<128x1xf32>
      %32 = arith.addf %29, %31 : vector<128x1xf32>
      %c0_16 = arith.constant 0 : index
      %c0_17 = arith.constant 0 : index
      %33 = vector.load %arg11[%c0_16, %c0_17] : memref<128x1xf32, #tpu.memory_space<vmem>>, vector<128x1xf32>
      tpu.vector_store %arg11[%c0_16, %c0_17], %32 {strides = array<i32>} : memref<128x1xf32, #tpu.memory_space<vmem>>, vector<128x1xf32>,
      %c0_18 = arith.constant 0 : index
      %c0_19 = arith.constant 0 : index
      %34 = vector.load %arg12[%c0_18, %c0_19] : memref<128x128xf32, #tpu.memory_space<vmem>>, vector<128x128xf32>
      %35 = arith.truncf %28 : vector<128x128xf32> to vector<128x128xbf16>
      %c0_20 = arith.constant 0 : index
      %c0_21 = arith.constant 0 : index
      %36 = vector.load %arg7[%c0_20, %c0_21] : memref<128x128xbf16, #tpu.memory_space<vmem>>, vector<128x128xbf16>
      %cst_22 = arith.constant dense<0.000000e+00> : vector<128x128xf32>
      %37 = tpu.matmul %35, %36, %cst_22 {dimension_numbers = #tpu.dot_dimension_numbers<[1], [0], [0], [1], [0, 0, 1, 1], [], []>} : vector<128x128xbf16>, vector<128x128xbf16>, vector<128x128xf32> -> vector<128x128xf32>
      %38 = arith.addf %34, %37 : vector<128x128xf32>
      %c0_23 = arith.constant 0 : index
      %c0_24 = arith.constant 0 : index
      %39 = vector.load %arg12[%c0_23, %c0_24] : memref<128x128xf32, #tpu.memory_space<vmem>>, vector<128x128xf32>
      tpu.vector_store %arg12[%c0_23, %c0_24], %38 {strides = array<i32>} : memref<128x128xf32, #tpu.memory_space<vmem>>, vector<128x128xf32>,
    } else {
    }
    %c0_i32_2 = arith.constant 0 : i32
    %8 = arith.cmpi eq, %arg1, %c0_i32_2 : i32
    %9 = arith.extui %8 : i1 to i32
    %c0_i32_3 = arith.constant 0 : i32
    %10 = arith.cmpi ne, %9, %c0_i32_3 : i32
    scf.if %10 {
      %c0 = arith.constant 0 : index
      %c0_4 = arith.constant 0 : index
      %11 = vector.load %arg11[%c0, %c0_4] : memref<128x1xf32, #tpu.memory_space<vmem>>, vector<128x1xf32>
      %cst = arith.constant 9.99999968E-21 : f32
      %12 = vector.broadcast %cst : f32 to vector<128x1xf32>
      %13 = arith.maximumf %11, %12 : vector<128x1xf32>
      %c0_5 = arith.constant 0 : index
      %c0_6 = arith.constant 0 : index
      %14 = vector.load %arg12[%c0_5, %c0_6] : memref<128x128xf32, #tpu.memory_space<vmem>>, vector<128x128xf32>
      %15 = tpu.reciprocal %13 {approx = true} : vector<128x1xf32> -> vector<128x1xf32>
      %16 = vector.broadcast %15 : vector<128x1xf32> to vector<128x128xf32>
      %17 = arith.mulf %14, %16 : vector<128x128xf32>
      %c0_7 = arith.constant 0 : index
      %c0_8 = arith.constant 0 : index
      %18 = vector.load %arg9[%c0_7, %c0_8] : memref<1x128xf32, #tpu.memory_space<vmem>>, vector<1x128xf32>
      %19 = vector.broadcast %18 : vector<1x128xf32> to vector<128x128xf32>
      %20 = arith.addf %17, %19 : vector<128x128xf32>
      %21 = arith.truncf %20 : vector<128x128xf32> to vector<128x128xbf16>
      %c0_9 = arith.constant 0 : index
      %c0_10 = arith.constant 0 : index
      %22 = vector.load %arg10[%c0_9, %c0_10] : memref<128x128xbf16, #tpu.memory_space<vmem>>, vector<128x128xbf16>
      tpu.vector_store %arg10[%c0_9, %c0_10], %21 {strides = array<i32>} : memref<128x128xbf16, #tpu.memory_space<vmem>>, vector<128x128xbf16>,
    } else {
    }
    return
  }
  func.func @transform_0(%arg0: i32, %arg1: i32, %arg2: memref<1xi32, #tpu.memory_space<smem>>, %arg3: memref<1xi32, #tpu.memory_space<smem>>) -> (i32, i32) {
    %c0_i32 = arith.constant 0 : i32
    %c0_i32_0 = arith.constant 0 : i32
    return %arg0, %c0_i32 : i32, i32
  }
  func.func @transform_1(%arg0: i32, %arg1: i32, %arg2: memref<1xi32, #tpu.memory_space<smem>>, %arg3: memref<1xi32, #tpu.memory_space<smem>>) -> (i32, i32) {
    %c1_i32 = arith.constant 1 : i32
    %0 = arith.muli %arg0, %c1_i32 : i32
    %1 = arith.addi %0, %arg1 : i32
    %2 = arith.index_cast %1 : i32 to index
    %3 = memref.load %arg2[%2] : memref<1xi32, #tpu.memory_space<smem>>
    %c0_i32 = arith.constant 0 : i32
    %c0_i32_0 = arith.constant 0 : i32
    return %c0_i32, %3 : i32, i32
  }
  func.func @transform_2(%arg0: i32, %arg1: i32, %arg2: memref<1xi32, #tpu.memory_space<smem>>, %arg3: memref<1xi32, #tpu.memory_space<smem>>) -> (i32, i32) {
    %c0_i32 = arith.constant 0 : i32
    %c0_i32_0 = arith.constant 0 : i32
    return %arg0, %c0_i32 : i32, i32
  }
  func.func @transform_3(%arg0: i32, %arg1: i32, %arg2: memref<1xi32, #tpu.memory_space<smem>>, %arg3: memref<1xi32, #tpu.memory_space<smem>>) -> (i32, i32) {
    %c1_i32 = arith.constant 1 : i32
    %0 = arith.muli %arg0, %c1_i32 : i32
    %1 = arith.addi %0, %arg1 : i32
    %2 = arith.index_cast %1 : i32 to index
    %3 = memref.load %arg2[%2] : memref<1xi32, #tpu.memory_space<smem>>
    %c0_i32 = arith.constant 0 : i32
    %c0_i32_0 = arith.constant 0 : i32
    return %3, %c0_i32 : i32, i32
  }
  func.func @transform_4(%arg0: i32, %arg1: i32, %arg2: memref<1xi32, #tpu.memory_space<smem>>, %arg3: memref<1xi32, #tpu.memory_space<smem>>) -> (i32, i32) {
    %c1_i32 = arith.constant 1 : i32
    %0 = arith.muli %arg0, %c1_i32 : i32
    %1 = arith.addi %0, %arg1 : i32
    %2 = arith.index_cast %1 : i32 to index
    %3 = memref.load %arg2[%2] : memref<1xi32, #tpu.memory_space<smem>>
    %c0_i32 = arith.constant 0 : i32
    return %arg0, %3 : i32, i32
  }
  func.func @transform_5(%arg0: i32, %arg1: i32, %arg2: memref<1xi32, #tpu.memory_space<smem>>, %arg3: memref<1xi32, #tpu.memory_space<smem>>) -> (i32, i32) {
    %c0_i32 = arith.constant 0 : i32
    %c0_i32_0 = arith.constant 0 : i32
    %c0_i32_1 = arith.constant 0 : i32
    return %c0_i32, %c0_i32_0 : i32, i32
  }
  func.func @transform_6(%arg0: i32, %arg1: i32, %arg2: memref<1xi32, #tpu.memory_space<smem>>, %arg3: memref<1xi32, #tpu.memory_space<smem>>) -> (i32, i32) {
    %c0_i32 = arith.constant 0 : i32
    %c0_i32_0 = arith.constant 0 : i32
    return %arg0, %c0_i32 : i32, i32
  }
}

module attributes {stable_mosaic.version = 11 : i64} {
  func.func @_gat_project_kernel(%arg0: i32, %arg1: memref<128x128xbf16, #tpu.memory_space<vmem>>, %arg2: memref<128x256xbf16, #tpu.memory_space<vmem>>, %arg3: memref<128x128xbf16, #tpu.memory_space<vmem>>, %arg4: memref<128x128xf32, #tpu.memory_space<vmem>>) attributes {dimension_semantics = [#tpu.dimension_semantics<parallel>], iteration_bounds = array<i64: 1>, scalar_prefetch = 0 : i64, scratch_operands = 0 : i64, tpu.core_type = #tpu.core_type<tc>, window_params = [{transform_indices = @transform_0, window_bounds = array<i64: 128, 128>}, {pipeline_mode = #tpu.pipeline_mode<synchronous>, transform_indices = @transform_1, window_bounds = array<i64: 128, 256>}, {transform_indices = @transform_2, window_bounds = array<i64: 128, 128>}, {transform_indices = @transform_3, window_bounds = array<i64: 128, 128>}]} {
    %c0 = arith.constant 0 : index
    %c0_0 = arith.constant 0 : index
    %0 = vector.load %arg1[%c0, %c0_0] : memref<128x128xbf16, #tpu.memory_space<vmem>>, vector<128x128xbf16>
    %c0_1 = arith.constant 0 : index
    %c0_2 = arith.constant 0 : index
    %1 = vector.load %arg2[%c0_1, %c0_2] : memref<128x256xbf16, #tpu.memory_space<vmem>>, vector<128x256xbf16>
    %cst = arith.constant dense<0.000000e+00> : vector<128x256xf32>
    %2 = tpu.matmul %0, %1, %cst {dimension_numbers = #tpu.dot_dimension_numbers<[1], [0], [0], [1], [0, 0, 1, 1], [], []>} : vector<128x128xbf16>, vector<128x256xbf16>, vector<128x256xf32> -> vector<128x256xf32>
    %3 = vector.extract_strided_slice %2 {offsets = [0, 0], sizes = [128, 128], strides = [1, 1]} : vector<128x256xf32> to vector<128x128xf32>
    %4 = arith.truncf %3 : vector<128x128xf32> to vector<128x128xbf16>
    %c0_3 = arith.constant 0 : index
    %c0_4 = arith.constant 0 : index
    %5 = vector.load %arg3[%c0_3, %c0_4] : memref<128x128xbf16, #tpu.memory_space<vmem>>, vector<128x128xbf16>
    tpu.vector_store %arg3[%c0_3, %c0_4], %4 {strides = array<i32>} : memref<128x128xbf16, #tpu.memory_space<vmem>>, vector<128x128xbf16>,
    %6 = vector.extract_strided_slice %2 {offsets = [0, 128], sizes = [128, 128], strides = [1, 1]} : vector<128x256xf32> to vector<128x128xf32>
    %c0_5 = arith.constant 0 : index
    %c0_6 = arith.constant 0 : index
    %7 = vector.load %arg4[%c0_5, %c0_6] : memref<128x128xf32, #tpu.memory_space<vmem>>, vector<128x128xf32>
    tpu.vector_store %arg4[%c0_5, %c0_6], %6 {strides = array<i32>} : memref<128x128xf32, #tpu.memory_space<vmem>>, vector<128x128xf32>,
    return
  }
  func.func @transform_0(%arg0: i32) -> (i32, i32) {
    %c0_i32 = arith.constant 0 : i32
    %c0_i32_0 = arith.constant 0 : i32
    return %arg0, %c0_i32 : i32, i32
  }
  func.func @transform_1(%arg0: i32) -> (i32, i32) {
    %c0_i32 = arith.constant 0 : i32
    %c0_i32_0 = arith.constant 0 : i32
    %c0_i32_1 = arith.constant 0 : i32
    return %c0_i32, %c0_i32_0 : i32, i32
  }
  func.func @transform_2(%arg0: i32) -> (i32, i32) {
    %c0_i32 = arith.constant 0 : i32
    %c0_i32_0 = arith.constant 0 : i32
    return %arg0, %c0_i32 : i32, i32
  }
  func.func @transform_3(%arg0: i32) -> (i32, i32) {
    %c0_i32 = arith.constant 0 : i32
    %c0_i32_0 = arith.constant 0 : i32
    return %arg0, %c0_i32 : i32, i32
  }
}

</mosaic_0001>

<bundles_post_ra>
// kernel: gat_forward.6
= control target key start
LH: loop header
LB: loop body
LE: loop exit
PB: predicated region body
PF: predicated region fallthrough
CT: control target
= control target key end

     0   :  { %9 = vsyncpa [#allocation3], 0  ;;  %s556_s15 = smov [#allocation2]   ;;  %s557_s17 = smov 128   ;;  %s678_s0 = inlined_call_operand.vmem [shape: bf16[128,128], index: 0, kind: input, shape index: {}]   ;;  %s679_s1 = inlined_call_operand.hbm [shape: bf16[128,256], index: 1, kind: input, shape index: {}]   ;;  %s680_s2 = inlined_call_operand.vmem [shape: bf16[128,128], index: 2, kind: output, shape index: {0}]   ;;  %s681_s3 = inlined_call_operand.vmem [shape: f32[128,128], index: 3, kind: output, shape index: {1}]  }
   0x1   :  { %s16_s14 = sshll.u32 %s679_s1, 4  ;;  %s18_s16 = sshll.u32 %s556_s15, 4  ;;  %s17_s14 = int_to_ptr.hbm [resolvable:$true] %s16_s14  ;;  %s19_s16 = int_to_ptr.vmem [resolvable:$true] %s18_s16 }
   0x2   :  { %s558_s18 = smov 8  }
   0x3   :  { %24 = dma.hbm_to_vmem [thread:$0]  %s17_s14, 2048, %s19_s16, [#allocation3], %s557_s17, %s557_s17, %s558_s18  }
   0x4   :  { %554 = dma.done.wait [#allocation3], 2048  }
   0x5   :  { %555 = vsyncadd [#allocation3], 4294965248  ;;  %v434_v0 = vld [vmem:[#allocation2 + $0x70] sm:$0xf]  ;;  %v463_v1 = vld [vmem:[#allocation2 + $0x74] sm:$0xf0] }
   0x6   :  { %v462_v2 = vld [vmem:[#allocation2 + $0x74] sm:$0xf]  ;;  %v435_v3 = vor.u32 %v463_v1, %v434_v0  ;;  %v436_v4 = vld [vmem:[#allocation2 + $0x78] sm:$0xf0]  ;;  %v426_v5 = vld [vmem:[#allocation2 + $0x60] sm:$0xf] }
   0x7   :  { %v461_v6 = vld [vmem:[#allocation2 + $0x64] sm:$0xf0]  ;;  %v439_v7 = vor.u32 %v462_v2, %v436_v4  ;;  %v460_v8 = vld [vmem:[#allocation2 + $0x64] sm:$0xf]  ;;  %v428_v9 = vld [vmem:[#allocation2 + $0x68] sm:$0xf0] }
   0x8   :  { %189 = vmatpush.bf16.msra.mxu0 %v435_v3  ;;  %511 = vmatpush.bf16.msra.mxu2 %v435_v3  ;;  %v427_v10 = vor.u32 %v461_v6, %v426_v5  ;;  %v431_v11 = vor.u32 %v460_v8, %v428_v9  ;;  %v418_v12 = vld [vmem:[#allocation2 + $0x50] sm:$0xf]  ;;  %v459_v13 = vld [vmem:[#allocation2 + $0x54] sm:$0xf0]  ;;  %v458_v14 = vld [vmem:[#allocation2 + $0x54] sm:$0xf] }
   0x9   :  { %238 = vmatpush.bf16.msra.mxu1 %v439_v7  ;;  %519 = vmatpush.bf16.msra.mxu3 %v439_v7  ;;  %v420_v15 = vld [vmem:[#allocation2 + $0x58] sm:$0xf0]  ;;  %v419_v16 = vor.u32 %v459_v13, %v418_v12  ;;  %v410_v18 = vld [vmem:[#allocation2 + $0x40] sm:$0xf]  ;;  %v457_v19 = vld [vmem:[#allocation2 + $0x44] sm:$0xf0] }
   0xa   :  { %v423_v17 = vor.u32 %v458_v14, %v420_v15  ;;  %v456_v20 = vld [vmem:[#allocation2 + $0x44] sm:$0xf]  ;;  %v412_v21 = vld [vmem:[#allocation2 + $0x48] sm:$0xf0]  ;;  %v411_v22 = vor.u32 %v457_v19, %v410_v18  ;;  %v402_v24 = vld [vmem:[#allocation2 + $0x30] sm:$0xf] }
   0xb   :  { %v415_v23 = vor.u32 %v456_v20, %v412_v21  ;;  %v455_v25 = vld [vmem:[#allocation2 + $0x34] sm:$0xf0]  ;;  %v454_v26 = vld [vmem:[#allocation2 + $0x34] sm:$0xf]  ;;  %v404_v27 = vld [vmem:[#allocation2 + $0x38] sm:$0xf0] }
   0xc   :  { %190 = vmatpush.bf16.msra.mxu0 %v427_v10  ;;  %512 = vmatpush.bf16.msra.mxu2 %v427_v10  ;;  %v403_v28 = vor.u32 %v455_v25, %v402_v24  ;;  %v407_v29 = vor.u32 %v454_v26, %v404_v27  ;;  %v394_v30 = vld [vmem:[#allocation2 + $0x20] sm:$0xf]  ;;  %v453_v31 = vld [vmem:[#allocation2 + $0x24] sm:$0xf0]  ;;  %v452_v32 = vld [vmem:[#allocation2 + $0x24] sm:$0xf] }
   0xd   :  { %239 = vmatpush.bf16.msra.mxu1 %v431_v11  ;;  %520 = vmatpush.bf16.msra.mxu3 %v431_v11  ;;  %v396_v33 = vld [vmem:[#allocation2 + $0x28] sm:$0xf0]  ;;  %v395_v34 = vor.u32 %v453_v31, %v394_v30  ;;  %v386_v36 = vld [vmem:[#allocation2 + $0x10] sm:$0xf]  ;;  %v451_v37 = vld [vmem:[#allocation2 + $0x14] sm:$0xf0] }
   0xe   :  { %v399_v35 = vor.u32 %v452_v32, %v396_v33  ;;  %v450_v38 = vld [vmem:[#allocation2 + $0x14] sm:$0xf]  ;;  %v388_v39 = vld [vmem:[#allocation2 + $0x18] sm:$0xf0]  ;;  %v387_v40 = vor.u32 %v451_v37, %v386_v36  ;;  %v378_v42 = vld [vmem:[#allocation2] sm:$0xf] }
   0xf   :  { %v391_v41 = vor.u32 %v450_v38, %v388_v39  ;;  %v449_v43 = vld [vmem:[#allocation2 + $0x4] sm:$0xf0]  ;;  %v448_v44 = vld [vmem:[#allocation2 + $0x4] sm:$0xf]  ;;  %v380_v45 = vld [vmem:[#allocation2 + $0x8] sm:$0xf0] }
  0x10   :  { %191 = vmatpush.bf16.msra.mxu0 %v419_v16  ;;  %513 = vmatpush.bf16.msra.mxu2 %v419_v16  ;;  %v379_v46 = vor.u32 %v449_v43, %v378_v42  ;;  %v383_v47 = vor.u32 %v448_v44, %v380_v45  ;;  %v440_v48 = vld [vmem:[%s678_s0] sm:$0xff]  ;;  %v441_v50 = vld [vmem:[%s678_s0 + $0x8] sm:$0xff]  ;;  %v442_v52 = vld [vmem:[%s678_s0 + $0x10] sm:$0xff] }
  0x11   :  { %240 = vmatpush.bf16.msra.mxu1 %v423_v17  ;;  %521 = vmatpush.bf16.msra.mxu3 %v423_v17  ;;  %v444_v49 = vld [vmem:[%s678_s0 + $0x20] sm:$0xff]  ;;  %v445_v51 = vld [vmem:[%s678_s0 + $0x28] sm:$0xff]  ;;  %v446_v53 = vld [vmem:[%s678_s0 + $0x30] sm:$0xff] }
  0x12   :  { %v443_v54 = vld [vmem:[%s678_s0 + $0x18] sm:$0xff] }
  0x13   :  { %v447_v55 = vld [vmem:[%s678_s0 + $0x38] sm:$0xff] }
  0x14   :  { %192 = vmatpush.bf16.msra.mxu0 %v411_v22  ;;  %514 = vmatpush.bf16.msra.mxu2 %v411_v22 }
  0x15   :  { %241 = vmatpush.bf16.msra.mxu1 %v415_v23  ;;  %522 = vmatpush.bf16.msra.mxu3 %v415_v23 }
  0x18   :  { %193 = vmatpush.bf16.msra.mxu0 %v403_v28  ;;  %515 = vmatpush.bf16.msra.mxu2 %v403_v28 }
  0x19   :  { %242 = vmatpush.bf16.msra.mxu1 %v407_v29  ;;  %523 = vmatpush.bf16.msra.mxu3 %v407_v29 }
  0x1c   :  { %194 = vmatpush.bf16.msra.mxu0 %v395_v34  ;;  %516 = vmatpush.bf16.msra.mxu2 %v395_v34 }
  0x1d   :  { %243 = vmatpush.bf16.msra.mxu1 %v399_v35  ;;  %524 = vmatpush.bf16.msra.mxu3 %v399_v35 }
  0x20   :  { %195 = vmatpush.bf16.msra.mxu0 %v387_v40  ;;  %517 = vmatpush.bf16.msra.mxu2 %v387_v40 }
  0x21   :  { %244 = vmatpush.bf16.msra.mxu1 %v391_v41  ;;  %525 = vmatpush.bf16.msra.mxu3 %v391_v41 }
  0x24   :  { %196 = vmatpush.bf16.msra.mxu0 %v379_v46  ;;  %518 = vmatpush.bf16.msra.mxu2 %v379_v46 }
  0x25   :  { %245 = vmatpush.bf16.msra.mxu1 %v383_v47  ;;  %526 = vmatpush.bf16.msra.mxu3 %v383_v47 }
  0x27   :  { %197 = vmatmul.bf16.vlgmr.msra.gmra.mxu0 %v440_v48  ;;  %217 = vmatmul.bf16.vlgmr.msra.gmra.mxu2 %v444_v49 }
  0x28   :  { %246 = vmatmul.bf16.vlgmr.msra.gmra.mxu1 %v440_v48  ;;  %266 = vmatmul.bf16.vlgmr.msra.gmra.mxu3 %v444_v49 }
  0x37   :  { %202 = vmatmul.bf16.gmra.mxu0 %v441_v50  ;;  %222 = vmatmul.bf16.gmra.mxu2 %v445_v51 }
  0x38   :  { %251 = vmatmul.bf16.gmra.mxu1 %v441_v50  ;;  %271 = vmatmul.bf16.gmra.mxu3 %v445_v51 }
  0x47   :  { %207 = vmatmul.bf16.gmra.mxu0 %v442_v52  ;;  %227 = vmatmul.bf16.gmra.mxu2 %v446_v53 }
  0x48   :  { %256 = vmatmul.bf16.gmra.mxu1 %v442_v52  ;;  %276 = vmatmul.bf16.gmra.mxu3 %v446_v53 }
  0x57   :  { %212 = vmatmul.bf16.gmra.mxu0 %v443_v54  ;;  %232 = vmatmul.bf16.gmra.mxu2 %v447_v55 }
  0x58   :  { %261 = vmatmul.bf16.gmra.mxu1 %v443_v54  ;;  %281 = vmatmul.bf16.gmra.mxu3 %v447_v55 }
  0xa4   :  { %v198_v56 = vpop.f32.mrf.mxu0 }
  0xa5   :  { %v247_v57 = vpop.f32.mrf.mxu1 }
  0xa6   :  { %319 = vst [vmem:[%s681_s3] sm:$0xff] %v247_v57 }
  0xaa   :  { %v218_v58 = vpop.f32.mrf.mxu2 }
  0xab   :  { %v267_v59 = vpop.f32.mrf.mxu3 }
  0xac   :  { %327 = vst [vmem:[%s681_s3 + $0x40] sm:$0xff] %v267_v59  ;;  %v200_v60 = vpop.f32.mrf.mxu0 }
  0xad   :  { %v467_v61 = vpack.c.bf16 %v200_v60, %v198_v56  ;;  %v249_v62 = vpop.f32.mrf.mxu1 }
  0xae   :  { %320 = vst [vmem:[%s681_s3 + $0x8] sm:$0xff] %v249_v62 }
  0xaf   :  { %468 = vst [vmem:[%s680_s2] sm:$0xff] %v467_v61  }
  0xb2   :  { %v220_v63 = vpop.f32.mrf.mxu2 }
  0xb3   :  { %v487_v0 = vpack.c.bf16 %v220_v63, %v218_v58  ;;  %v269_v1 = vpop.f32.mrf.mxu3 }
  0xb4   :  { %328 = vst [vmem:[%s681_s3 + $0x48] sm:$0xff] %v269_v1  ;;  %v203_v2 = vpop.f32.mrf.mxu0 }
  0xb5   :  { %507 = vst [vmem:[%s680_s2 + $0x20] sm:$0xff] %v487_v0   ;;  %v252_v3 = vpop.f32.mrf.mxu1 }
  0xb6   :  { %321 = vst [vmem:[%s681_s3 + $0x10] sm:$0xff] %v252_v3 }
  0xba   :  { %v223_v4 = vpop.f32.mrf.mxu2 }
  0xbb   :  { %v272_v5 = vpop.f32.mrf.mxu3 }
  0xbc   :  { %329 = vst [vmem:[%s681_s3 + $0x50] sm:$0xff] %v272_v5  ;;  %v205_v6 = vpop.f32.mrf.mxu0 }
  0xbd   :  { %v472_v7 = vpack.c.bf16 %v205_v6, %v203_v2  ;;  %v254_v8 = vpop.f32.mrf.mxu1 }
  0xbe   :  { %322 = vst [vmem:[%s681_s3 + $0x18] sm:$0xff] %v254_v8 }
  0xbf   :  { %504 = vst [vmem:[%s680_s2 + $0x8] sm:$0xff] %v472_v7  }
  0xc2   :  { %v225_v9 = vpop.f32.mrf.mxu2 }
  0xc3   :  { %v492_v10 = vpack.c.bf16 %v225_v9, %v223_v4  ;;  %v274_v11 = vpop.f32.mrf.mxu3 }
  0xc4   :  { %330 = vst [vmem:[%s681_s3 + $0x58] sm:$0xff] %v274_v11  ;;  %v208_v12 = vpop.f32.mrf.mxu0 }
  0xc5   :  { %508 = vst [vmem:[%s680_s2 + $0x28] sm:$0xff] %v492_v10   ;;  %v257_v13 = vpop.f32.mrf.mxu1 }
  0xc6   :  { %323 = vst [vmem:[%s681_s3 + $0x20] sm:$0xff] %v257_v13 }
  0xca   :  { %v228_v14 = vpop.f32.mrf.mxu2 }
  0xcb   :  { %v277_v15 = vpop.f32.mrf.mxu3 }
  0xcc   :  { %331 = vst [vmem:[%s681_s3 + $0x60] sm:$0xff] %v277_v15  ;;  %v210_v16 = vpop.f32.mrf.mxu0 }
  0xcd   :  { %v477_v17 = vpack.c.bf16 %v210_v16, %v208_v12  ;;  %v259_v18 = vpop.f32.mrf.mxu1 }
  0xce   :  { %324 = vst [vmem:[%s681_s3 + $0x28] sm:$0xff] %v259_v18 }
  0xcf   :  { %505 = vst [vmem:[%s680_s2 + $0x10] sm:$0xff] %v477_v17  }
  0xd2   :  { %v230_v19 = vpop.f32.mrf.mxu2 }
  0xd3   :  { %v497_v20 = vpack.c.bf16 %v230_v19, %v228_v14  ;;  %v279_v21 = vpop.f32.mrf.mxu3 }
  0xd4   :  { %332 = vst [vmem:[%s681_s3 + $0x68] sm:$0xff] %v279_v21  ;;  %v213_v22 = vpop.f32.mrf.mxu0 }
  0xd5   :  { %509 = vst [vmem:[%s680_s2 + $0x30] sm:$0xff] %v497_v20   ;;  %v262_v23 = vpop.f32.mrf.mxu1 }
  0xd6   :  { %325 = vst [vmem:[%s681_s3 + $0x30] sm:$0xff] %v262_v23 }
  0xda   :  { %v233_v24 = vpop.f32.mrf.mxu2 }
  0xdb   :  { %v282_v25 = vpop.f32.mrf.mxu3 }
  0xdc   :  { %333 = vst [vmem:[%s681_s3 + $0x70] sm:$0xff] %v282_v25  ;;  %v215_v26 = vpop.f32.mrf.mxu0 }
  0xdd   :  { %v482_v27 = vpack.c.bf16 %v215_v26, %v213_v22  ;;  %v264_v28 = vpop.f32.mrf.mxu1 }
  0xde   :  { %326 = vst [vmem:[%s681_s3 + $0x38] sm:$0xff] %v264_v28 }
  0xdf   :  { %506 = vst [vmem:[%s680_s2 + $0x18] sm:$0xff] %v482_v27  }
  0xe2   :  { %v235_v29 = vpop.f32.mrf.mxu2 }
  0xe3   :  { %v502_v30 = vpack.c.bf16 %v235_v29, %v233_v24  ;;  %v284_v31 = vpop.f32.mrf.mxu3 }
  0xe4   :  { %334 = vst [vmem:[%s681_s3 + $0x78] sm:$0xff] %v284_v31 }
  0xe5   :  { %510 = vst [vmem:[%s680_s2 + $0x38] sm:$0xff] %v502_v30  }
  0xe6   :  { %343 = vsyncpa [#allocation3], 1 }

// kernel: gat_forward.8
= control target key start
LH: loop header
LB: loop body
LE: loop exit
PB: predicated region body
PF: predicated region fallthrough
CT: control target
= control target key end

     0   :  { %s722_s1 = inlined_call_operand.vmem [shape: bf16[128,256], index: 1, kind: input, shape index: {}]   ;;  %s723_s0 = inlined_call_operand.vmem [shape: bf16[128,128], index: 0, kind: input, shape index: {}]   ;;  %s724_s3 = inlined_call_operand.vmem [shape: f32[128,128], index: 3, kind: output, shape index: {1}]   ;;  %s725_s2 = inlined_call_operand.vmem [shape: bf16[128,128], index: 2, kind: output, shape index: {0}]  }
   0x1   :  { %v417_v0 = vld [vmem:[%s722_s1 + $0x70] sm:$0xf]  ;;  %v446_v1 = vld [vmem:[%s722_s1 + $0x74] sm:$0xf0]  ;;  %v445_v2 = vld [vmem:[%s722_s1 + $0x74] sm:$0xf] }
   0x2   :  { %v418_v3 = vor.u32 %v446_v1, %v417_v0  ;;  %v419_v4 = vld [vmem:[%s722_s1 + $0x78] sm:$0xf0]  ;;  %v409_v5 = vld [vmem:[%s722_s1 + $0x60] sm:$0xf]  ;;  %v444_v6 = vld [vmem:[%s722_s1 + $0x64] sm:$0xf0] }
   0x3   :  { %v422_v7 = vor.u32 %v445_v2, %v419_v4  ;;  %v443_v8 = vld [vmem:[%s722_s1 + $0x64] sm:$0xf]  ;;  %v411_v9 = vld [vmem:[%s722_s1 + $0x68] sm:$0xf0]  ;;  %v410_v10 = vor.u32 %v444_v6, %v409_v5  ;;  %v401_v12 = vld [vmem:[%s722_s1 + $0x50] sm:$0xf] }
   0x4   :  { %173 = vmatpush.bf16.msra.mxu0 %v418_v3  ;;  %494 = vmatpush.bf16.msra.mxu2 %v418_v3  ;;  %v414_v11 = vor.u32 %v443_v8, %v411_v9  ;;  %v442_v13 = vld [vmem:[%s722_s1 + $0x54] sm:$0xf0]  ;;  %v441_v14 = vld [vmem:[%s722_s1 + $0x54] sm:$0xf]  ;;  %v403_v15 = vld [vmem:[%s722_s1 + $0x58] sm:$0xf0] }
   0x5   :  { %222 = vmatpush.bf16.msra.mxu1 %v422_v7  ;;  %502 = vmatpush.bf16.msra.mxu3 %v422_v7  ;;  %v402_v16 = vor.u32 %v442_v13, %v401_v12  ;;  %v406_v17 = vor.u32 %v441_v14, %v403_v15  ;;  %v393_v18 = vld [vmem:[%s722_s1 + $0x40] sm:$0xf]  ;;  %v440_v19 = vld [vmem:[%s722_s1 + $0x44] sm:$0xf0]  ;;  %v439_v20 = vld [vmem:[%s722_s1 + $0x44] sm:$0xf] }
   0x6   :  { %v395_v21 = vld [vmem:[%s722_s1 + $0x48] sm:$0xf0]  ;;  %v394_v22 = vor.u32 %v440_v19, %v393_v18  ;;  %v385_v24 = vld [vmem:[%s722_s1 + $0x30] sm:$0xf]  ;;  %v438_v25 = vld [vmem:[%s722_s1 + $0x34] sm:$0xf0] }
   0x7   :  { %v398_v23 = vor.u32 %v439_v20, %v395_v21  ;;  %v437_v26 = vld [vmem:[%s722_s1 + $0x34] sm:$0xf]  ;;  %v387_v27 = vld [vmem:[%s722_s1 + $0x38] sm:$0xf0]  ;;  %v386_v28 = vor.u32 %v438_v25, %v385_v24  ;;  %v377_v30 = vld [vmem:[%s722_s1 + $0x20] sm:$0xf] }
   0x8   :  { %174 = vmatpush.bf16.msra.mxu0 %v410_v10  ;;  %495 = vmatpush.bf16.msra.mxu2 %v410_v10  ;;  %v390_v29 = vor.u32 %v437_v26, %v387_v27  ;;  %v436_v31 = vld [vmem:[%s722_s1 + $0x24] sm:$0xf0]  ;;  %v435_v32 = vld [vmem:[%s722_s1 + $0x24] sm:$0xf]  ;;  %v379_v33 = vld [vmem:[%s722_s1 + $0x28] sm:$0xf0] }
   0x9   :  { %223 = vmatpush.bf16.msra.mxu1 %v414_v11  ;;  %503 = vmatpush.bf16.msra.mxu3 %v414_v11  ;;  %v378_v34 = vor.u32 %v436_v31, %v377_v30  ;;  %v382_v35 = vor.u32 %v435_v32, %v379_v33  ;;  %v369_v36 = vld [vmem:[%s722_s1 + $0x10] sm:$0xf]  ;;  %v434_v37 = vld [vmem:[%s722_s1 + $0x14] sm:$0xf0]  ;;  %v433_v38 = vld [vmem:[%s722_s1 + $0x14] sm:$0xf] }
   0xa   :  { %v371_v39 = vld [vmem:[%s722_s1 + $0x18] sm:$0xf0]  ;;  %v370_v40 = vor.u32 %v434_v37, %v369_v36  ;;  %v361_v42 = vld [vmem:[%s722_s1] sm:$0xf]  ;;  %v432_v43 = vld [vmem:[%s722_s1 + $0x4] sm:$0xf0] }
   0xb   :  { %v374_v41 = vor.u32 %v433_v38, %v371_v39  ;;  %v431_v44 = vld [vmem:[%s722_s1 + $0x4] sm:$0xf]  ;;  %v363_v45 = vld [vmem:[%s722_s1 + $0x8] sm:$0xf0]  ;;  %v362_v46 = vor.u32 %v432_v43, %v361_v42  ;;  %v425_v52 = vld [vmem:[%s723_s0 + $0x10] sm:$0xff] }
   0xc   :  { %175 = vmatpush.bf16.msra.mxu0 %v402_v16  ;;  %496 = vmatpush.bf16.msra.mxu2 %v402_v16  ;;  %v366_v47 = vor.u32 %v431_v44, %v363_v45  ;;  %v423_v48 = vld [vmem:[%s723_s0] sm:$0xff]  ;;  %v424_v50 = vld [vmem:[%s723_s0 + $0x8] sm:$0xff]  ;;  %v429_v53 = vld [vmem:[%s723_s0 + $0x30] sm:$0xff] }
   0xd   :  { %224 = vmatpush.bf16.msra.mxu1 %v406_v17  ;;  %504 = vmatpush.bf16.msra.mxu3 %v406_v17  ;;  %v427_v49 = vld [vmem:[%s723_s0 + $0x20] sm:$0xff]  ;;  %v428_v51 = vld [vmem:[%s723_s0 + $0x28] sm:$0xff]  ;;  %v426_v54 = vld [vmem:[%s723_s0 + $0x18] sm:$0xff] }
   0xe   :  { %v430_v55 = vld [vmem:[%s723_s0 + $0x38] sm:$0xff] }
  0x10   :  { %176 = vmatpush.bf16.msra.mxu0 %v394_v22  ;;  %497 = vmatpush.bf16.msra.mxu2 %v394_v22 }
  0x11   :  { %225 = vmatpush.bf16.msra.mxu1 %v398_v23  ;;  %505 = vmatpush.bf16.msra.mxu3 %v398_v23 }
  0x14   :  { %177 = vmatpush.bf16.msra.mxu0 %v386_v28  ;;  %498 = vmatpush.bf16.msra.mxu2 %v386_v28 }
  0x15   :  { %226 = vmatpush.bf16.msra.mxu1 %v390_v29  ;;  %506 = vmatpush.bf16.msra.mxu3 %v390_v29 }
  0x18   :  { %178 = vmatpush.bf16.msra.mxu0 %v378_v34  ;;  %499 = vmatpush.bf16.msra.mxu2 %v378_v34 }
  0x19   :  { %227 = vmatpush.bf16.msra.mxu1 %v382_v35  ;;  %507 = vmatpush.bf16.msra.mxu3 %v382_v35 }
  0x1c   :  { %179 = vmatpush.bf16.msra.mxu0 %v370_v40  ;;  %500 = vmatpush.bf16.msra.mxu2 %v370_v40 }
  0x1d   :  { %228 = vmatpush.bf16.msra.mxu1 %v374_v41  ;;  %508 = vmatpush.bf16.msra.mxu3 %v374_v41 }
  0x20   :  { %180 = vmatpush.bf16.msra.mxu0 %v362_v46  ;;  %501 = vmatpush.bf16.msra.mxu2 %v362_v46 }
  0x21   :  { %229 = vmatpush.bf16.msra.mxu1 %v366_v47  ;;  %509 = vmatpush.bf16.msra.mxu3 %v366_v47 }
  0x23   :  { %181 = vmatmul.bf16.vlgmr.msra.gmra.mxu0 %v423_v48  ;;  %201 = vmatmul.bf16.vlgmr.msra.gmra.mxu2 %v427_v49 }
  0x24   :  { %230 = vmatmul.bf16.vlgmr.msra.gmra.mxu1 %v423_v48  ;;  %250 = vmatmul.bf16.vlgmr.msra.gmra.mxu3 %v427_v49 }
  0x33   :  { %186 = vmatmul.bf16.gmra.mxu0 %v424_v50  ;;  %206 = vmatmul.bf16.gmra.mxu2 %v428_v51 }
  0x34   :  { %235 = vmatmul.bf16.gmra.mxu1 %v424_v50  ;;  %255 = vmatmul.bf16.gmra.mxu3 %v428_v51 }
  0x43   :  { %191 = vmatmul.bf16.gmra.mxu0 %v425_v52  ;;  %211 = vmatmul.bf16.gmra.mxu2 %v429_v53 }
  0x44   :  { %240 = vmatmul.bf16.gmra.mxu1 %v425_v52  ;;  %260 = vmatmul.bf16.gmra.mxu3 %v429_v53 }
  0x53   :  { %196 = vmatmul.bf16.gmra.mxu0 %v426_v54  ;;  %216 = vmatmul.bf16.gmra.mxu2 %v430_v55 }
  0x54   :  { %245 = vmatmul.bf16.gmra.mxu1 %v426_v54  ;;  %265 = vmatmul.bf16.gmra.mxu3 %v430_v55 }
  0xa0   :  { %v182_v56 = vpop.f32.mrf.mxu0 }
  0xa1   :  { %v231_v57 = vpop.f32.mrf.mxu1 }
  0xa2   :  { %303 = vst [vmem:[%s724_s3] sm:$0xff] %v231_v57 }
  0xa6   :  { %v202_v58 = vpop.f32.mrf.mxu2 }
  0xa7   :  { %v251_v59 = vpop.f32.mrf.mxu3 }
  0xa8   :  { %311 = vst [vmem:[%s724_s3 + $0x40] sm:$0xff] %v251_v59  ;;  %v184_v60 = vpop.f32.mrf.mxu0 }
  0xa9   :  { %v450_v61 = vpack.c.bf16 %v184_v60, %v182_v56  ;;  %v233_v62 = vpop.f32.mrf.mxu1 }
  0xaa   :  { %304 = vst [vmem:[%s724_s3 + $0x8] sm:$0xff] %v233_v62 }
  0xab   :  { %451 = vst [vmem:[%s725_s2] sm:$0xff] %v450_v61  }
  0xae   :  { %v204_v63 = vpop.f32.mrf.mxu2 }
  0xaf   :  { %v470_v0 = vpack.c.bf16 %v204_v63, %v202_v58  ;;  %v253_v1 = vpop.f32.mrf.mxu3 }
  0xb0   :  { %312 = vst [vmem:[%s724_s3 + $0x48] sm:$0xff] %v253_v1  ;;  %v187_v2 = vpop.f32.mrf.mxu0 }
  0xb1   :  { %490 = vst [vmem:[%s725_s2 + $0x20] sm:$0xff] %v470_v0   ;;  %v236_v3 = vpop.f32.mrf.mxu1 }
  0xb2   :  { %305 = vst [vmem:[%s724_s3 + $0x10] sm:$0xff] %v236_v3 }
  0xb6   :  { %v207_v4 = vpop.f32.mrf.mxu2 }
  0xb7   :  { %v256_v5 = vpop.f32.mrf.mxu3 }
  0xb8   :  { %313 = vst [vmem:[%s724_s3 + $0x50] sm:$0xff] %v256_v5  ;;  %v189_v6 = vpop.f32.mrf.mxu0 }
  0xb9   :  { %v455_v7 = vpack.c.bf16 %v189_v6, %v187_v2  ;;  %v238_v8 = vpop.f32.mrf.mxu1 }
  0xba   :  { %306 = vst [vmem:[%s724_s3 + $0x18] sm:$0xff] %v238_v8 }
  0xbb   :  { %487 = vst [vmem:[%s725_s2 + $0x8] sm:$0xff] %v455_v7  }
  0xbe   :  { %v209_v9 = vpop.f32.mrf.mxu2 }
  0xbf   :  { %v475_v10 = vpack.c.bf16 %v209_v9, %v207_v4  ;;  %v258_v11 = vpop.f32.mrf.mxu3 }
  0xc0   :  { %314 = vst [vmem:[%s724_s3 + $0x58] sm:$0xff] %v258_v11  ;;  %v192_v12 = vpop.f32.mrf.mxu0 }
  0xc1   :  { %491 = vst [vmem:[%s725_s2 + $0x28] sm:$0xff] %v475_v10   ;;  %v241_v13 = vpop.f32.mrf.mxu1 }
  0xc2   :  { %307 = vst [vmem:[%s724_s3 + $0x20] sm:$0xff] %v241_v13 }
  0xc6   :  { %v212_v14 = vpop.f32.mrf.mxu2 }
  0xc7   :  { %v261_v15 = vpop.f32.mrf.mxu3 }
  0xc8   :  { %315 = vst [vmem:[%s724_s3 + $0x60] sm:$0xff] %v261_v15  ;;  %v194_v16 = vpop.f32.mrf.mxu0 }
  0xc9   :  { %v460_v17 = vpack.c.bf16 %v194_v16, %v192_v12  ;;  %v243_v18 = vpop.f32.mrf.mxu1 }
  0xca   :  { %308 = vst [vmem:[%s724_s3 + $0x28] sm:$0xff] %v243_v18 }
  0xcb   :  { %488 = vst [vmem:[%s725_s2 + $0x10] sm:$0xff] %v460_v17  }
  0xce   :  { %v214_v19 = vpop.f32.mrf.mxu2 }
  0xcf   :  { %v480_v20 = vpack.c.bf16 %v214_v19, %v212_v14  ;;  %v263_v21 = vpop.f32.mrf.mxu3 }
  0xd0   :  { %316 = vst [vmem:[%s724_s3 + $0x68] sm:$0xff] %v263_v21  ;;  %v197_v22 = vpop.f32.mrf.mxu0 }
  0xd1   :  { %492 = vst [vmem:[%s725_s2 + $0x30] sm:$0xff] %v480_v20   ;;  %v246_v23 = vpop.f32.mrf.mxu1 }
  0xd2   :  { %309 = vst [vmem:[%s724_s3 + $0x30] sm:$0xff] %v246_v23 }
  0xd6   :  { %v217_v24 = vpop.f32.mrf.mxu2 }
  0xd7   :  { %v266_v25 = vpop.f32.mrf.mxu3 }
  0xd8   :  { %317 = vst [vmem:[%s724_s3 + $0x70] sm:$0xff] %v266_v25  ;;  %v199_v26 = vpop.f32.mrf.mxu0 }
  0xd9   :  { %v465_v27 = vpack.c.bf16 %v199_v26, %v197_v22  ;;  %v248_v28 = vpop.f32.mrf.mxu1 }
  0xda   :  { %310 = vst [vmem:[%s724_s3 + $0x38] sm:$0xff] %v248_v28 }
  0xdb   :  { %489 = vst [vmem:[%s725_s2 + $0x18] sm:$0xff] %v465_v27  }
  0xde   :  { %v219_v29 = vpop.f32.mrf.mxu2 }
  0xdf   :  { %v485_v30 = vpack.c.bf16 %v219_v29, %v217_v24  ;;  %v268_v31 = vpop.f32.mrf.mxu3 }
  0xe0   :  { %318 = vst [vmem:[%s724_s3 + $0x78] sm:$0xff] %v268_v31 }
  0xe1   :  { %493 = vst [vmem:[%s725_s2 + $0x38] sm:$0xff] %v485_v30  }

// kernel: gat_forward.7
= control target key start
LH: loop header
LB: loop body
LE: loop exit
PB: predicated region body
PF: predicated region fallthrough
CT: control target
= control target key end

     0   :  { %vm99_vm0 = vcmask 7168   ;;  %v1196_v0 = vmov 0.0   ;;  %s1601_s0 = inlined_call_operand.<no memory space> [shape: s32[1], index: 0, kind: input, shape index: {}]   ;;  %s1602_s1 = inlined_call_operand.<no memory space> [shape: s32[1], index: 1, kind: input, shape index: {}]   ;;  %s1603_s2 = inlined_call_operand.vmem [shape: f32[128,1], index: 2, kind: input, shape index: {}]   ;;  %s1604_s4 = inlined_call_operand.vmem [shape: f32[128,1], index: 4, kind: input, shape index: {}]   ;;  %s1605_s7 = inlined_call_operand.vmem [shape: f32[1,128], index: 7, kind: input, shape index: {}]   ;;  %s1606_s8 = inlined_call_operand.vmem [shape: bf16[128,128], index: 8, kind: output, shape index: {}]   ;;  %s1607_s3 = inlined_call_operand.vmem [shape: f32[1,128], index: 3, kind: input, shape index: {}]   ;;  %s1608_s6 = inlined_call_operand.vmem [shape: s8[128,128], index: 6, kind: input, shape index: {}]   ;;  %s1609_s5 = inlined_call_operand.vmem [shape: bf16[128,128], index: 5, kind: input, shape index: {}]  }
   0x1   :  { %p72_p0 = scmp.lt.s32.totalorder %s1601_s0, 0  ;;  %s981_s9 = sshll.u32 %s1601_s0, 4  ;;  %100 = vst.msk [vmem:[#allocation2] sm:$0xff] %vm99_vm0, %v1196_v0 }
   0x2   :  { %p80_p1 = scmp.lt.s32.totalorder %s981_s9, 15  ;;  %101 = vst.msk [vmem:[#allocation2 + $0x8] sm:$0xff] %vm99_vm0, %v1196_v0  ;;  %p985_p2 = scmp.le.s32.totalorder %s1602_s1, 0 }
   0x3   :  { %s1611_s0 = smov (!%p72_p0, %s1601_s0), 0  ;;  %102 = vst.msk [vmem:[#allocation2 + $0x10] sm:$0xff] %vm99_vm0, %v1196_v0 }
   0x4   :  { %s1613_s9 = smov (!%p80_p1, %s981_s9), 15  ;;  %103 = vst.msk [vmem:[#allocation2 + $0x18] sm:$0xff] %vm99_vm0, %v1196_v0  ;;  %s74_s14 = scalar_lea.vmem %s1607_s3, %s1611_s0 }
   0x5   :  { %s983_s15 = sshll.u32 %s1611_s0, 3  ;;  %104 = vst.msk [vmem:[#allocation2 + $0x20] sm:$0xff] %vm99_vm0, %v1196_v0  ;;  %s982_s16 = sshll.u32 %s1613_s9, 2 }
   0x6   :  { %s1268_s19 = scalar_lea.vmem %s1608_s6, %s983_s15  ;;  %105 = vst.msk [vmem:[#allocation2 + $0x28] sm:$0xff] %vm99_vm0, %v1196_v0  ;;  %s1274_s22 = scalar_lea.vmem %s1609_s5, %s982_s16 }
   0x7   :  { %106 = vst.msk [vmem:[#allocation2 + $0x30] sm:$0xff] %vm99_vm0, %v1196_v0 }
   0x8   :  { %107 = vst.msk [vmem:[#allocation2 + $0x38] sm:$0xff] %vm99_vm0, %v1196_v0 }
   0x9   :  { %108 = vst.msk [vmem:[#allocation2 + $0x40] sm:$0xff] %vm99_vm0, %v1196_v0 }
   0xa   :  { %109 = vst.msk [vmem:[#allocation2 + $0x48] sm:$0xff] %vm99_vm0, %v1196_v0 }
   0xb   :  { %110 = vst.msk [vmem:[#allocation2 + $0x50] sm:$0xff] %vm99_vm0, %v1196_v0 }
   0xc   :  { %111 = vst.msk [vmem:[#allocation2 + $0x58] sm:$0xff] %vm99_vm0, %v1196_v0 }
   0xd   :  { %112 = vst.msk [vmem:[#allocation2 + $0x60] sm:$0xff] %vm99_vm0, %v1196_v0 }
   0xe   :  { %113 = vst.msk [vmem:[#allocation2 + $0x68] sm:$0xff] %vm99_vm0, %v1196_v0 }
   0xf   :  { %114 = vst.msk [vmem:[#allocation2 + $0x70] sm:$0xff] %vm99_vm0, %v1196_v0 }
  0x10   :  { %115 = vst.msk [vmem:[#allocation2 + $0x78] sm:$0xff] %vm99_vm0, %v1196_v0 }
  0x11   :  { %116 = vst [vmem:[#allocation3 + $0x30] sm:$0xff] %v1196_v0 }
  0x12   :  { %117 = vst [vmem:[#allocation3] sm:$0xff] %v1196_v0 }
  0x13   :  { %118 = vst [vmem:[#allocation3 + $0x58] sm:$0xff] %v1196_v0 }
  0x14   :  { %119 = vst [vmem:[#allocation3 + $0x18] sm:$0xff] %v1196_v0 }
  0x15   :  { %120 = vst [vmem:[#allocation3 + $0x50] sm:$0xff] %v1196_v0 }
  0x16   :  { %121 = vst [vmem:[#allocation3 + $0x68] sm:$0xff] %v1196_v0 }
  0x17   :  { %122 = vst [vmem:[#allocation3 + $0x8] sm:$0xff] %v1196_v0 }
  0x18   :  { %123 = vst [vmem:[#allocation3 + $0x48] sm:$0xff] %v1196_v0 }
  0x19   :  { %124 = vst [vmem:[#allocation3 + $0x40] sm:$0xff] %v1196_v0 }
  0x1a   :  { %125 = vst [vmem:[#allocation3 + $0x20] sm:$0xff] %v1196_v0 }
  0x1b   :  { %126 = vst [vmem:[#allocation3 + $0x10] sm:$0xff] %v1196_v0 }
  0x1c   :  { %127 = vst [vmem:[#allocation3 + $0x38] sm:$0xff] %v1196_v0  ;;  %136 = sbr.rel (%p985_p2) target bundleno = 387 (0x183), region = 33 }
  0x1d   :  { %128 = vst [vmem:[#allocation3 + $0x60] sm:$0xff] %v1196_v0 }
  0x1e   :  { %129 = vst [vmem:[#allocation3 + $0x70] sm:$0xff] %v1196_v0 }
  0x1f   :  { %130 = vst [vmem:[#allocation3 + $0x78] sm:$0xff] %v1196_v0 }
  0x20   :  { %131 = vst [vmem:[#allocation3 + $0x28] sm:$0xff] %v1196_v0 }
  0x21   :  { %v193_v1 = vld [vmem:[%s1603_s2 + $0x20] sm:$0xff]  ;;  %v191_v2 = vld [vmem:[%s1603_s2 + $0x10] sm:$0xff]  ;;  %v1197_v4 = vmov 0   ;;  %v194_v5 = vld [vmem:[%s1603_s2 + $0x28] sm:$0xff] }
  0x22   :  { %v189_v3 = vld [vmem:[%s1603_s2] sm:$0xff]  ;;  %1126 = vset.pattern.permute.xlu2 %v1197_v4  ;;  %1125 = vset.pattern.permute.xlu1 %v1197_v4  ;;  %v192_v6 = vld [vmem:[%s1603_s2 + $0x18] sm:$0xff]  ;;  %v190_v7 = vld [vmem:[%s1603_s2 + $0x8] sm:$0xff] }
  0x23   :  { %1124 = vset.pattern.permute.xlu0 %v1197_v4  ;;  %228 = vperm.xlu2 %1126, %v193_v1   ;;  %v201_v8 = vld [vmem:[%s1603_s2 + $0x60] sm:$0xff]  ;;  %v198_v9 = vld [vmem:[%s1603_s2 + $0x48] sm:$0xff]  ;;  %v203_v20 = vld [vmem:[%s1603_s2 + $0x70] sm:$0xff] }
  0x24   :  { %218 = vperm.xlu1 %1125, %v191_v2   ;;  %208 = vperm.xlu0 %1124, %v189_v3   ;;  %v197_v10 = vld [vmem:[%s1603_s2 + $0x40] sm:$0xff]  ;;  %v346_v11 = vld [vmem:[%s1604_s4 + $0x48] sm:$0xff]  ;;  %v200_v21 = vld [vmem:[%s1603_s2 + $0x58] sm:$0xff] }
  0x25   :  { %v345_v12 = vld [vmem:[%s1604_s4 + $0x40] sm:$0xff]  ;;  %v202_v13 = vld [vmem:[%s1603_s2 + $0x68] sm:$0xff]  ;;  %v199_v22 = vld [vmem:[%s1603_s2 + $0x50] sm:$0xff] }
  0x26   :  { %v337_v14 = vld [vmem:[%s1604_s4] sm:$0xff]  ;;  %v350_v15 = vld [vmem:[%s1604_s4 + $0x68] sm:$0xff]  ;;  %v196_v23 = vld [vmem:[%s1603_s2 + $0x38] sm:$0xff] }
  0x27   :  { %v349_v16 = vld [vmem:[%s1604_s4 + $0x60] sm:$0xff]  ;;  %v342_v17 = vld [vmem:[%s1604_s4 + $0x28] sm:$0xff]  ;;  %v195_v24 = vld [vmem:[%s1603_s2 + $0x30] sm:$0xff] }
  0x28   :  { %v341_v18 = vld [vmem:[%s1604_s4 + $0x20] sm:$0xff]  ;;  %v338_v19 = vld [vmem:[%s1604_s4 + $0x8] sm:$0xff]  ;;  %v204_v25 = vld [vmem:[%s1603_s2 + $0x78] sm:$0xff] }
  0x29   :  { %v351_v26 = vld [vmem:[%s1604_s4 + $0x70] sm:$0xff]  ;;  %v348_v27 = vld [vmem:[%s1604_s4 + $0x58] sm:$0xff]  ;;  %v1047_v37 = vld [vmem:[%s1274_s22 + $0x28] sm:$0xff] }
  0x2a   :  { %v347_v28 = vld [vmem:[%s1604_s4 + $0x50] sm:$0xff]  ;;  %v340_v29 = vld [vmem:[%s1604_s4 + $0x18] sm:$0xff]  ;;  %v1046_v39 = vld [vmem:[%s1274_s22 + $0x20] sm:$0xff] }
  0x2b   :  { %233 = vperm.xlu2 %1126, %v194_v5   ;;  %v339_v30 = vld [vmem:[%s1604_s4 + $0x10] sm:$0xff]  ;;  %v352_v31 = vld [vmem:[%s1604_s4 + $0x78] sm:$0xff]  ;;  %v1043_v43 = vld [vmem:[%s1274_s22 + $0x8] sm:$0xff] }
  0x2c   :  { %223 = vperm.xlu1 %1125, %v192_v6   ;;  %213 = vperm.xlu0 %1124, %v190_v7   ;;  %v344_v32 = vld [vmem:[%s1604_s4 + $0x38] sm:$0xff]  ;;  %v343_v33 = vld [vmem:[%s1604_s4 + $0x30] sm:$0xff]  ;;  %v1401_v44 = vld [vmem:[%s74_s14] ss:$0 sm:$0xff] }
  0x2d   :  { %v1049_v34 = vld [vmem:[%s1274_s22 + $0x38] sm:$0xff]  ;;  %v1048_v36 = vld [vmem:[%s1274_s22 + $0x30] sm:$0xff]  ;;  %v1042_v49 = vld [vmem:[%s1274_s22] sm:$0xff] }
  0x2e   :  { %1098 = vmatpush.bf16.msra.mxu2 %v1049_v34  ;;  %1099 = vmatpush.bf16.msra.mxu3 %v1049_v34  ;;  %v1045_v40 = vld [vmem:[%s1274_s22 + $0x18] sm:$0xff]  ;;  %v1044_v42 = vld [vmem:[%s1274_s22 + $0x10] sm:$0xff]  ;;  %v1408_v51 = vld [vmem:[%s1268_s19] sm:$0xff] }
  0x2f   :  { %666 = vmatpush.bf16.msra.mxu0 %v1049_v34  ;;  %1097 = vmatpush.bf16.msra.mxu1 %v1049_v34  ;;  %v141_v57 = vunpack.c.0.s8 %v1408_v51  ;;  %v1424_v5 = vld [vmem:[%s1268_s19 + $0x10] sm:$0xff] }
  0x31   :  { %v1413_v59 = vcvt.s32.f32 %v141_v57  ;;  %v1465_v57 = vld [vmem:[%s1268_s19 + $0x8] sm:$0xff] }
  0x32   :  { %1101 = vmatpush.bf16.msra.mxu2 %v1048_v36  ;;  %1102 = vmatpush.bf16.msra.mxu3 %v1048_v36 }
  0x33   :  { %268 = vperm.xlu2 %1126, %v201_v8   ;;  %667 = vmatpush.bf16.msra.mxu0 %v1048_v36  ;;  %vm173_vm1 = vcmp.gt.f32.partialorder %v1413_v59, 0.0 }
  0x34   :  { %253 = vperm.xlu1 %1125, %v198_v9   ;;  %248 = vperm.xlu0 %1124, %v197_v10  }
  0x35   :  { %1100 = vmatpush.bf16.msra.mxu1 %v1048_v36 }
  0x36   :  { %1104 = vmatpush.bf16.msra.mxu2 %v1047_v37  ;;  %1105 = vmatpush.bf16.msra.mxu3 %v1047_v37 }
  0x37   :  { %668 = vmatpush.bf16.msra.mxu0 %v1047_v37 }
  0x39   :  { %1103 = vmatpush.bf16.msra.mxu1 %v1047_v37 }
  0x3a   :  { %1107 = vmatpush.bf16.msra.mxu2 %v1046_v39  ;;  %1108 = vmatpush.bf16.msra.mxu3 %v1046_v39 }
  0x3b   :  { %400 = vperm.xlu2 %1126, %v346_v11   ;;  %669 = vmatpush.bf16.msra.mxu0 %v1046_v39  ;;  %v150_v11 = vunpack.c.1.s8 %v1424_v5 }
  0x3c   :  { %395 = vperm.xlu1 %1125, %v345_v12   ;;  %273 = vperm.xlu0 %1124, %v202_v13  }
  0x3d   :  { %1106 = vmatpush.bf16.msra.mxu1 %v1046_v39 }
  0x3e   :  { %1110 = vmatpush.bf16.msra.mxu2 %v1045_v40  ;;  %1111 = vmatpush.bf16.msra.mxu3 %v1045_v40 }
  0x3f   :  { %670 = vmatpush.bf16.msra.mxu0 %v1045_v40 }
  0x41   :  { %1109 = vmatpush.bf16.msra.mxu1 %v1045_v40 }
  0x42   :  { %1113 = vmatpush.bf16.msra.mxu2 %v1044_v42  ;;  %1114 = vmatpush.bf16.msra.mxu3 %v1044_v42 }
  0x43   :  { %355 = vperm.xlu2 %1126, %v337_v14   ;;  %671 = vmatpush.bf16.msra.mxu0 %v1044_v42  ;;  %v149_v14 = vunpack.c.0.s8 %v1424_v5 }
  0x44   :  { %420 = vperm.xlu1 %1125, %v350_v15   ;;  %415 = vperm.xlu0 %1124, %v349_v16  }
  0x45   :  { %1112 = vmatpush.bf16.msra.mxu1 %v1044_v42 }
  0x46   :  { %1116 = vmatpush.bf16.msra.mxu2 %v1043_v43  ;;  %1117 = vmatpush.bf16.msra.mxu3 %v1043_v43 }
  0x47   :  { %672 = vmatpush.bf16.msra.mxu0 %v1043_v43 }
  0x49   :  { %1115 = vmatpush.bf16.msra.mxu1 %v1043_v43 }
  0x4a   :  { %1119 = vmatpush.bf16.msra.mxu2 %v1042_v49  ;;  %1120 = vmatpush.bf16.msra.mxu3 %v1042_v49 }
  0x4b   :  { %380 = vperm.xlu2 %1126, %v342_v17   ;;  %673 = vmatpush.bf16.msra.mxu0 %v1042_v49 }
  0x4c   :  { %375 = vperm.xlu1 %1125, %v341_v18   ;;  %360 = vperm.xlu0 %1124, %v338_v19  }
  0x4d   :  { %1118 = vmatpush.bf16.msra.mxu1 %v1042_v49 }
  0x53   :  { %278 = vperm.xlu2 %1126, %v203_v20  }
  0x54   :  { %263 = vperm.xlu1 %1125, %v200_v21   ;;  %258 = vperm.xlu0 %1124, %v199_v22   ;;  %v166_v22 = vcvt.s32.f32 %v150_v11 }
  0x56   :  { %vm182_vm2 = vcmp.gt.f32.partialorder %v166_v22, 0.0 }
  0x5b   :  { %243 = vperm.xlu2 %1126, %v196_v23   ;;  %v1434_v23 = vcvt.s32.f32 %v149_v14 }
  0x5c   :  { %238 = vperm.xlu1 %1125, %v195_v24   ;;  %283 = vperm.xlu0 %1124, %v204_v25   ;;  %v1437_v24 = vld [vmem:[%s1268_s19 + $0x18] sm:$0xff] }
  0x5d   :  { %vm181_vm3 = vcmp.gt.f32.partialorder %v1434_v23, 0.0  ;;  %v155_v23 = vunpack.c.2.s8 %v1437_v24 }
  0x5e   :  { %vm1030_vm4 = vmpackc.low %vm182_vm2, %vm181_vm3 }
  0x63   :  { %425 = vperm.xlu2 %1126, %v351_v26  }
  0x64   :  { %410 = vperm.xlu1 %1125, %v348_v27   ;;  %405 = vperm.xlu0 %1124, %v347_v28  }
  0x6b   :  { %370 = vperm.xlu2 %1126, %v340_v29  }
  0x6c   :  { %365 = vperm.xlu1 %1125, %v339_v30   ;;  %430 = vperm.xlu0 %1124, %v352_v31  }
  0x74   :  { %390 = vperm.xlu1 %1125, %v344_v32   ;;  %385 = vperm.xlu0 %1124, %v343_v33   ;;  %v153_v33 = vunpack.c.0.s8 %v1437_v24 }
  0x76   :  { %v1456_v49 = vcvt.s32.f32 %v153_v33 }
  0x78   :  { %vm185_vm5 = vcmp.gt.f32.partialorder %v1456_v49, 0.0  ;;  %v500_v49 = vld [vmem:[#allocation2 + $0x18] sm:$0xff] }
  0x7d   :  { %v1386_v35 = vpop.permute.xlu2 %228 }
  0x7e   :  { %v293_v25 = vadd.f32 %v1401_v44, %v1386_v35 }
  0x80   :  { %v309_v35 = vmul.f32 0.2, %v293_v25 }
  0x85   :  { %v1390_v38 = vpop.permute.xlu2 %233 }
  0x86   :  { %v294_v18 = vadd.f32 %v1401_v44, %v1390_v38  ;;  %v154_v38 = vunpack.c.1.s8 %v1437_v24 }
  0x88   :  { %v310_v26 = vmul.f32 0.2, %v294_v18 }
  0x8a   :  { %v326_v39 = vmax.f32 %v294_v18, %v310_v26 }
  0x8d   :  { %v269_v41 = vpop.permute.xlu2 %268 }
  0x8e   :  { %v301_v7 = vadd.f32 %v1401_v44, %v269_v41 }
  0x90   :  { %v317_v19 = vmul.f32 0.2, %v301_v7 }
  0x92   :  { %v333_v30 = vmax.f32 %v301_v7, %v317_v19  ;;  %v144_v19 = vunpack.c.3.s8 %v1408_v51 }
  0x95   :  { %v401_v45 = vpop.permute.xlu2 %400 }
  0x96   :  { %v1403_v46 = vpop.permute.xlu1 %218  ;;  %v209_v47 = vpop.permute.xlu0 %208 }
  0x97   :  { %v289_v48 = vadd.f32 %v1401_v44, %v209_v47 }
  0x99   :  { %v305_v50 = vmul.f32 0.2, %v289_v48 }
  0x9b   :  { %v321_v52 = vmax.f32 %v289_v48, %v305_v50  ;;  %v1458_v50 = vcvt.s32.f32 %v154_v38 }
  0x9d   :  { %v356_v53 = vpop.permute.xlu2 %355  ;;  %vm186_vm6 = vcmp.gt.f32.partialorder %v1458_v50, 0.0 }
  0x9e   :  { %v433_v54 = vsub.f32 %v321_v52, %v356_v53  ;;  %v1410_v55 = vpop.permute.xlu1 %223  ;;  %v214_v56 = vpop.permute.xlu0 %213  ;;  %vm1036_vm7 = vmpackc.low %vm186_vm6, %vm185_vm5 }
  0x9f   :  { %v290_v27 = vadd.f32 %v1401_v44, %v214_v56  ;;  %v292_v52 = vadd.f32 %v1401_v44, %v1410_v55  ;;  %v142_v55 = vunpack.c.1.s8 %v1408_v51 }
  0xa0   :  { %v449_v58 = vmul.f32 1.442695, %v433_v54  ;;  %v325_v54 = vmax.f32 %v293_v25, %v309_v35 }
  0xa1   :  { %v306_v42 = vmul.f32 0.2, %v290_v27 }
  0xa2   :  { %1128 = vpow2.f32 %v449_v58 }
  0xa3   :  { %v322_v56 = vmax.f32 %v290_v27, %v306_v42  ;;  %v1487_v27 = vcvt.s32.f32 %v144_v19  ;;  %v291_v42 = vadd.f32 %v1401_v44, %v1403_v46 }
  0xa5   :  { %v381_v60 = vpop.permute.xlu2 %380  ;;  %vm176_vm13 = vcmp.gt.f32.partialorder %v1487_v27, 0.0 }
  0xa6   :  { %v254_v61 = vpop.permute.xlu1 %253  ;;  %v249_v62 = vpop.permute.xlu0 %248  ;;  %v438_v47 = vsub.f32 %v326_v39, %v381_v60 }
  0xa7   :  { %v298_v63 = vadd.f32 %v1401_v44, %v254_v61  ;;  %v297_v0 = vadd.f32 %v1401_v44, %v249_v62  ;;  %v145_v62 = vunpack.c.0.s8 %v1465_v57 }
  0xa8   :  { %v1418_v1 = vpop.eup %1128  ;;  %v459_v58 = vmul.f32 1.442695, %v438_v47 }
  0xa9   :  { %v314_v2 = vmul.f32 0.2, %v298_v63  ;;  %v313_v3 = vmul.f32 0.2, %v297_v0  ;;  %v481_v4 = vsel %vm173_vm1, %v1418_v1, 0.0 }
  0xaa   :  { %513 = vadd.xlane.f32.xlu2 %v481_v4 }
  0xab   :  { %v330_v6 = vmax.f32 %v298_v63, %v314_v2  ;;  %v329_v10 = vmax.f32 %v297_v0, %v313_v3  ;;  %v308_v2 = vmul.f32 0.2, %v292_v52  ;;  %v146_v3 = vunpack.c.1.s8 %v1465_v57 }
  0xad   :  { %v442_v8 = vsub.f32 %v330_v6, %v401_v45  ;;  %v1427_v9 = vpop.permute.xlu2 %278  ;;  %v162_v14 = vcvt.s32.f32 %v146_v3 }
  0xae   :  { %v396_v12 = vpop.permute.xlu1 %395  ;;  %v274_v13 = vpop.permute.xlu0 %273  ;;  %v303_v33 = vadd.f32 %v1401_v44, %v1427_v9 }
  0xaf   :  { %v467_v15 = vmul.f32 1.442695, %v442_v8  ;;  %v441_v16 = vsub.f32 %v329_v10, %v396_v12  ;;  %v302_v17 = vadd.f32 %v1401_v44, %v274_v13  ;;  %v161_v10 = vcvt.s32.f32 %v145_v62 }
  0xb0   :  { %v158_v12 = vcvt.s32.f32 %v142_v55  ;;  %v324_v13 = vmax.f32 %v292_v52, %v308_v2  ;;  %vm178_vm10 = vcmp.gt.f32.partialorder %v162_v14, 0.0  ;;  %v319_v35 = vmul.f32 0.2, %v303_v33 }
  0xb1   :  { %1130 = vpow2.f32 %v467_v15  ;;  %v465_v20 = vmul.f32 1.442695, %v441_v16  ;;  %v318_v21 = vmul.f32 0.2, %v302_v17  ;;  %vm177_vm8 = vcmp.gt.f32.partialorder %v161_v10, 0.0 }
  0xb2   :  { %vm174_vm9 = vcmp.gt.f32.partialorder %v158_v12, 0.0  ;;  %vm1024_vm11 = vmpackc.low %vm178_vm10, %vm177_vm8  ;;  %v335_v47 = vmax.f32 %v303_v33, %v319_v35  ;;  %v143_v14 = vunpack.c.2.s8 %v1408_v51 }
  0xb3   :  { %1132 = vpow2.f32 %v465_v20  ;;  %v334_v29 = vmax.f32 %v302_v17, %v318_v21  ;;  %vm1018_vm12 = vmpackc.low %vm174_vm9, %vm173_vm1 }
  0xb4   :  { %v159_v51 = vcvt.s32.f32 %v143_v14 }
  0xb5   :  { %v1442_v28 = vpop.permute.xlu2 %243 }
  0xb6   :  { %v421_v31 = vpop.permute.xlu1 %420  ;;  %v416_v32 = vpop.permute.xlu0 %415 }
  0xb7   :  { %v1131_v34 = vpop.eup %1130  ;;  %v446_v36 = vsub.f32 %v334_v29, %v421_v31  ;;  %v445_v37 = vsub.f32 %v333_v30, %v416_v32 }
  0xb8   :  { %v1448_v40 = vsel %vm182_vm2, %v1131_v34, 0.0  ;;  %vm175_vm2 = vcmp.gt.f32.partialorder %v159_v51, 0.0 }
  0xb9   :  { %v1450_v41 = vpop.eup %1132  ;;  %v475_v43 = vmul.f32 1.442695, %v446_v36  ;;  %v473_v45 = vmul.f32 1.442695, %v445_v37 }
  0xba   :  { %v1031_v48 = vpack.c.bf16 %v1131_v34, %v1450_v41  ;;  %v489_v2 = vsel %vm181_vm3, %v1450_v41, 0.0  ;;  %v156_v41 = vunpack.c.3.s8 %v1437_v24 }
  0xbb   :  { %1134 = vpow2.f32 %v475_v43 }
  0xbc   :  { %1136 = vpow2.f32 %v473_v45  ;;  %1032 = vmatmul.msk.bf16.vlgmr.msra.gmra.mxu2 %vm1030_vm4, %v1031_v48 }
  0xbd   :  { %v1462_v53 = vpop.permute.xlu2 %425  ;;  %1138 = vpow2.f32 %v459_v58  ;;  %v152_v58 = vunpack.c.3.s8 %v1424_v5 }
  0xbe   :  { %v376_v60 = vpop.permute.xlu1 %375  ;;  %v361_v61 = vpop.permute.xlu0 %360 }
  0xbf   :  { %v437_v63 = vsub.f32 %v325_v54, %v376_v60  ;;  %v434_v0 = vsub.f32 %v322_v56, %v361_v61  ;;  %v151_v60 = vunpack.c.2.s8 %v1424_v5  ;;  %v307_v61 = vmul.f32 0.2, %v291_v42 }
  0xc0   :  { %v168_v3 = vcvt.s32.f32 %v152_v58  ;;  %v296_v5 = vadd.f32 %v1401_v44, %v1442_v28 }
  0xc1   :  { %v1472_v4 = vpop.eup %1134  ;;  %v457_v6 = vmul.f32 1.442695, %v437_v63  ;;  %v451_v7 = vmul.f32 1.442695, %v434_v0  ;;  %v447_v63 = vsub.f32 %v335_v47, %v1462_v53  ;;  %v323_v10 = vmax.f32 %v291_v42, %v307_v61 }
  0xc2   :  { %v1474_v8 = vpop.eup %1136  ;;  %vm184_vm14 = vcmp.gt.f32.partialorder %v168_v3, 0.0  ;;  %v312_v28 = vmul.f32 0.2, %v296_v5  ;;  %v494_v58 = vsel %vm186_vm6, %v1472_v4, 0.0 }
  0xc3   :  { %1140 = vpow2.f32 %v457_v6  ;;  %v1037_v11 = vpack.c.bf16 %v1472_v4, %v1474_v8  ;;  %v1139_v20 = vpop.eup %1138  ;;  %v1511_v6 = vcvt.s32.f32 %v151_v60  ;;  %v493_v60 = vsel %vm185_vm5, %v1474_v8, 0.0  ;;  %v502_v8 = vld [vmem:[#allocation2 + $0x28] sm:$0xff] }
  0xc4   :  { %1142 = vpow2.f32 %v451_v7  ;;  %v486_v39 = vsel %vm178_vm10, %v1139_v20, 0.0  ;;  %v477_v7 = vmul.f32 1.442695, %v447_v63 }
  0xc5   :  { %1038 = vmatmul.msk.bf16.vlgmr.msra.gmra.mxu3 %vm1036_vm7, %v1037_v11  ;;  %v371_v15 = vpop.permute.xlu2 %370  ;;  %vm183_vm15 = vcmp.gt.f32.partialorder %v1511_v6, 0.0  ;;  %vm1021_vm7 = vmpackc.low %vm176_vm13, %vm175_vm2  ;;  %v587_v6 = vld [vmem:[#allocation3 + $0x20] sm:$0xff] }
  0xc6   :  { %v436_v16 = vsub.f32 %v324_v13, %v371_v15  ;;  %v264_v17 = vpop.permute.xlu1 %263  ;;  %v259_v18 = vpop.permute.xlu0 %258  ;;  %vm1033_vm1 = vmpackc.low %vm184_vm14, %vm183_vm15 }
  0xc7   :  { %v300_v31 = vadd.f32 %v1401_v44, %v264_v17  ;;  %v299_v32 = vadd.f32 %v1401_v44, %v259_v18 }
  0xc8   :  { %v455_v21 = vmul.f32 1.442695, %v436_v16 }
  0xc9   :  { %v1141_v22 = vpop.eup %1140  ;;  %v316_v37 = vmul.f32 0.2, %v300_v31  ;;  %v315_v38 = vmul.f32 0.2, %v299_v32 }
  0xca   :  { %v1143_v25 = vpop.eup %1142  ;;  %1144 = vpow2.f32 %v455_v21  ;;  %v1025_v26 = vpack.c.bf16 %v1139_v20, %v1141_v22  ;;  %v485_v62 = vsel %vm177_vm8, %v1141_v22, 0.0  ;;  %v171_v22 = vcvt.s32.f32 %v155_v23  ;;  %v578_v23 = vld [vmem:[#allocation3 + $0x30] sm:$0xff] }
  0xcb   :  { %v482_v29 = vsel %vm174_vm9, %v1143_v25, 0.0  ;;  %v1019_v30 = vpack.c.bf16 %v1143_v25, %v1418_v1  ;;  %v332_v43 = vmax.f32 %v300_v31, %v316_v37  ;;  %v331_v45 = vmax.f32 %v299_v32, %v315_v38 }
  0xcc   :  { %515 = vadd.xlane.f32.xlu0 %v482_v29  ;;  %1026 = vmatmul.msk.bf16.vlgmr.msra.gmra.mxu1 %vm1024_vm11, %v1025_v26  ;;  %v172_v25 = vcvt.s32.f32 %v156_v41  ;;  %v328_v26 = vmax.f32 %v296_v5, %v312_v28  ;;  %vm187_vm3 = vcmp.gt.f32.partialorder %v171_v22, 0.0  ;;  %v148_v37 = vunpack.c.3.s8 %v1465_v57  ;;  %v583_v22 = vld [vmem:[#allocation3 + $0x68] sm:$0xff] }
  0xcd   :  { %1020 = vmatmul.msk.bf16.vlgmr.msra.gmra.mxu0 %vm1018_vm12, %v1019_v30 }
  0xce   :  { %v239_v34 = vpop.permute.xlu1 %238  ;;  %v284_v36 = vpop.permute.xlu0 %283  ;;  %vm188_vm4 = vcmp.gt.f32.partialorder %v172_v25, 0.0 }
  0xcf   :  { %v304_v9 = vadd.f32 %v1401_v44, %v284_v36  ;;  %v295_v53 = vadd.f32 %v1401_v44, %v239_v34  ;;  %v147_v36 = vunpack.c.2.s8 %v1465_v57  ;;  %vm1039_vm8 = vmpackc.low %vm188_vm4, %vm187_vm3  ;;  %v164_v57 = vcvt.s32.f32 %v148_v37 }
  0xd0   :  { %v1495_v59 = vpop.eup %1144 }
  0xd1   :  { %v484_v1 = vsel %vm176_vm13, %v1495_v59, 0.0  ;;  %v320_v46 = vmul.f32 0.2, %v304_v9  ;;  %v311_v18 = vmul.f32 0.2, %v295_v53  ;;  %v163_v47 = vcvt.s32.f32 %v147_v36 }
  0xd2   :  { %519 = vadd.xlane.f32.xlu2 %v484_v1  ;;  %vm180_vm10 = vcmp.gt.f32.partialorder %v164_v57, 0.0  ;;  %v588_v57 = vld [vmem:[#allocation3 + $0x10] sm:$0xff] }
  0xd3   :  { %v336_v11 = vmax.f32 %v304_v9, %v320_v46  ;;  %v327_v29 = vmax.f32 %v295_v53, %v311_v18  ;;  %vm179_vm9 = vcmp.gt.f32.partialorder %v163_v47, 0.0  ;;  %v501_v18 = vld [vmem:[#allocation2 + $0x20] sm:$0xff] }
  0xd4   :  { %523 = vadd.xlane.f32.xlu0 %v486_v39  ;;  %vm1027_vm11 = vmpackc.low %vm180_vm10, %vm179_vm9 }
  0xd6   :  { %v411_v48 = vpop.permute.xlu1 %410  ;;  %v406_v52 = vpop.permute.xlu0 %405 }
  0xd7   :  { %v444_v54 = vsub.f32 %v332_v43, %v411_v48  ;;  %v443_v56 = vsub.f32 %v331_v45, %v406_v52 }
  0xd9   :  { %v471_v0 = vmul.f32 1.442695, %v444_v54  ;;  %v469_v55 = vmul.f32 1.442695, %v443_v56 }
  0xda   :  { %521 = vadd.xlane.f32.xlu2 %v485_v62  ;;  %v497_v62 = vld [vmem:[#allocation2] sm:$0xff] }
  0xdb   :  { %1146 = vpow2.f32 %v471_v0  ;;  %v498_v0 = vld [vmem:[#allocation2 + $0x8] sm:$0xff] }
  0xdc   :  { %1148 = vpow2.f32 %v469_v55  ;;  %529 = vadd.xlane.f32.xlu0 %v489_v2 }
  0xdd   :  { %1150 = vpow2.f32 %v477_v7  ;;  %v590_v7 = vld [vmem:[#allocation3 + $0x60] sm:$0xff] }
  0xde   :  { %v366_v12 = vpop.permute.xlu1 %365  ;;  %v431_v13 = vpop.permute.xlu0 %430 }
  0xdf   :  { %v435_v15 = vsub.f32 %v323_v10, %v366_v12  ;;  %v448_v16 = vsub.f32 %v336_v11, %v431_v13  ;;  %v582_v11 = vld [vmem:[#allocation3 + $0x50] sm:$0xff] }
  0xe1   :  { %v1147_v17 = vpop.eup %1146  ;;  %v453_v44 = vmul.f32 1.442695, %v435_v15  ;;  %v479_v19 = vmul.f32 1.442695, %v448_v16 }
  0xe2   :  { %v1149_v20 = vpop.eup %1148  ;;  %v492_v21 = vsel %vm184_vm14, %v1147_v17, 0.0 }
  0xe3   :  { %1152 = vpow2.f32 %v453_v44  ;;  %v1034_v24 = vpack.c.bf16 %v1147_v17, %v1149_v20  ;;  %v1151_v32 = vpop.eup %1150  ;;  %v491_v56 = vsel %vm183_vm15, %v1149_v20, 0.0  ;;  %v505_v44 = vld [vmem:[#allocation2 + $0x40] sm:$0xff] }
  0xe4   :  { %1154 = vpow2.f32 %v479_v19  ;;  %535 = vadd.xlane.f32.xlu0 %v492_v21  ;;  %v495_v9 = vsel %vm187_vm3, %v1151_v32, 0.0  ;;  %v591_v21 = vld [vmem:[#allocation3 + $0x70] sm:$0xff] }
  0xe5   :  { %1035 = vmatmul.msk.bf16.gmra.mxu2 %vm1033_vm1, %v1034_v24 }
  0xe6   :  { %v391_v30 = vpop.permute.xlu1 %390  ;;  %v386_v31 = vpop.permute.xlu0 %385 }
  0xe7   :  { %v440_v33 = vsub.f32 %v328_v26, %v391_v30  ;;  %v439_v34 = vsub.f32 %v327_v29, %v386_v31  ;;  %v579_v26 = vld [vmem:[#allocation3] sm:$0xff] }
  0xe9   :  { %v1153_v38 = vpop.eup %1152  ;;  %v463_v1 = vmul.f32 1.442695, %v440_v33  ;;  %v461_v35 = vmul.f32 1.442695, %v439_v34  ;;  %v508_v34 = vld [vmem:[#allocation2 + $0x58] sm:$0xff] }
  0xea   :  { %v1155_v39 = vpop.eup %1154  ;;  %v483_v42 = vsel %vm175_vm2, %v1153_v38, 0.0  ;;  %v1022_v43 = vpack.c.bf16 %v1495_v59, %v1153_v38  ;;  %v499_v38 = vld [vmem:[#allocation2 + $0x10] sm:$0xff] }
  0xeb   :  { %1156 = vpow2.f32 %v463_v1  ;;  %517 = vadd.xlane.f32.xlu1 %v483_v42  ;;  %v1040_v45 = vpack.c.bf16 %v1155_v39, %v1151_v32  ;;  %v496_v61 = vsel %vm188_vm4, %v1155_v39, 0.0  ;;  %v511_v1 = vld [vmem:[#allocation2 + $0x70] sm:$0xff] }
  0xec   :  { %1158 = vpow2.f32 %v461_v35  ;;  %541 = vadd.xlane.f32.xlu0 %v495_v9  ;;  %1023 = vmatmul.msk.bf16.gmra.mxu0 %vm1021_vm7, %v1022_v43  ;;  %v504_v43 = vld [vmem:[#allocation2 + $0x38] sm:$0xff] }
  0xed   :  { %1041 = vmatmul.msk.bf16.gmra.mxu3 %vm1039_vm8, %v1040_v45  ;;  %v503_v45 = vld [vmem:[#allocation2 + $0x30] sm:$0xff] }
  0xf1   :  { %v1157_v27 = vpop.eup %1156 }
  0xf2   :  { %v1159_v48 = vpop.eup %1158  ;;  %v488_v52 = vsel %vm180_vm10, %v1157_v27, 0.0 }
  0xf3   :  { %v487_v54 = vsel %vm179_vm9, %v1159_v48, 0.0  ;;  %527 = vadd.xlane.f32.xlu2 %v488_v52  ;;  %v1028_v59 = vpack.c.bf16 %v1157_v27, %v1159_v48  ;;  %v580_v52 = vld [vmem:[#allocation3 + $0x58] sm:$0xff] }
  0xf4   :  { %525 = vadd.xlane.f32.xlu1 %v487_v54 }
  0xf5   :  { %1029 = vmatmul.msk.bf16.gmra.mxu1 %vm1027_vm11, %v1028_v59 }
  0xfb   :  { %533 = vadd.xlane.f32.xlu2 %v491_v56 }
  0xfc   :  { %531 = vadd.xlane.f32.xlu1 %v1448_v40  ;;  %v586_v40 = vld [vmem:[#allocation3 + $0x40] sm:$0xff] }
 0x103   :  { %539 = vadd.xlane.f32.xlu2 %v494_v58 }
 0x104   :  { %537 = vadd.xlane.f32.xlu1 %v493_v60 }
 0x10c   :  { %543 = vadd.xlane.f32.xlu1 %v496_v61  ;;  %v507_v61 = vld [vmem:[#allocation2 + $0x50] sm:$0xff] }
 0x11d   :  { %v514_v63 = vpop.xlane.xlu2 %513 }
 0x11e   :  { %v545_v46 = vadd.f32 %v514_v63, %v497_v62  ;;  %v506_v62 = vld [vmem:[#allocation2 + $0x48] sm:$0xff] }
 0x120   :  { %562 = vst.msk [vmem:[#allocation2] sm:$0xff] %vm99_vm0, %v545_v46  ;;  %v589_v46 = vld [vmem:[#allocation3 + $0x38] sm:$0xff] }
 0x13f   :  { %v516_v55 = vpop.xlane.xlu0 %515  ;;  %v695_v2 = vpop.f32.mrf.mxu2 }
 0x140   :  { %v546_v50 = vadd.f32 %v516_v55, %v498_v0  ;;  %v723_v4 = vadd.f32 %v695_v2, %v586_v40  ;;  %v592_v0 = vld [vmem:[#allocation3 + $0x78] sm:$0xff] }
 0x141   :  { %v581_v2 = vld [vmem:[#allocation3 + $0x18] sm:$0xff] }
 0x142   :  { %563 = vst.msk [vmem:[#allocation2 + $0x8] sm:$0xff] %vm99_vm0, %v546_v50 }
 0x143   :  { %739 = vst [vmem:[#allocation3 + $0x40] sm:$0xff] %v723_v4 }
 0x145   :  { %v520_v3 = vpop.xlane.xlu2 %519 }
 0x146   :  { %v548_v5 = vadd.f32 %v520_v3, %v500_v49 }
 0x147   :  { %v524_v53 = vpop.xlane.xlu0 %523  ;;  %v697_v10 = vpop.f32.mrf.mxu2 }
 0x148   :  { %v550_v12 = vadd.f32 %v524_v53, %v502_v8  ;;  %565 = vst.msk [vmem:[#allocation2 + $0x18] sm:$0xff] %vm99_vm0, %v548_v5  ;;  %v724_v13 = vadd.f32 %v697_v10, %v587_v6  ;;  %v705_v14 = vpop.f32.mrf.mxu3  ;;  %v584_v8 = vld [vmem:[#allocation3 + $0x8] sm:$0xff] }
 0x149   :  { %v727_v41 = vadd.f32 %v705_v14, %v590_v7  ;;  %v685_v15 = vpop.f32.mrf.mxu1  ;;  %v593_v14 = vld [vmem:[#allocation3 + $0x28] sm:$0xff] }
 0x14a   :  { %567 = vst.msk [vmem:[#allocation2 + $0x28] sm:$0xff] %vm99_vm0, %v550_v12  ;;  %v675_v16 = vpop.f32.mrf.mxu0  ;;  %v719_v28 = vadd.f32 %v685_v15, %v582_v11  ;;  %v510_v11 = vld [vmem:[#allocation2 + $0x68] sm:$0xff]  ;;  %v509_v12 = vld [vmem:[#allocation2 + $0x60] sm:$0xff] }
 0x14b   :  { %740 = vst [vmem:[#allocation3 + $0x20] sm:$0xff] %v724_v13  ;;  %v715_v17 = vadd.f32 %v675_v16, %v578_v23 }
 0x14c   :  { %743 = vst [vmem:[#allocation3 + $0x60] sm:$0xff] %v727_v41 }
 0x14d   :  { %731 = vst [vmem:[#allocation3 + $0x30] sm:$0xff] %v715_v17  ;;  %v522_v19 = vpop.xlane.xlu2 %521 }
 0x14e   :  { %735 = vst [vmem:[#allocation3 + $0x50] sm:$0xff] %v719_v28  ;;  %v549_v20 = vadd.f32 %v522_v19, %v501_v18  ;;  %v585_v28 = vld [vmem:[#allocation3 + $0x48] sm:$0xff]  ;;  %v512_v19 = vld [vmem:[#allocation2 + $0x78] sm:$0xff] }
 0x14f   :  { %v530_v51 = vpop.xlane.xlu0 %529 }
 0x150   :  { %v553_v25 = vadd.f32 %v530_v51, %v505_v44  ;;  %566 = vst.msk [vmem:[#allocation2 + $0x20] sm:$0xff] %vm99_vm0, %v549_v20  ;;  %v707_v24 = vpop.f32.mrf.mxu3 }
 0x151   :  { %v728_v29 = vadd.f32 %v707_v24, %v591_v21  ;;  %v687_v30 = vpop.f32.mrf.mxu1 }
 0x152   :  { %570 = vst.msk [vmem:[#allocation2 + $0x40] sm:$0xff] %vm99_vm0, %v553_v25  ;;  %v677_v31 = vpop.f32.mrf.mxu0  ;;  %v720_v32 = vadd.f32 %v687_v30, %v583_v22 }
 0x153   :  { %744 = vst [vmem:[#allocation3 + $0x70] sm:$0xff] %v728_v29  ;;  %v716_v33 = vadd.f32 %v677_v31, %v579_v26 }
 0x154   :  { %736 = vst [vmem:[#allocation3 + $0x68] sm:$0xff] %v720_v32 }
 0x155   :  { %732 = vst [vmem:[#allocation3] sm:$0xff] %v716_v33 }
 0x157   :  { %v536_v36 = vpop.xlane.xlu0 %535 }
 0x158   :  { %v556_v37 = vadd.f32 %v536_v36, %v508_v34 }
 0x15a   :  { %573 = vst.msk [vmem:[#allocation2 + $0x58] sm:$0xff] %vm99_vm0, %v556_v37 }
 0x15e   :  { %v518_v35 = vpop.xlane.xlu1 %517 }
 0x15f   :  { %v547_v39 = vadd.f32 %v518_v35, %v499_v38  ;;  %v542_v42 = vpop.xlane.xlu0 %541 }
 0x160   :  { %v559_v9 = vadd.f32 %v542_v42, %v511_v1 }
 0x161   :  { %564 = vst.msk [vmem:[#allocation2 + $0x10] sm:$0xff] %vm99_vm0, %v547_v39 }
 0x162   :  { %576 = vst.msk [vmem:[#allocation2 + $0x70] sm:$0xff] %vm99_vm0, %v559_v9 }
 0x166   :  { %v528_v47 = vpop.xlane.xlu2 %527 }
 0x167   :  { %v526_v27 = vpop.xlane.xlu1 %525  ;;  %v552_v48 = vadd.f32 %v528_v47, %v504_v43 }
 0x168   :  { %v551_v54 = vadd.f32 %v526_v27, %v503_v45  ;;  %v700_v59 = vpop.f32.mrf.mxu2 }
 0x169   :  { %569 = vst.msk [vmem:[#allocation2 + $0x38] sm:$0xff] %vm99_vm0, %v552_v48  ;;  %v725_v56 = vadd.f32 %v700_v59, %v588_v57  ;;  %v680_v58 = vpop.f32.mrf.mxu0 }
 0x16a   :  { %568 = vst.msk [vmem:[#allocation2 + $0x30] sm:$0xff] %vm99_vm0, %v551_v54  ;;  %v717_v60 = vadd.f32 %v680_v58, %v580_v52 }
 0x16b   :  { %741 = vst [vmem:[#allocation3 + $0x10] sm:$0xff] %v725_v56 }
 0x16c   :  { %733 = vst [vmem:[#allocation3 + $0x58] sm:$0xff] %v717_v60 }
 0x16e   :  { %v534_v63 = vpop.xlane.xlu2 %533 }
 0x16f   :  { %v532_v40 = vpop.xlane.xlu1 %531  ;;  %v555_v55 = vadd.f32 %v534_v63, %v507_v61 }
 0x170   :  { %v554_v50 = vadd.f32 %v532_v40, %v506_v62  ;;  %v702_v4 = vpop.f32.mrf.mxu2  ;;  %v710_v49 = vpop.f32.mrf.mxu3 }
 0x171   :  { %572 = vst.msk [vmem:[#allocation2 + $0x50] sm:$0xff] %vm99_vm0, %v555_v55  ;;  %v726_v3 = vadd.f32 %v702_v4, %v589_v46  ;;  %v729_v6 = vadd.f32 %v710_v49, %v592_v0  ;;  %v682_v5 = vpop.f32.mrf.mxu0 }
 0x172   :  { %571 = vst.msk [vmem:[#allocation2 + $0x48] sm:$0xff] %vm99_vm0, %v554_v50  ;;  %v718_v7 = vadd.f32 %v682_v5, %v581_v2  ;;  %v690_v53 = vpop.f32.mrf.mxu1 }
 0x173   :  { %742 = vst [vmem:[#allocation3 + $0x38] sm:$0xff] %v726_v3  ;;  %v721_v10 = vadd.f32 %v690_v53, %v584_v8 }
 0x174   :  { %745 = vst [vmem:[#allocation3 + $0x78] sm:$0xff] %v729_v6 }
 0x175   :  { %734 = vst [vmem:[#allocation3 + $0x18] sm:$0xff] %v718_v7 }
 0x176   :  { %737 = vst [vmem:[#allocation3 + $0x8] sm:$0xff] %v721_v10  ;;  %v540_v13 = vpop.xlane.xlu2 %539 }
 0x177   :  { %v538_v23 = vpop.xlane.xlu1 %537  ;;  %v558_v41 = vadd.f32 %v540_v13, %v510_v11 }
 0x178   :  { %v557_v15 = vadd.f32 %v538_v23, %v509_v12  ;;  %v712_v16 = vpop.f32.mrf.mxu3 }
 0x179   :  { %575 = vst.msk [vmem:[#allocation2 + $0x68] sm:$0xff] %vm99_vm0, %v558_v41  ;;  %v730_v17 = vadd.f32 %v712_v16, %v593_v14 }
 0x17a   :  { %574 = vst.msk [vmem:[#allocation2 + $0x60] sm:$0xff] %vm99_vm0, %v557_v15  ;;  %v692_v18 = vpop.f32.mrf.mxu1 }
 0x17b   :  { %746 = vst [vmem:[#allocation3 + $0x28] sm:$0xff] %v730_v17  ;;  %v722_v44 = vadd.f32 %v692_v18, %v585_v28 }
 0x17d   :  { %738 = vst [vmem:[#allocation3 + $0x48] sm:$0xff] %v722_v44 }
 0x17f   :  { %v544_v20 = vpop.xlane.xlu1 %543 }
 0x180   :  { %v560_v21 = vadd.f32 %v544_v20, %v512_v19 }
 0x182   :  { %577 = vst.msk [vmem:[#allocation2 + $0x78] sm:$0xff] %vm99_vm0, %v560_v21 }
 0x183 PF:  { %v754_v51 = vld [vmem:[#allocation2 + $0x20] sm:$0xff]  ;;  %v752_v22 = vld [vmem:[#allocation2 + $0x10] sm:$0xff]  ;;  %v1198_v24 = vmov 0   ;;  %v755_v31 = vld [vmem:[#allocation2 + $0x28] sm:$0xff] }
 0x184   :  { %v750_v25 = vld [vmem:[#allocation2] sm:$0xff]  ;;  %1162 = vset.pattern.permute.xlu2 %v1198_v24  ;;  %1161 = vset.pattern.permute.xlu1 %v1198_v24  ;;  %v770_v26 = vmax.f32 %v754_v51, 1e-20  ;;  %v768_v29 = vmax.f32 %v752_v22, 1e-20  ;;  %v753_v32 = vld [vmem:[#allocation2 + $0x18] sm:$0xff] }
 0x185   :  { %v766_v30 = vmax.f32 %v750_v25, 1e-20  ;;  %1160 = vset.pattern.permute.xlu0 %v1198_v24  ;;  %v751_v33 = vld [vmem:[#allocation2 + $0x8] sm:$0xff]  ;;  %v771_v34 = vmax.f32 %v755_v31, 1e-20  ;;  %v758_v35 = vld [vmem:[#allocation2 + $0x40] sm:$0xff] }
 0x186   :  { %1164 = vrcp.f32 %v770_v26  ;;  %v769_v36 = vmax.f32 %v753_v32, 1e-20  ;;  %v767_v37 = vmax.f32 %v751_v33, 1e-20  ;;  %v757_v42 = vld [vmem:[#allocation2 + $0x38] sm:$0xff]  ;;  %v756_v9 = vld [vmem:[#allocation2 + $0x30] sm:$0xff] }
 0x187   :  { %1166 = vrcp.f32 %v768_v29  ;;  %v774_v43 = vmax.f32 %v758_v35, 1e-20  ;;  %v773_v45 = vmax.f32 %v757_v42, 1e-20  ;;  %v772_v57 = vmax.f32 %v756_v9, 1e-20 }
 0x188   :  { %1168 = vrcp.f32 %v766_v30  ;;  %v761_v52 = vld [vmem:[#allocation2 + $0x58] sm:$0xff]  ;;  %v760_v54 = vld [vmem:[#allocation2 + $0x50] sm:$0xff]  ;;  %v759_v59 = vld [vmem:[#allocation2 + $0x48] sm:$0xff] }
 0x189   :  { %1170 = vrcp.f32 %v771_v34  ;;  %v777_v56 = vmax.f32 %v761_v52, 1e-20  ;;  %v776_v58 = vmax.f32 %v760_v54, 1e-20  ;;  %v775_v61 = vmax.f32 %v759_v59, 1e-20 }
 0x18a   :  { %1172 = vrcp.f32 %v769_v36  ;;  %v764_v46 = vld [vmem:[#allocation2 + $0x70] sm:$0xff]  ;;  %v763_v0 = vld [vmem:[#allocation2 + $0x68] sm:$0xff]  ;;  %v762_v40 = vld [vmem:[#allocation2 + $0x60] sm:$0xff] }
 0x18b   :  { %1174 = vrcp.f32 %v767_v37  ;;  %v780_v55 = vmax.f32 %v764_v46, 1e-20  ;;  %v779_v2 = vmax.f32 %v763_v0, 1e-20  ;;  %v778_v4 = vmax.f32 %v762_v40, 1e-20 }
 0x18c   :  { %v1165_v38 = vpop.eup %1164  ;;  %1176 = vrcp.f32 %v774_v43  ;;  %v765_v3 = vld [vmem:[#allocation2 + $0x78] sm:$0xff]  ;;  %v786_v12 = vld [vmem:[#allocation3 + $0x50] sm:$0xff]  ;;  %v787_v14 = vld [vmem:[#allocation3 + $0x68] sm:$0xff] }
 0x18d   :  { %v1167_v1 = vpop.eup %1166  ;;  %836 = vperm.xlu2 %1162, %v1165_v38   ;;  %1178 = vrcp.f32 %v773_v45  ;;  %v781_v5 = vmax.f32 %v765_v3, 1e-20  ;;  %v1559_v23 = vld [vmem:[%s1605_s7] ss:$0 sm:$0xff]  ;;  %v784_v19 = vld [vmem:[#allocation3 + $0x58] sm:$0xff]  ;;  %v782_v21 = vld [vmem:[#allocation3 + $0x30] sm:$0xff] }
 0x18e   :  { %v1169_v39 = vpop.eup %1168  ;;  %826 = vperm.xlu1 %1161, %v1167_v1   ;;  %1180 = vrcp.f32 %v772_v57  ;;  %v785_v51 = vld [vmem:[#allocation3 + $0x18] sm:$0xff]  ;;  %v783_v22 = vld [vmem:[#allocation3] sm:$0xff]  ;;  %v789_v1 = vld [vmem:[#allocation3 + $0x48] sm:$0xff] }
 0x18f   :  { %816 = vperm.xlu0 %1160, %v1169_v39   ;;  %v1171_v47 = vpop.eup %1170  ;;  %1182 = vrcp.f32 %v777_v56  ;;  %v788_v35 = vld [vmem:[#allocation3 + $0x8] sm:$0xff]  ;;  %v792_v54 = vld [vmem:[#allocation3 + $0x10] sm:$0xff]  ;;  %v791_v56 = vld [vmem:[#allocation3 + $0x20] sm:$0xff] }
 0x190   :  { %v1173_v27 = vpop.eup %1172  ;;  %1184 = vrcp.f32 %v776_v58 }
 0x191   :  { %v1175_v48 = vpop.eup %1174  ;;  %1186 = vrcp.f32 %v775_v61 }
 0x192   :  { %v1177_v60 = vpop.eup %1176  ;;  %1188 = vrcp.f32 %v780_v55 }
 0x193   :  { %v1179_v62 = vpop.eup %1178  ;;  %1190 = vrcp.f32 %v779_v2 }
 0x194   :  { %v1181_v63 = vpop.eup %1180  ;;  %1192 = vrcp.f32 %v778_v4  ;;  %v795_v4 = vld [vmem:[#allocation3 + $0x70] sm:$0xff] }
 0x195   :  { %841 = vperm.xlu2 %1162, %v1171_v47   ;;  %v1183_v50 = vpop.eup %1182  ;;  %1194 = vrcp.f32 %v781_v5  ;;  %v793_v47 = vld [vmem:[#allocation3 + $0x38] sm:$0xff] }
 0x196   :  { %831 = vperm.xlu1 %1161, %v1173_v27   ;;  %v1185_v49 = vpop.eup %1184  ;;  %v790_v27 = vld [vmem:[#allocation3 + $0x40] sm:$0xff] }
 0x197   :  { %821 = vperm.xlu0 %1160, %v1175_v48   ;;  %v1187_v8 = vpop.eup %1186 }
 0x198   :  { %v1189_v6 = vpop.eup %1188 }
 0x199   :  { %v1191_v7 = vpop.eup %1190 }
 0x19a   :  { %v1193_v53 = vpop.eup %1192 }
 0x19b   :  { %v1195_v10 = vpop.eup %1194 }
 0x19d   :  { %856 = vperm.xlu2 %1162, %v1177_v60  }
 0x19e   :  { %851 = vperm.xlu1 %1161, %v1179_v62  }
 0x19f   :  { %846 = vperm.xlu0 %1160, %v1181_v63  }
 0x1a5   :  { %871 = vperm.xlu2 %1162, %v1183_v50  }
 0x1a6   :  { %866 = vperm.xlu1 %1161, %v1185_v49   ;;  %v794_v49 = vld [vmem:[#allocation3 + $0x60] sm:$0xff] }
 0x1a7   :  { %861 = vperm.xlu0 %1160, %v1187_v8  }
 0x1ad   :  { %886 = vperm.xlu2 %1162, %v1189_v6  }
 0x1ae   :  { %881 = vperm.xlu1 %1161, %v1191_v7  }
 0x1af   :  { %876 = vperm.xlu0 %1160, %v1193_v53  }
 0x1b7   :  { %891 = vperm.xlu0 %1160, %v1195_v10   ;;  %v796_v10 = vld [vmem:[#allocation3 + $0x78] sm:$0xff] }
 0x1e7   :  { %v837_v11 = vpop.permute.xlu2 %836 }
 0x1e8   :  { %v898_v13 = vmul.f32 %v837_v11, %v786_v12 }
 0x1ea   :  { %v918_v15 = vadd.f32 %v1559_v23, %v898_v13  ;;  %v797_v13 = vld [vmem:[#allocation3 + $0x28] sm:$0xff] }
 0x1ef   :  { %v842_v41 = vpop.permute.xlu2 %841 }
 0x1f0   :  { %v899_v16 = vmul.f32 %v842_v41, %v787_v14 }
 0x1f2   :  { %v919_v28 = vadd.f32 %v1559_v23, %v899_v16 }
 0x1f4   :  { %v1063_v17 = vpack.c.bf16 %v919_v28, %v918_v15 }
 0x1f6   :  { %1091 = vst [vmem:[%s1606_s8 + $0x10] sm:$0xff] %v1063_v17  }
 0x1f7   :  { %v857_v33 = vpop.permute.xlu2 %856 }
 0x1f8   :  { %v902_v58 = vmul.f32 %v857_v33, %v790_v27 }
 0x1fa   :  { %v922_v40 = vadd.f32 %v1559_v23, %v902_v58 }
 0x1ff   :  { %v872_v48 = vpop.permute.xlu2 %871 }
 0x200   :  { %v827_v18 = vpop.permute.xlu1 %826  ;;  %v905_v59 = vmul.f32 %v872_v48, %v793_v47 }
 0x201   :  { %v817_v44 = vpop.permute.xlu0 %816  ;;  %v896_v20 = vmul.f32 %v827_v18, %v784_v19 }
 0x202   :  { %v894_v25 = vmul.f32 %v817_v44, %v782_v21  ;;  %v925_v46 = vadd.f32 %v1559_v23, %v905_v59 }
 0x203   :  { %v916_v26 = vadd.f32 %v1559_v23, %v896_v20 }
 0x204   :  { %v914_v34 = vadd.f32 %v1559_v23, %v894_v25 }
 0x207   :  { %v887_v11 = vpop.permute.xlu2 %886 }
 0x208   :  { %v832_v24 = vpop.permute.xlu1 %831  ;;  %v908_v14 = vmul.f32 %v887_v11, %v796_v10 }
 0x209   :  { %v897_v29 = vmul.f32 %v832_v24, %v785_v51  ;;  %v822_v30 = vpop.permute.xlu0 %821 }
 0x20a   :  { %v895_v31 = vmul.f32 %v822_v30, %v783_v22  ;;  %v928_v16 = vadd.f32 %v1559_v23, %v908_v14 }
 0x20b   :  { %v917_v32 = vadd.f32 %v1559_v23, %v897_v29 }
 0x20c   :  { %v915_v36 = vadd.f32 %v1559_v23, %v895_v31 }
 0x20d   :  { %v1058_v37 = vpack.c.bf16 %v917_v32, %v916_v26 }
 0x20e   :  { %v1053_v38 = vpack.c.bf16 %v915_v36, %v914_v34 }
 0x20f   :  { %1090 = vst [vmem:[%s1606_s8 + $0x8] sm:$0xff] %v1058_v37  }
 0x210   :  { %1054 = vst [vmem:[%s1606_s8] sm:$0xff] %v1053_v38   ;;  %v852_v39 = vpop.permute.xlu1 %851 }
 0x211   :  { %v901_v42 = vmul.f32 %v852_v39, %v789_v1  ;;  %v847_v9 = vpop.permute.xlu0 %846 }
 0x212   :  { %v900_v43 = vmul.f32 %v847_v9, %v788_v35 }
 0x213   :  { %v921_v45 = vadd.f32 %v1559_v23, %v901_v42 }
 0x214   :  { %v920_v57 = vadd.f32 %v1559_v23, %v900_v43 }
 0x216   :  { %v1068_v52 = vpack.c.bf16 %v921_v45, %v920_v57 }
 0x218   :  { %1092 = vst [vmem:[%s1606_s8 + $0x18] sm:$0xff] %v1068_v52   ;;  %v867_v60 = vpop.permute.xlu1 %866 }
 0x219   :  { %v904_v61 = vmul.f32 %v867_v60, %v792_v54  ;;  %v862_v62 = vpop.permute.xlu0 %861 }
 0x21a   :  { %v903_v63 = vmul.f32 %v862_v62, %v791_v56 }
 0x21b   :  { %v924_v0 = vadd.f32 %v1559_v23, %v904_v61 }
 0x21c   :  { %v923_v55 = vadd.f32 %v1559_v23, %v903_v63 }
 0x21d   :  { %v1078_v2 = vpack.c.bf16 %v925_v46, %v924_v0 }
 0x21e   :  { %v1073_v50 = vpack.c.bf16 %v923_v55, %v922_v40 }
 0x21f   :  { %1094 = vst [vmem:[%s1606_s8 + $0x28] sm:$0xff] %v1078_v2  }
 0x220   :  { %1093 = vst [vmem:[%s1606_s8 + $0x20] sm:$0xff] %v1073_v50   ;;  %v882_v8 = vpop.permute.xlu1 %881 }
 0x221   :  { %v907_v3 = vmul.f32 %v882_v8, %v795_v4  ;;  %v877_v6 = vpop.permute.xlu0 %876 }
 0x222   :  { %v906_v5 = vmul.f32 %v877_v6, %v794_v49 }
 0x223   :  { %v927_v7 = vadd.f32 %v1559_v23, %v907_v3 }
 0x224   :  { %v926_v53 = vadd.f32 %v1559_v23, %v906_v5 }
 0x226   :  { %v1083_v12 = vpack.c.bf16 %v927_v7, %v926_v53 }
 0x228   :  { %1095 = vst [vmem:[%s1606_s8 + $0x30] sm:$0xff] %v1083_v12  }
 0x229   :  { %v892_v41 = vpop.permute.xlu0 %891 }
 0x22a   :  { %v909_v15 = vmul.f32 %v892_v41, %v797_v13 }
 0x22c   :  { %v929_v28 = vadd.f32 %v1559_v23, %v909_v15 }
 0x22e   :  { %v1088_v17 = vpack.c.bf16 %v929_v28, %v928_v16 }
 0x230   :  { %1096 = vst [vmem:[%s1606_s8 + $0x38] sm:$0xff] %v1088_v17  }

// kernel: gat_forward.11
= control target key start
LH: loop header
LB: loop body
LE: loop exit
PB: predicated region body
PF: predicated region fallthrough
CT: control target
= control target key end

     0   :  { %vm99_vm0 = vcmask 7168   ;;  %v1600_v0 = vmov 0.0   ;;  %s2569_s0 = inlined_call_operand.<no memory space> [shape: s32[1], index: 0, kind: input, shape index: {}]   ;;  %s2570_s1 = inlined_call_operand.<no memory space> [shape: s32[1], index: 1, kind: input, shape index: {}]   ;;  %s2571_s2 = inlined_call_operand.vmem [shape: f32[128,1], index: 2, kind: input, shape index: {}]   ;;  %s2572_s4 = inlined_call_operand.vmem [shape: f32[128,1], index: 4, kind: input, shape index: {}]   ;;  %s2573_s7 = inlined_call_operand.vmem [shape: f32[1,128], index: 7, kind: input, shape index: {}]   ;;  %s2574_s8 = inlined_call_operand.vmem [shape: f32[128,128], index: 8, kind: output, shape index: {}]   ;;  %s2575_s3 = inlined_call_operand.vmem [shape: f32[1,128], index: 3, kind: input, shape index: {}]   ;;  %s2576_s6 = inlined_call_operand.vmem [shape: s8[128,128], index: 6, kind: input, shape index: {}]   ;;  %s2577_s5 = inlined_call_operand.vmem [shape: bf16[128,128], index: 5, kind: input, shape index: {}]  }
   0x1   :  { %p72_p0 = scmp.lt.s32.totalorder %s2569_s0, 0  ;;  %s1368_s9 = sshll.u32 %s2569_s0, 4  ;;  %100 = vst.msk [vmem:[#allocation2] sm:$0xff] %vm99_vm0, %v1600_v0 }
   0x2   :  { %p80_p1 = scmp.lt.s32.totalorder %s1368_s9, 15  ;;  %101 = vst.msk [vmem:[#allocation2 + $0x8] sm:$0xff] %vm99_vm0, %v1600_v0  ;;  %p1372_p2 = scmp.le.s32.totalorder %s2570_s1, 0 }
   0x3   :  { %s2615_s0 = smov (!%p72_p0, %s2569_s0), 0  ;;  %102 = vst.msk [vmem:[#allocation2 + $0x10] sm:$0xff] %vm99_vm0, %v1600_v0 }
   0x4   :  { %s2617_s9 = smov (!%p80_p1, %s1368_s9), 15  ;;  %103 = vst.msk [vmem:[#allocation2 + $0x18] sm:$0xff] %vm99_vm0, %v1600_v0  ;;  %s74_s14 = scalar_lea.vmem %s2575_s3, %s2615_s0 }
   0x5   :  { %s1370_s15 = sshll.u32 %s2615_s0, 3  ;;  %104 = vst.msk [vmem:[#allocation2 + $0x20] sm:$0xff] %vm99_vm0, %v1600_v0  ;;  %s1369_s16 = sshll.u32 %s2617_s9, 2 }
   0x6   :  { %s1672_s19 = scalar_lea.vmem %s2576_s6, %s1370_s15  ;;  %105 = vst.msk [vmem:[#allocation2 + $0x28] sm:$0xff] %vm99_vm0, %v1600_v0  ;;  %s1678_s22 = scalar_lea.vmem %s2577_s5, %s1369_s16 }
   0x7   :  { %106 = vst.msk [vmem:[#allocation2 + $0x30] sm:$0xff] %vm99_vm0, %v1600_v0 }
   0x8   :  { %107 = vst.msk [vmem:[#allocation2 + $0x38] sm:$0xff] %vm99_vm0, %v1600_v0 }
   0x9   :  { %108 = vst.msk [vmem:[#allocation2 + $0x40] sm:$0xff] %vm99_vm0, %v1600_v0 }
   0xa   :  { %109 = vst.msk [vmem:[#allocation2 + $0x48] sm:$0xff] %vm99_vm0, %v1600_v0 }
   0xb   :  { %110 = vst.msk [vmem:[#allocation2 + $0x50] sm:$0xff] %vm99_vm0, %v1600_v0 }
   0xc   :  { %111 = vst.msk [vmem:[#allocation2 + $0x58] sm:$0xff] %vm99_vm0, %v1600_v0 }
   0xd   :  { %112 = vst.msk [vmem:[#allocation2 + $0x60] sm:$0xff] %vm99_vm0, %v1600_v0 }
   0xe   :  { %113 = vst.msk [vmem:[#allocation2 + $0x68] sm:$0xff] %vm99_vm0, %v1600_v0 }
   0xf   :  { %114 = vst.msk [vmem:[#allocation2 + $0x70] sm:$0xff] %vm99_vm0, %v1600_v0 }
  0x10   :  { %115 = vst.msk [vmem:[#allocation2 + $0x78] sm:$0xff] %vm99_vm0, %v1600_v0 }
  0x11   :  { %116 = vst [vmem:[#allocation3 + $0x30] sm:$0xff] %v1600_v0 }
  0x12   :  { %117 = vst [vmem:[#allocation3] sm:$0xff] %v1600_v0 }
  0x13   :  { %118 = vst [vmem:[#allocation3 + $0x58] sm:$0xff] %v1600_v0 }
  0x14   :  { %119 = vst [vmem:[#allocation3 + $0x18] sm:$0xff] %v1600_v0 }
  0x15   :  { %120 = vst [vmem:[#allocation3 + $0x50] sm:$0xff] %v1600_v0 }
  0x16   :  { %121 = vst [vmem:[#allocation3 + $0x68] sm:$0xff] %v1600_v0 }
  0x17   :  { %122 = vst [vmem:[#allocation3 + $0x8] sm:$0xff] %v1600_v0 }
  0x18   :  { %123 = vst [vmem:[#allocation3 + $0x48] sm:$0xff] %v1600_v0 }
  0x19   :  { %124 = vst [vmem:[#allocation3 + $0x40] sm:$0xff] %v1600_v0 }
  0x1a   :  { %125 = vst [vmem:[#allocation3 + $0x20] sm:$0xff] %v1600_v0 }
  0x1b   :  { %126 = vst [vmem:[#allocation3 + $0x10] sm:$0xff] %v1600_v0 }
  0x1c   :  { %127 = vst [vmem:[#allocation3 + $0x38] sm:$0xff] %v1600_v0  ;;  %136 = sbr.rel (%p1372_p2) target bundleno = 387 (0x183), region = 33 }
  0x1d   :  { %128 = vst [vmem:[#allocation3 + $0x60] sm:$0xff] %v1600_v0 }
  0x1e   :  { %129 = vst [vmem:[#allocation3 + $0x70] sm:$0xff] %v1600_v0 }
  0x1f   :  { %130 = vst [vmem:[#allocation3 + $0x78] sm:$0xff] %v1600_v0 }
  0x20   :  { %131 = vst [vmem:[#allocation3 + $0x28] sm:$0xff] %v1600_v0 }
  0x21   :  { %v193_v1 = vld [vmem:[%s2571_s2 + $0x20] sm:$0xff]  ;;  %v191_v2 = vld [vmem:[%s2571_s2 + $0x10] sm:$0xff]  ;;  %v1601_v4 = vmov 0   ;;  %v194_v5 = vld [vmem:[%s2571_s2 + $0x28] sm:$0xff] }
  0x22   :  { %v189_v3 = vld [vmem:[%s2571_s2] sm:$0xff]  ;;  %1466 = vset.pattern.permute.xlu2 %v1601_v4  ;;  %1465 = vset.pattern.permute.xlu1 %v1601_v4  ;;  %v192_v6 = vld [vmem:[%s2571_s2 + $0x18] sm:$0xff]  ;;  %v190_v7 = vld [vmem:[%s2571_s2 + $0x8] sm:$0xff] }
  0x23   :  { %1464 = vset.pattern.permute.xlu0 %v1601_v4  ;;  %228 = vperm.xlu2 %1466, %v193_v1   ;;  %v201_v8 = vld [vmem:[%s2571_s2 + $0x60] sm:$0xff]  ;;  %v198_v9 = vld [vmem:[%s2571_s2 + $0x48] sm:$0xff]  ;;  %v203_v20 = vld [vmem:[%s2571_s2 + $0x70] sm:$0xff] }
  0x24   :  { %218 = vperm.xlu1 %1465, %v191_v2   ;;  %208 = vperm.xlu0 %1464, %v189_v3   ;;  %v197_v10 = vld [vmem:[%s2571_s2 + $0x40] sm:$0xff]  ;;  %v346_v11 = vld [vmem:[%s2572_s4 + $0x48] sm:$0xff]  ;;  %v200_v21 = vld [vmem:[%s2571_s2 + $0x58] sm:$0xff] }
  0x25   :  { %v345_v12 = vld [vmem:[%s2572_s4 + $0x40] sm:$0xff]  ;;  %v202_v13 = vld [vmem:[%s2571_s2 + $0x68] sm:$0xff]  ;;  %v199_v22 = vld [vmem:[%s2571_s2 + $0x50] sm:$0xff] }
  0x26   :  { %v337_v14 = vld [vmem:[%s2572_s4] sm:$0xff]  ;;  %v350_v15 = vld [vmem:[%s2572_s4 + $0x68] sm:$0xff]  ;;  %v196_v23 = vld [vmem:[%s2571_s2 + $0x38] sm:$0xff] }
  0x27   :  { %v349_v16 = vld [vmem:[%s2572_s4 + $0x60] sm:$0xff]  ;;  %v342_v17 = vld [vmem:[%s2572_s4 + $0x28] sm:$0xff]  ;;  %v195_v24 = vld [vmem:[%s2571_s2 + $0x30] sm:$0xff] }
  0x28   :  { %v341_v18 = vld [vmem:[%s2572_s4 + $0x20] sm:$0xff]  ;;  %v338_v19 = vld [vmem:[%s2572_s4 + $0x8] sm:$0xff]  ;;  %v204_v25 = vld [vmem:[%s2571_s2 + $0x78] sm:$0xff] }
  0x29   :  { %v351_v26 = vld [vmem:[%s2572_s4 + $0x70] sm:$0xff]  ;;  %v348_v27 = vld [vmem:[%s2572_s4 + $0x58] sm:$0xff]  ;;  %v1434_v37 = vld [vmem:[%s1678_s22 + $0x28] sm:$0xff] }
  0x2a   :  { %v347_v28 = vld [vmem:[%s2572_s4 + $0x50] sm:$0xff]  ;;  %v340_v29 = vld [vmem:[%s2572_s4 + $0x18] sm:$0xff]  ;;  %v1433_v39 = vld [vmem:[%s1678_s22 + $0x20] sm:$0xff] }
  0x2b   :  { %233 = vperm.xlu2 %1466, %v194_v5   ;;  %v339_v30 = vld [vmem:[%s2572_s4 + $0x10] sm:$0xff]  ;;  %v352_v31 = vld [vmem:[%s2572_s4 + $0x78] sm:$0xff]  ;;  %v1430_v43 = vld [vmem:[%s1678_s22 + $0x8] sm:$0xff] }
  0x2c   :  { %223 = vperm.xlu1 %1465, %v192_v6   ;;  %213 = vperm.xlu0 %1464, %v190_v7   ;;  %v344_v32 = vld [vmem:[%s2572_s4 + $0x38] sm:$0xff]  ;;  %v343_v33 = vld [vmem:[%s2572_s4 + $0x30] sm:$0xff]  ;;  %v1805_v44 = vld [vmem:[%s74_s14] ss:$0 sm:$0xff] }
  0x2d   :  { %v1436_v34 = vld [vmem:[%s1678_s22 + $0x38] sm:$0xff]  ;;  %v1435_v36 = vld [vmem:[%s1678_s22 + $0x30] sm:$0xff]  ;;  %v1429_v49 = vld [vmem:[%s1678_s22] sm:$0xff] }
  0x2e   :  { %1438 = vmatpush.bf16.msra.mxu2 %v1436_v34  ;;  %1439 = vmatpush.bf16.msra.mxu3 %v1436_v34  ;;  %v1432_v40 = vld [vmem:[%s1678_s22 + $0x18] sm:$0xff]  ;;  %v1431_v42 = vld [vmem:[%s1678_s22 + $0x10] sm:$0xff]  ;;  %v1812_v51 = vld [vmem:[%s1672_s19] sm:$0xff] }
  0x2f   :  { %666 = vmatpush.bf16.msra.mxu0 %v1436_v34  ;;  %1437 = vmatpush.bf16.msra.mxu1 %v1436_v34  ;;  %v141_v57 = vunpack.c.0.s8 %v1812_v51  ;;  %v1828_v5 = vld [vmem:[%s1672_s19 + $0x10] sm:$0xff] }
  0x31   :  { %v1817_v59 = vcvt.s32.f32 %v141_v57  ;;  %v1869_v57 = vld [vmem:[%s1672_s19 + $0x8] sm:$0xff] }
  0x32   :  { %1441 = vmatpush.bf16.msra.mxu2 %v1435_v36  ;;  %1442 = vmatpush.bf16.msra.mxu3 %v1435_v36 }
  0x33   :  { %268 = vperm.xlu2 %1466, %v201_v8   ;;  %667 = vmatpush.bf16.msra.mxu0 %v1435_v36  ;;  %vm173_vm1 = vcmp.gt.f32.partialorder %v1817_v59, 0.0 }
  0x34   :  { %253 = vperm.xlu1 %1465, %v198_v9   ;;  %248 = vperm.xlu0 %1464, %v197_v10  }
  0x35   :  { %1440 = vmatpush.bf16.msra.mxu1 %v1435_v36 }
  0x36   :  { %1444 = vmatpush.bf16.msra.mxu2 %v1434_v37  ;;  %1445 = vmatpush.bf16.msra.mxu3 %v1434_v37 }
  0x37   :  { %668 = vmatpush.bf16.msra.mxu0 %v1434_v37 }
  0x39   :  { %1443 = vmatpush.bf16.msra.mxu1 %v1434_v37 }
  0x3a   :  { %1447 = vmatpush.bf16.msra.mxu2 %v1433_v39  ;;  %1448 = vmatpush.bf16.msra.mxu3 %v1433_v39 }
  0x3b   :  { %400 = vperm.xlu2 %1466, %v346_v11   ;;  %669 = vmatpush.bf16.msra.mxu0 %v1433_v39  ;;  %v150_v11 = vunpack.c.1.s8 %v1828_v5 }
  0x3c   :  { %395 = vperm.xlu1 %1465, %v345_v12   ;;  %273 = vperm.xlu0 %1464, %v202_v13  }
  0x3d   :  { %1446 = vmatpush.bf16.msra.mxu1 %v1433_v39 }
  0x3e   :  { %1450 = vmatpush.bf16.msra.mxu2 %v1432_v40  ;;  %1451 = vmatpush.bf16.msra.mxu3 %v1432_v40 }
  0x3f   :  { %670 = vmatpush.bf16.msra.mxu0 %v1432_v40 }
  0x41   :  { %1449 = vmatpush.bf16.msra.mxu1 %v1432_v40 }
  0x42   :  { %1453 = vmatpush.bf16.msra.mxu2 %v1431_v42  ;;  %1454 = vmatpush.bf16.msra.mxu3 %v1431_v42 }
  0x43   :  { %355 = vperm.xlu2 %1466, %v337_v14   ;;  %671 = vmatpush.bf16.msra.mxu0 %v1431_v42  ;;  %v149_v14 = vunpack.c.0.s8 %v1828_v5 }
  0x44   :  { %420 = vperm.xlu1 %1465, %v350_v15   ;;  %415 = vperm.xlu0 %1464, %v349_v16  }
  0x45   :  { %1452 = vmatpush.bf16.msra.mxu1 %v1431_v42 }
  0x46   :  { %1456 = vmatpush.bf16.msra.mxu2 %v1430_v43  ;;  %1457 = vmatpush.bf16.msra.mxu3 %v1430_v43 }
  0x47   :  { %672 = vmatpush.bf16.msra.mxu0 %v1430_v43 }
  0x49   :  { %1455 = vmatpush.bf16.msra.mxu1 %v1430_v43 }
  0x4a   :  { %1459 = vmatpush.bf16.msra.mxu2 %v1429_v49  ;;  %1460 = vmatpush.bf16.msra.mxu3 %v1429_v49 }
  0x4b   :  { %380 = vperm.xlu2 %1466, %v342_v17   ;;  %673 = vmatpush.bf16.msra.mxu0 %v1429_v49 }
  0x4c   :  { %375 = vperm.xlu1 %1465, %v341_v18   ;;  %360 = vperm.xlu0 %1464, %v338_v19  }
  0x4d   :  { %1458 = vmatpush.bf16.msra.mxu1 %v1429_v49 }
  0x53   :  { %278 = vperm.xlu2 %1466, %v203_v20  }
  0x54   :  { %263 = vperm.xlu1 %1465, %v200_v21   ;;  %258 = vperm.xlu0 %1464, %v199_v22   ;;  %v166_v22 = vcvt.s32.f32 %v150_v11 }
  0x56   :  { %vm182_vm2 = vcmp.gt.f32.partialorder %v166_v22, 0.0 }
  0x5b   :  { %243 = vperm.xlu2 %1466, %v196_v23   ;;  %v1838_v23 = vcvt.s32.f32 %v149_v14 }
  0x5c   :  { %238 = vperm.xlu1 %1465, %v195_v24   ;;  %283 = vperm.xlu0 %1464, %v204_v25   ;;  %v1841_v24 = vld [vmem:[%s1672_s19 + $0x18] sm:$0xff] }
  0x5d   :  { %vm181_vm3 = vcmp.gt.f32.partialorder %v1838_v23, 0.0  ;;  %v155_v23 = vunpack.c.2.s8 %v1841_v24 }
  0x5e   :  { %vm1417_vm4 = vmpackc.low %vm182_vm2, %vm181_vm3 }
  0x63   :  { %425 = vperm.xlu2 %1466, %v351_v26  }
  0x64   :  { %410 = vperm.xlu1 %1465, %v348_v27   ;;  %405 = vperm.xlu0 %1464, %v347_v28  }
  0x6b   :  { %370 = vperm.xlu2 %1466, %v340_v29  }
  0x6c   :  { %365 = vperm.xlu1 %1465, %v339_v30   ;;  %430 = vperm.xlu0 %1464, %v352_v31  }
  0x74   :  { %390 = vperm.xlu1 %1465, %v344_v32   ;;  %385 = vperm.xlu0 %1464, %v343_v33   ;;  %v153_v33 = vunpack.c.0.s8 %v1841_v24 }
  0x76   :  { %v1860_v49 = vcvt.s32.f32 %v153_v33 }
  0x78   :  { %vm185_vm5 = vcmp.gt.f32.partialorder %v1860_v49, 0.0  ;;  %v500_v49 = vld [vmem:[#allocation2 + $0x18] sm:$0xff] }
  0x7d   :  { %v1790_v35 = vpop.permute.xlu2 %228 }
  0x7e   :  { %v293_v25 = vadd.f32 %v1805_v44, %v1790_v35 }
  0x80   :  { %v309_v35 = vmul.f32 0.2, %v293_v25 }
  0x85   :  { %v1794_v38 = vpop.permute.xlu2 %233 }
  0x86   :  { %v294_v18 = vadd.f32 %v1805_v44, %v1794_v38  ;;  %v154_v38 = vunpack.c.1.s8 %v1841_v24 }
  0x88   :  { %v310_v26 = vmul.f32 0.2, %v294_v18 }
  0x8a   :  { %v326_v39 = vmax.f32 %v294_v18, %v310_v26 }
  0x8d   :  { %v269_v41 = vpop.permute.xlu2 %268 }
  0x8e   :  { %v301_v7 = vadd.f32 %v1805_v44, %v269_v41 }
  0x90   :  { %v317_v19 = vmul.f32 0.2, %v301_v7 }
  0x92   :  { %v333_v30 = vmax.f32 %v301_v7, %v317_v19  ;;  %v144_v19 = vunpack.c.3.s8 %v1812_v51 }
  0x95   :  { %v401_v45 = vpop.permute.xlu2 %400 }
  0x96   :  { %v1807_v46 = vpop.permute.xlu1 %218  ;;  %v209_v47 = vpop.permute.xlu0 %208 }
  0x97   :  { %v289_v48 = vadd.f32 %v1805_v44, %v209_v47 }
  0x99   :  { %v305_v50 = vmul.f32 0.2, %v289_v48 }
  0x9b   :  { %v321_v52 = vmax.f32 %v289_v48, %v305_v50  ;;  %v1862_v50 = vcvt.s32.f32 %v154_v38 }
  0x9d   :  { %v356_v53 = vpop.permute.xlu2 %355  ;;  %vm186_vm6 = vcmp.gt.f32.partialorder %v1862_v50, 0.0 }
  0x9e   :  { %v433_v54 = vsub.f32 %v321_v52, %v356_v53  ;;  %v1814_v55 = vpop.permute.xlu1 %223  ;;  %v214_v56 = vpop.permute.xlu0 %213  ;;  %vm1423_vm7 = vmpackc.low %vm186_vm6, %vm185_vm5 }
  0x9f   :  { %v290_v27 = vadd.f32 %v1805_v44, %v214_v56  ;;  %v292_v52 = vadd.f32 %v1805_v44, %v1814_v55  ;;  %v142_v55 = vunpack.c.1.s8 %v1812_v51 }
  0xa0   :  { %v449_v58 = vmul.f32 1.442695, %v433_v54  ;;  %v325_v54 = vmax.f32 %v293_v25, %v309_v35 }
  0xa1   :  { %v306_v42 = vmul.f32 0.2, %v290_v27 }
  0xa2   :  { %1468 = vpow2.f32 %v449_v58 }
  0xa3   :  { %v322_v56 = vmax.f32 %v290_v27, %v306_v42  ;;  %v1891_v27 = vcvt.s32.f32 %v144_v19  ;;  %v291_v42 = vadd.f32 %v1805_v44, %v1807_v46 }
  0xa5   :  { %v381_v60 = vpop.permute.xlu2 %380  ;;  %vm176_vm13 = vcmp.gt.f32.partialorder %v1891_v27, 0.0 }
  0xa6   :  { %v254_v61 = vpop.permute.xlu1 %253  ;;  %v249_v62 = vpop.permute.xlu0 %248  ;;  %v438_v47 = vsub.f32 %v326_v39, %v381_v60 }
  0xa7   :  { %v298_v63 = vadd.f32 %v1805_v44, %v254_v61  ;;  %v297_v0 = vadd.f32 %v1805_v44, %v249_v62  ;;  %v145_v62 = vunpack.c.0.s8 %v1869_v57 }
  0xa8   :  { %v1822_v1 = vpop.eup %1468  ;;  %v459_v58 = vmul.f32 1.442695, %v438_v47 }
  0xa9   :  { %v314_v2 = vmul.f32 0.2, %v298_v63  ;;  %v313_v3 = vmul.f32 0.2, %v297_v0  ;;  %v481_v4 = vsel %vm173_vm1, %v1822_v1, 0.0 }
  0xaa   :  { %513 = vadd.xlane.f32.xlu2 %v481_v4 }
  0xab   :  { %v330_v6 = vmax.f32 %v298_v63, %v314_v2  ;;  %v329_v10 = vmax.f32 %v297_v0, %v313_v3  ;;  %v308_v2 = vmul.f32 0.2, %v292_v52  ;;  %v146_v3 = vunpack.c.1.s8 %v1869_v57 }
  0xad   :  { %v442_v8 = vsub.f32 %v330_v6, %v401_v45  ;;  %v1831_v9 = vpop.permute.xlu2 %278  ;;  %v162_v14 = vcvt.s32.f32 %v146_v3 }
  0xae   :  { %v396_v12 = vpop.permute.xlu1 %395  ;;  %v274_v13 = vpop.permute.xlu0 %273  ;;  %v303_v33 = vadd.f32 %v1805_v44, %v1831_v9 }
  0xaf   :  { %v467_v15 = vmul.f32 1.442695, %v442_v8  ;;  %v441_v16 = vsub.f32 %v329_v10, %v396_v12  ;;  %v302_v17 = vadd.f32 %v1805_v44, %v274_v13  ;;  %v161_v10 = vcvt.s32.f32 %v145_v62 }
  0xb0   :  { %v158_v12 = vcvt.s32.f32 %v142_v55  ;;  %v324_v13 = vmax.f32 %v292_v52, %v308_v2  ;;  %vm178_vm10 = vcmp.gt.f32.partialorder %v162_v14, 0.0  ;;  %v319_v35 = vmul.f32 0.2, %v303_v33 }
  0xb1   :  { %1470 = vpow2.f32 %v467_v15  ;;  %v465_v20 = vmul.f32 1.442695, %v441_v16  ;;  %v318_v21 = vmul.f32 0.2, %v302_v17  ;;  %vm177_vm8 = vcmp.gt.f32.partialorder %v161_v10, 0.0 }
  0xb2   :  { %vm174_vm9 = vcmp.gt.f32.partialorder %v158_v12, 0.0  ;;  %vm1411_vm11 = vmpackc.low %vm178_vm10, %vm177_vm8  ;;  %v335_v47 = vmax.f32 %v303_v33, %v319_v35  ;;  %v143_v14 = vunpack.c.2.s8 %v1812_v51 }
  0xb3   :  { %1472 = vpow2.f32 %v465_v20  ;;  %v334_v29 = vmax.f32 %v302_v17, %v318_v21  ;;  %vm1405_vm12 = vmpackc.low %vm174_vm9, %vm173_vm1 }
  0xb4   :  { %v159_v51 = vcvt.s32.f32 %v143_v14 }
  0xb5   :  { %v1846_v28 = vpop.permute.xlu2 %243 }
  0xb6   :  { %v421_v31 = vpop.permute.xlu1 %420  ;;  %v416_v32 = vpop.permute.xlu0 %415 }
  0xb7   :  { %v1471_v34 = vpop.eup %1470  ;;  %v446_v36 = vsub.f32 %v334_v29, %v421_v31  ;;  %v445_v37 = vsub.f32 %v333_v30, %v416_v32 }
  0xb8   :  { %v1852_v40 = vsel %vm182_vm2, %v1471_v34, 0.0  ;;  %vm175_vm2 = vcmp.gt.f32.partialorder %v159_v51, 0.0 }
  0xb9   :  { %v1854_v41 = vpop.eup %1472  ;;  %v475_v43 = vmul.f32 1.442695, %v446_v36  ;;  %v473_v45 = vmul.f32 1.442695, %v445_v37 }
  0xba   :  { %v1418_v48 = vpack.c.bf16 %v1471_v34, %v1854_v41  ;;  %v489_v2 = vsel %vm181_vm3, %v1854_v41, 0.0  ;;  %v156_v41 = vunpack.c.3.s8 %v1841_v24 }
  0xbb   :  { %1474 = vpow2.f32 %v475_v43 }
  0xbc   :  { %1476 = vpow2.f32 %v473_v45  ;;  %1419 = vmatmul.msk.bf16.vlgmr.msra.gmra.mxu2 %vm1417_vm4, %v1418_v48 }
  0xbd   :  { %v1866_v53 = vpop.permute.xlu2 %425  ;;  %1478 = vpow2.f32 %v459_v58  ;;  %v152_v58 = vunpack.c.3.s8 %v1828_v5 }
  0xbe   :  { %v376_v60 = vpop.permute.xlu1 %375  ;;  %v361_v61 = vpop.permute.xlu0 %360 }
  0xbf   :  { %v437_v63 = vsub.f32 %v325_v54, %v376_v60  ;;  %v434_v0 = vsub.f32 %v322_v56, %v361_v61  ;;  %v151_v60 = vunpack.c.2.s8 %v1828_v5  ;;  %v307_v61 = vmul.f32 0.2, %v291_v42 }
  0xc0   :  { %v168_v3 = vcvt.s32.f32 %v152_v58  ;;  %v296_v5 = vadd.f32 %v1805_v44, %v1846_v28 }
  0xc1   :  { %v1876_v4 = vpop.eup %1474  ;;  %v457_v6 = vmul.f32 1.442695, %v437_v63  ;;  %v451_v7 = vmul.f32 1.442695, %v434_v0  ;;  %v447_v63 = vsub.f32 %v335_v47, %v1866_v53  ;;  %v323_v10 = vmax.f32 %v291_v42, %v307_v61 }
  0xc2   :  { %v1878_v8 = vpop.eup %1476  ;;  %vm184_vm14 = vcmp.gt.f32.partialorder %v168_v3, 0.0  ;;  %v312_v28 = vmul.f32 0.2, %v296_v5  ;;  %v494_v58 = vsel %vm186_vm6, %v1876_v4, 0.0 }
  0xc3   :  { %1480 = vpow2.f32 %v457_v6  ;;  %v1424_v11 = vpack.c.bf16 %v1876_v4, %v1878_v8  ;;  %v1479_v20 = vpop.eup %1478  ;;  %v1915_v6 = vcvt.s32.f32 %v151_v60  ;;  %v493_v60 = vsel %vm185_vm5, %v1878_v8, 0.0  ;;  %v502_v8 = vld [vmem:[#allocation2 + $0x28] sm:$0xff] }
  0xc4   :  { %1482 = vpow2.f32 %v451_v7  ;;  %v486_v39 = vsel %vm178_vm10, %v1479_v20, 0.0  ;;  %v477_v7 = vmul.f32 1.442695, %v447_v63 }
  0xc5   :  { %1425 = vmatmul.msk.bf16.vlgmr.msra.gmra.mxu3 %vm1423_vm7, %v1424_v11  ;;  %v371_v15 = vpop.permute.xlu2 %370  ;;  %vm183_vm15 = vcmp.gt.f32.partialorder %v1915_v6, 0.0  ;;  %vm1408_vm7 = vmpackc.low %vm176_vm13, %vm175_vm2  ;;  %v587_v6 = vld [vmem:[#allocation3 + $0x20] sm:$0xff] }
  0xc6   :  { %v436_v16 = vsub.f32 %v324_v13, %v371_v15  ;;  %v264_v17 = vpop.permute.xlu1 %263  ;;  %v259_v18 = vpop.permute.xlu0 %258  ;;  %vm1420_vm1 = vmpackc.low %vm184_vm14, %vm183_vm15 }
  0xc7   :  { %v300_v31 = vadd.f32 %v1805_v44, %v264_v17  ;;  %v299_v32 = vadd.f32 %v1805_v44, %v259_v18 }
  0xc8   :  { %v455_v21 = vmul.f32 1.442695, %v436_v16 }
  0xc9   :  { %v1481_v22 = vpop.eup %1480  ;;  %v316_v37 = vmul.f32 0.2, %v300_v31  ;;  %v315_v38 = vmul.f32 0.2, %v299_v32 }
  0xca   :  { %v1483_v25 = vpop.eup %1482  ;;  %1484 = vpow2.f32 %v455_v21  ;;  %v1412_v26 = vpack.c.bf16 %v1479_v20, %v1481_v22  ;;  %v485_v62 = vsel %vm177_vm8, %v1481_v22, 0.0  ;;  %v171_v22 = vcvt.s32.f32 %v155_v23  ;;  %v578_v23 = vld [vmem:[#allocation3 + $0x30] sm:$0xff] }
  0xcb   :  { %v482_v29 = vsel %vm174_vm9, %v1483_v25, 0.0  ;;  %v1406_v30 = vpack.c.bf16 %v1483_v25, %v1822_v1  ;;  %v332_v43 = vmax.f32 %v300_v31, %v316_v37  ;;  %v331_v45 = vmax.f32 %v299_v32, %v315_v38 }
  0xcc   :  { %515 = vadd.xlane.f32.xlu0 %v482_v29  ;;  %1413 = vmatmul.msk.bf16.vlgmr.msra.gmra.mxu1 %vm1411_vm11, %v1412_v26  ;;  %v172_v25 = vcvt.s32.f32 %v156_v41  ;;  %v328_v26 = vmax.f32 %v296_v5, %v312_v28  ;;  %vm187_vm3 = vcmp.gt.f32.partialorder %v171_v22, 0.0  ;;  %v148_v37 = vunpack.c.3.s8 %v1869_v57  ;;  %v583_v22 = vld [vmem:[#allocation3 + $0x68] sm:$0xff] }
  0xcd   :  { %1407 = vmatmul.msk.bf16.vlgmr.msra.gmra.mxu0 %vm1405_vm12, %v1406_v30 }
  0xce   :  { %v239_v34 = vpop.permute.xlu1 %238  ;;  %v284_v36 = vpop.permute.xlu0 %283  ;;  %vm188_vm4 = vcmp.gt.f32.partialorder %v172_v25, 0.0 }
  0xcf   :  { %v304_v9 = vadd.f32 %v1805_v44, %v284_v36  ;;  %v295_v53 = vadd.f32 %v1805_v44, %v239_v34  ;;  %v147_v36 = vunpack.c.2.s8 %v1869_v57  ;;  %vm1426_vm8 = vmpackc.low %vm188_vm4, %vm187_vm3  ;;  %v164_v57 = vcvt.s32.f32 %v148_v37 }
  0xd0   :  { %v1899_v59 = vpop.eup %1484 }
  0xd1   :  { %v484_v1 = vsel %vm176_vm13, %v1899_v59, 0.0  ;;  %v320_v46 = vmul.f32 0.2, %v304_v9  ;;  %v311_v18 = vmul.f32 0.2, %v295_v53  ;;  %v163_v47 = vcvt.s32.f32 %v147_v36 }
  0xd2   :  { %519 = vadd.xlane.f32.xlu2 %v484_v1  ;;  %vm180_vm10 = vcmp.gt.f32.partialorder %v164_v57, 0.0  ;;  %v588_v57 = vld [vmem:[#allocation3 + $0x10] sm:$0xff] }
  0xd3   :  { %v336_v11 = vmax.f32 %v304_v9, %v320_v46  ;;  %v327_v29 = vmax.f32 %v295_v53, %v311_v18  ;;  %vm179_vm9 = vcmp.gt.f32.partialorder %v163_v47, 0.0  ;;  %v501_v18 = vld [vmem:[#allocation2 + $0x20] sm:$0xff] }
  0xd4   :  { %523 = vadd.xlane.f32.xlu0 %v486_v39  ;;  %vm1414_vm11 = vmpackc.low %vm180_vm10, %vm179_vm9 }
  0xd6   :  { %v411_v48 = vpop.permute.xlu1 %410  ;;  %v406_v52 = vpop.permute.xlu0 %405 }
  0xd7   :  { %v444_v54 = vsub.f32 %v332_v43, %v411_v48  ;;  %v443_v56 = vsub.f32 %v331_v45, %v406_v52 }
  0xd9   :  { %v471_v0 = vmul.f32 1.442695, %v444_v54  ;;  %v469_v55 = vmul.f32 1.442695, %v443_v56 }
  0xda   :  { %521 = vadd.xlane.f32.xlu2 %v485_v62  ;;  %v497_v62 = vld [vmem:[#allocation2] sm:$0xff] }
  0xdb   :  { %1486 = vpow2.f32 %v471_v0  ;;  %v498_v0 = vld [vmem:[#allocation2 + $0x8] sm:$0xff] }
  0xdc   :  { %1488 = vpow2.f32 %v469_v55  ;;  %529 = vadd.xlane.f32.xlu0 %v489_v2 }
  0xdd   :  { %1490 = vpow2.f32 %v477_v7  ;;  %v590_v7 = vld [vmem:[#allocation3 + $0x60] sm:$0xff] }
  0xde   :  { %v366_v12 = vpop.permute.xlu1 %365  ;;  %v431_v13 = vpop.permute.xlu0 %430 }
  0xdf   :  { %v435_v15 = vsub.f32 %v323_v10, %v366_v12  ;;  %v448_v16 = vsub.f32 %v336_v11, %v431_v13  ;;  %v582_v11 = vld [vmem:[#allocation3 + $0x50] sm:$0xff] }
  0xe1   :  { %v1487_v17 = vpop.eup %1486  ;;  %v453_v44 = vmul.f32 1.442695, %v435_v15  ;;  %v479_v19 = vmul.f32 1.442695, %v448_v16 }
  0xe2   :  { %v1489_v20 = vpop.eup %1488  ;;  %v492_v21 = vsel %vm184_vm14, %v1487_v17, 0.0 }
  0xe3   :  { %1492 = vpow2.f32 %v453_v44  ;;  %v1421_v24 = vpack.c.bf16 %v1487_v17, %v1489_v20  ;;  %v1491_v32 = vpop.eup %1490  ;;  %v491_v56 = vsel %vm183_vm15, %v1489_v20, 0.0  ;;  %v505_v44 = vld [vmem:[#allocation2 + $0x40] sm:$0xff] }
  0xe4   :  { %1494 = vpow2.f32 %v479_v19  ;;  %535 = vadd.xlane.f32.xlu0 %v492_v21  ;;  %v495_v9 = vsel %vm187_vm3, %v1491_v32, 0.0  ;;  %v591_v21 = vld [vmem:[#allocation3 + $0x70] sm:$0xff] }
  0xe5   :  { %1422 = vmatmul.msk.bf16.gmra.mxu2 %vm1420_vm1, %v1421_v24 }
  0xe6   :  { %v391_v30 = vpop.permute.xlu1 %390  ;;  %v386_v31 = vpop.permute.xlu0 %385 }
  0xe7   :  { %v440_v33 = vsub.f32 %v328_v26, %v391_v30  ;;  %v439_v34 = vsub.f32 %v327_v29, %v386_v31  ;;  %v579_v26 = vld [vmem:[#allocation3] sm:$0xff] }
  0xe9   :  { %v1493_v38 = vpop.eup %1492  ;;  %v463_v1 = vmul.f32 1.442695, %v440_v33  ;;  %v461_v35 = vmul.f32 1.442695, %v439_v34  ;;  %v508_v34 = vld [vmem:[#allocation2 + $0x58] sm:$0xff] }
  0xea   :  { %v1495_v39 = vpop.eup %1494  ;;  %v483_v42 = vsel %vm175_vm2, %v1493_v38, 0.0  ;;  %v1409_v43 = vpack.c.bf16 %v1899_v59, %v1493_v38  ;;  %v499_v38 = vld [vmem:[#allocation2 + $0x10] sm:$0xff] }
  0xeb   :  { %1496 = vpow2.f32 %v463_v1  ;;  %517 = vadd.xlane.f32.xlu1 %v483_v42  ;;  %v1427_v45 = vpack.c.bf16 %v1495_v39, %v1491_v32  ;;  %v496_v61 = vsel %vm188_vm4, %v1495_v39, 0.0  ;;  %v511_v1 = vld [vmem:[#allocation2 + $0x70] sm:$0xff] }
  0xec   :  { %1498 = vpow2.f32 %v461_v35  ;;  %541 = vadd.xlane.f32.xlu0 %v495_v9  ;;  %1410 = vmatmul.msk.bf16.gmra.mxu0 %vm1408_vm7, %v1409_v43  ;;  %v504_v43 = vld [vmem:[#allocation2 + $0x38] sm:$0xff] }
  0xed   :  { %1428 = vmatmul.msk.bf16.gmra.mxu3 %vm1426_vm8, %v1427_v45  ;;  %v503_v45 = vld [vmem:[#allocation2 + $0x30] sm:$0xff] }
  0xf1   :  { %v1497_v27 = vpop.eup %1496 }
  0xf2   :  { %v1499_v48 = vpop.eup %1498  ;;  %v488_v52 = vsel %vm180_vm10, %v1497_v27, 0.0 }
  0xf3   :  { %v487_v54 = vsel %vm179_vm9, %v1499_v48, 0.0  ;;  %527 = vadd.xlane.f32.xlu2 %v488_v52  ;;  %v1415_v59 = vpack.c.bf16 %v1497_v27, %v1499_v48  ;;  %v580_v52 = vld [vmem:[#allocation3 + $0x58] sm:$0xff] }
  0xf4   :  { %525 = vadd.xlane.f32.xlu1 %v487_v54 }
  0xf5   :  { %1416 = vmatmul.msk.bf16.gmra.mxu1 %vm1414_vm11, %v1415_v59 }
  0xfb   :  { %533 = vadd.xlane.f32.xlu2 %v491_v56 }
  0xfc   :  { %531 = vadd.xlane.f32.xlu1 %v1852_v40  ;;  %v586_v40 = vld [vmem:[#allocation3 + $0x40] sm:$0xff] }
 0x103   :  { %539 = vadd.xlane.f32.xlu2 %v494_v58 }
 0x104   :  { %537 = vadd.xlane.f32.xlu1 %v493_v60 }
 0x10c   :  { %543 = vadd.xlane.f32.xlu1 %v496_v61  ;;  %v507_v61 = vld [vmem:[#allocation2 + $0x50] sm:$0xff] }
 0x11d   :  { %v514_v63 = vpop.xlane.xlu2 %513 }
 0x11e   :  { %v545_v46 = vadd.f32 %v514_v63, %v497_v62  ;;  %v506_v62 = vld [vmem:[#allocation2 + $0x48] sm:$0xff] }
 0x120   :  { %562 = vst.msk [vmem:[#allocation2] sm:$0xff] %vm99_vm0, %v545_v46  ;;  %v589_v46 = vld [vmem:[#allocation3 + $0x38] sm:$0xff] }
 0x13f   :  { %v516_v55 = vpop.xlane.xlu0 %515  ;;  %v695_v2 = vpop.f32.mrf.mxu2 }
 0x140   :  { %v546_v50 = vadd.f32 %v516_v55, %v498_v0  ;;  %v723_v4 = vadd.f32 %v695_v2, %v586_v40  ;;  %v592_v0 = vld [vmem:[#allocation3 + $0x78] sm:$0xff] }
 0x141   :  { %v581_v2 = vld [vmem:[#allocation3 + $0x18] sm:$0xff] }
 0x142   :  { %563 = vst.msk [vmem:[#allocation2 + $0x8] sm:$0xff] %vm99_vm0, %v546_v50 }
 0x143   :  { %739 = vst [vmem:[#allocation3 + $0x40] sm:$0xff] %v723_v4 }
 0x145   :  { %v520_v3 = vpop.xlane.xlu2 %519 }
 0x146   :  { %v548_v5 = vadd.f32 %v520_v3, %v500_v49 }
 0x147   :  { %v524_v53 = vpop.xlane.xlu0 %523  ;;  %v697_v10 = vpop.f32.mrf.mxu2 }
 0x148   :  { %v550_v12 = vadd.f32 %v524_v53, %v502_v8  ;;  %565 = vst.msk [vmem:[#allocation2 + $0x18] sm:$0xff] %vm99_vm0, %v548_v5  ;;  %v724_v13 = vadd.f32 %v697_v10, %v587_v6  ;;  %v705_v14 = vpop.f32.mrf.mxu3  ;;  %v584_v8 = vld [vmem:[#allocation3 + $0x8] sm:$0xff] }
 0x149   :  { %v727_v41 = vadd.f32 %v705_v14, %v590_v7  ;;  %v685_v15 = vpop.f32.mrf.mxu1  ;;  %v593_v14 = vld [vmem:[#allocation3 + $0x28] sm:$0xff] }
 0x14a   :  { %567 = vst.msk [vmem:[#allocation2 + $0x28] sm:$0xff] %vm99_vm0, %v550_v12  ;;  %v675_v16 = vpop.f32.mrf.mxu0  ;;  %v719_v28 = vadd.f32 %v685_v15, %v582_v11  ;;  %v510_v11 = vld [vmem:[#allocation2 + $0x68] sm:$0xff]  ;;  %v509_v12 = vld [vmem:[#allocation2 + $0x60] sm:$0xff] }
 0x14b   :  { %740 = vst [vmem:[#allocation3 + $0x20] sm:$0xff] %v724_v13  ;;  %v715_v17 = vadd.f32 %v675_v16, %v578_v23 }
 0x14c   :  { %743 = vst [vmem:[#allocation3 + $0x60] sm:$0xff] %v727_v41 }
 0x14d   :  { %731 = vst [vmem:[#allocation3 + $0x30] sm:$0xff] %v715_v17  ;;  %v522_v19 = vpop.xlane.xlu2 %521 }
 0x14e   :  { %735 = vst [vmem:[#allocation3 + $0x50] sm:$0xff] %v719_v28  ;;  %v549_v20 = vadd.f32 %v522_v19, %v501_v18  ;;  %v585_v28 = vld [vmem:[#allocation3 + $0x48] sm:$0xff]  ;;  %v512_v19 = vld [vmem:[#allocation2 + $0x78] sm:$0xff] }
 0x14f   :  { %v530_v51 = vpop.xlane.xlu0 %529 }
 0x150   :  { %v553_v25 = vadd.f32 %v530_v51, %v505_v44  ;;  %566 = vst.msk [vmem:[#allocation2 + $0x20] sm:$0xff] %vm99_vm0, %v549_v20  ;;  %v707_v24 = vpop.f32.mrf.mxu3 }
 0x151   :  { %v728_v29 = vadd.f32 %v707_v24, %v591_v21  ;;  %v687_v30 = vpop.f32.mrf.mxu1 }
 0x152   :  { %570 = vst.msk [vmem:[#allocation2 + $0x40] sm:$0xff] %vm99_vm0, %v553_v25  ;;  %v677_v31 = vpop.f32.mrf.mxu0  ;;  %v720_v32 = vadd.f32 %v687_v30, %v583_v22 }
 0x153   :  { %744 = vst [vmem:[#allocation3 + $0x70] sm:$0xff] %v728_v29  ;;  %v716_v33 = vadd.f32 %v677_v31, %v579_v26 }
 0x154   :  { %736 = vst [vmem:[#allocation3 + $0x68] sm:$0xff] %v720_v32 }
 0x155   :  { %732 = vst [vmem:[#allocation3] sm:$0xff] %v716_v33 }
 0x157   :  { %v536_v36 = vpop.xlane.xlu0 %535 }
 0x158   :  { %v556_v37 = vadd.f32 %v536_v36, %v508_v34 }
 0x15a   :  { %573 = vst.msk [vmem:[#allocation2 + $0x58] sm:$0xff] %vm99_vm0, %v556_v37 }
 0x15e   :  { %v518_v35 = vpop.xlane.xlu1 %517 }
 0x15f   :  { %v547_v39 = vadd.f32 %v518_v35, %v499_v38  ;;  %v542_v42 = vpop.xlane.xlu0 %541 }
 0x160   :  { %v559_v9 = vadd.f32 %v542_v42, %v511_v1 }
 0x161   :  { %564 = vst.msk [vmem:[#allocation2 + $0x10] sm:$0xff] %vm99_vm0, %v547_v39 }
 0x162   :  { %576 = vst.msk [vmem:[#allocation2 + $0x70] sm:$0xff] %vm99_vm0, %v559_v9 }
 0x166   :  { %v528_v47 = vpop.xlane.xlu2 %527 }
 0x167   :  { %v526_v27 = vpop.xlane.xlu1 %525  ;;  %v552_v48 = vadd.f32 %v528_v47, %v504_v43 }
 0x168   :  { %v551_v54 = vadd.f32 %v526_v27, %v503_v45  ;;  %v700_v59 = vpop.f32.mrf.mxu2 }
 0x169   :  { %569 = vst.msk [vmem:[#allocation2 + $0x38] sm:$0xff] %vm99_vm0, %v552_v48  ;;  %v725_v56 = vadd.f32 %v700_v59, %v588_v57  ;;  %v680_v58 = vpop.f32.mrf.mxu0 }
 0x16a   :  { %568 = vst.msk [vmem:[#allocation2 + $0x30] sm:$0xff] %vm99_vm0, %v551_v54  ;;  %v717_v60 = vadd.f32 %v680_v58, %v580_v52 }
 0x16b   :  { %741 = vst [vmem:[#allocation3 + $0x10] sm:$0xff] %v725_v56 }
 0x16c   :  { %733 = vst [vmem:[#allocation3 + $0x58] sm:$0xff] %v717_v60 }
 0x16e   :  { %v534_v63 = vpop.xlane.xlu2 %533 }
 0x16f   :  { %v532_v40 = vpop.xlane.xlu1 %531  ;;  %v555_v55 = vadd.f32 %v534_v63, %v507_v61 }
 0x170   :  { %v554_v50 = vadd.f32 %v532_v40, %v506_v62  ;;  %v702_v4 = vpop.f32.mrf.mxu2  ;;  %v710_v49 = vpop.f32.mrf.mxu3 }
 0x171   :  { %572 = vst.msk [vmem:[#allocation2 + $0x50] sm:$0xff] %vm99_vm0, %v555_v55  ;;  %v726_v3 = vadd.f32 %v702_v4, %v589_v46  ;;  %v729_v6 = vadd.f32 %v710_v49, %v592_v0  ;;  %v682_v5 = vpop.f32.mrf.mxu0 }
 0x172   :  { %571 = vst.msk [vmem:[#allocation2 + $0x48] sm:$0xff] %vm99_vm0, %v554_v50  ;;  %v718_v7 = vadd.f32 %v682_v5, %v581_v2  ;;  %v690_v53 = vpop.f32.mrf.mxu1 }
 0x173   :  { %742 = vst [vmem:[#allocation3 + $0x38] sm:$0xff] %v726_v3  ;;  %v721_v10 = vadd.f32 %v690_v53, %v584_v8 }
 0x174   :  { %745 = vst [vmem:[#allocation3 + $0x78] sm:$0xff] %v729_v6 }
 0x175   :  { %734 = vst [vmem:[#allocation3 + $0x18] sm:$0xff] %v718_v7 }
 0x176   :  { %737 = vst [vmem:[#allocation3 + $0x8] sm:$0xff] %v721_v10  ;;  %v540_v13 = vpop.xlane.xlu2 %539 }
 0x177   :  { %v538_v23 = vpop.xlane.xlu1 %537  ;;  %v558_v41 = vadd.f32 %v540_v13, %v510_v11 }
 0x178   :  { %v557_v15 = vadd.f32 %v538_v23, %v509_v12  ;;  %v712_v16 = vpop.f32.mrf.mxu3 }
 0x179   :  { %575 = vst.msk [vmem:[#allocation2 + $0x68] sm:$0xff] %vm99_vm0, %v558_v41  ;;  %v730_v17 = vadd.f32 %v712_v16, %v593_v14 }
 0x17a   :  { %574 = vst.msk [vmem:[#allocation2 + $0x60] sm:$0xff] %vm99_vm0, %v557_v15  ;;  %v692_v18 = vpop.f32.mrf.mxu1 }
 0x17b   :  { %746 = vst [vmem:[#allocation3 + $0x28] sm:$0xff] %v730_v17  ;;  %v722_v44 = vadd.f32 %v692_v18, %v585_v28 }
 0x17d   :  { %738 = vst [vmem:[#allocation3 + $0x48] sm:$0xff] %v722_v44 }
 0x17f   :  { %v544_v20 = vpop.xlane.xlu1 %543 }
 0x180   :  { %v560_v21 = vadd.f32 %v544_v20, %v512_v19 }
 0x182   :  { %577 = vst.msk [vmem:[#allocation2 + $0x78] sm:$0xff] %vm99_vm0, %v560_v21 }
 0x183 PF:  { %v754_v51 = vld [vmem:[#allocation2 + $0x20] sm:$0xff]  ;;  %v752_v22 = vld [vmem:[#allocation2 + $0x10] sm:$0xff]  ;;  %v1602_v24 = vmov 0   ;;  %v755_v31 = vld [vmem:[#allocation2 + $0x28] sm:$0xff]  ;;  %v1138_v14 = vlaneseq }
 0x184   :  { %v750_v25 = vld [vmem:[#allocation2] sm:$0xff]  ;;  %1502 = vset.pattern.permute.xlu2 %v1602_v24  ;;  %1501 = vset.pattern.permute.xlu1 %v1602_v24  ;;  %v770_v26 = vmax.f32 %v754_v51, 1e-20  ;;  %v768_v29 = vmax.f32 %v752_v22, 1e-20  ;;  %v753_v32 = vld [vmem:[#allocation2 + $0x18] sm:$0xff] }
 0x185   :  { %v766_v30 = vmax.f32 %v750_v25, 1e-20  ;;  %1500 = vset.pattern.permute.xlu0 %v1602_v24  ;;  %v751_v33 = vld [vmem:[#allocation2 + $0x8] sm:$0xff]  ;;  %v771_v34 = vmax.f32 %v755_v31, 1e-20  ;;  %v758_v38 = vld [vmem:[#allocation2 + $0x40] sm:$0xff] }
 0x186   :  { %820 = vperm.xlu2 %1502, %v770_v26   ;;  %810 = vperm.xlu1 %1501, %v768_v29   ;;  %v769_v36 = vmax.f32 %v753_v32, 1e-20  ;;  %v767_v37 = vmax.f32 %v751_v33, 1e-20  ;;  %v757_v1 = vld [vmem:[#allocation2 + $0x38] sm:$0xff]  ;;  %v756_v35 = vld [vmem:[#allocation2 + $0x30] sm:$0xff] }
 0x187   :  { %800 = vperm.xlu0 %1500, %v766_v30   ;;  %v774_v39 = vmax.f32 %v758_v38, 1e-20  ;;  %v773_v42 = vmax.f32 %v757_v1, 1e-20  ;;  %v772_v9 = vmax.f32 %v756_v35, 1e-20 }
 0x188   :  { %v761_v43 = vld [vmem:[#allocation2 + $0x58] sm:$0xff]  ;;  %v760_v45 = vld [vmem:[#allocation2 + $0x50] sm:$0xff]  ;;  %v759_v47 = vld [vmem:[#allocation2 + $0x48] sm:$0xff]  ;;  %v1985_v21 = vand.u32 127, %v1138_v14 }
 0x189   :  { %v777_v57 = vmax.f32 %v761_v43, 1e-20  ;;  %v776_v27 = vmax.f32 %v760_v45, 1e-20  ;;  %v775_v48 = vmax.f32 %v759_v47, 1e-20 }
 0x18a   :  { %v764_v52 = vld [vmem:[#allocation2 + $0x70] sm:$0xff]  ;;  %v763_v54 = vld [vmem:[#allocation2 + $0x68] sm:$0xff]  ;;  %v762_v59 = vld [vmem:[#allocation2 + $0x60] sm:$0xff]  ;;  %vm1140_vm2 = vcmp.lt.s32.totalorder %v1985_v21, 4 }
 0x18b   :  { %v780_v56 = vmax.f32 %v764_v52, 1e-20  ;;  %v779_v58 = vmax.f32 %v763_v54, 1e-20  ;;  %v778_v60 = vmax.f32 %v762_v59, 1e-20 }
 0x18c   :  { %v765_v61 = vld [vmem:[#allocation2 + $0x78] sm:$0xff]  ;;  %v786_v10 = vld [vmem:[#allocation3 + $0x50] sm:$0xff]  ;;  %v1978_v18 = vld [vmem:[%s2573_s7] ss:$0 sm:$0xff] }
 0x18d   :  { %v781_v62 = vmax.f32 %v765_v61, 1e-20  ;;  %v787_v35 = vld [vmem:[#allocation3 + $0x68] sm:$0xff]  ;;  %v784_v14 = vld [vmem:[#allocation3 + $0x58] sm:$0xff] }
 0x18e   :  { %825 = vperm.xlu2 %1502, %v771_v34   ;;  %815 = vperm.xlu1 %1501, %v769_v36  }
 0x18f   :  { %805 = vperm.xlu0 %1500, %v767_v37  }
 0x196   :  { %840 = vperm.xlu2 %1502, %v774_v39   ;;  %835 = vperm.xlu1 %1501, %v773_v42  }
 0x197   :  { %830 = vperm.xlu0 %1500, %v772_v9  }
 0x19e   :  { %855 = vperm.xlu2 %1502, %v777_v57   ;;  %850 = vperm.xlu1 %1501, %v776_v27  }
 0x19f   :  { %845 = vperm.xlu0 %1500, %v775_v48  }
 0x1a6   :  { %870 = vperm.xlu2 %1502, %v780_v56   ;;  %865 = vperm.xlu1 %1501, %v779_v58  }
 0x1a7   :  { %860 = vperm.xlu0 %1500, %v778_v60  }
 0x1af   :  { %875 = vperm.xlu0 %1500, %v781_v62  }
 0x1e0   :  { %v821_v63 = vpop.permute.xlu2 %820 }
 0x1e1   :  { %1504 = vrcp.f32 %v821_v63  ;;  %vm943_vm0 = vweird.f32 %v821_v63  ;;  %v949_v50 = vand.u32 2147483648, %v821_v63  ;;  %v947_v49 = vand.u32 2147483647, %v821_v63 }
 0x1e3   :  { %v950_v5 = vor.u32 1.1754944e-38, %v949_v50  ;;  %vm948_vm12 = vcmp.eq.f32.partialorder %v947_v49, 8.507059e+37 }
 0x1e7   :  { %v1505_v46 = vpop.eup %1504 }
 0x1e8   :  { %v939_v0 = vmul.f32 %v1505_v46, %v821_v63  ;;  %v826_v40 = vpop.permute.xlu2 %825  ;;  %vm944_vm5 = vweird.f32 %v1505_v46 }
 0x1e9   :  { %1506 = vrcp.f32 %v826_v40  ;;  %vm945_vm6 = vmor %vm943_vm0, %vm944_vm5  ;;  %vm958_vm13 = vweird.f32 %v826_v40  ;;  %v964_v16 = vand.u32 2147483648, %v826_v40  ;;  %v962_v19 = vand.u32 2147483647, %v826_v40 }
 0x1ea   :  { %v940_v55 = vsub.f32 1.0, %v939_v0 }
 0x1eb   :  { %v965_v25 = vor.u32 1.1754944e-38, %v964_v16  ;;  %vm963_vm1 = vcmp.eq.f32.partialorder %v962_v19, 8.507059e+37 }
 0x1ec   :  { %v941_v2 = vmul.f32 %v1505_v46, %v940_v55 }
 0x1ee   :  { %v942_v4 = vadd.f32 %v1505_v46, %v941_v2 }
 0x1ef   :  { %v1507_v8 = vpop.eup %1506 }
 0x1f0   :  { %v954_v3 = vmul.f32 %v1507_v8, %v826_v40  ;;  %v1960_v6 = vpop.permute.xlu2 %840  ;;  %v946_v53 = vsel %vm945_vm6, %v1505_v46, %v942_v4  ;;  %vm959_vm14 = vweird.f32 %v1507_v8 }
 0x1f1   :  { %1508 = vrcp.f32 %v1960_v6  ;;  %v951_v11 = vsel %vm948_vm12, %v950_v5, %v946_v53  ;;  %vm1980_vm15 = vmor %vm958_vm13, %vm959_vm14  ;;  %v1009_v51 = vand.u32 2147483648, %v1960_v6  ;;  %v1007_v29 = vand.u32 2147483647, %v1960_v6 }
 0x1f2   :  { %v955_v7 = vsub.f32 1.0, %v954_v3  ;;  %v952_v15 = vmul.f32 %v951_v11, %v786_v10  ;;  %vm1003_vm3 = vweird.f32 %v1960_v6 }
 0x1f3   :  { %v2000_v32 = vor.u32 1.1754944e-38, %v1009_v51  ;;  %vm2025_vm7 = vcmp.eq.f32.partialorder %v1007_v29, 8.507059e+37  ;;  %v782_v51 = vld [vmem:[#allocation3 + $0x30] sm:$0xff] }
 0x1f4   :  { %v956_v12 = vmul.f32 %v1507_v8, %v955_v7  ;;  %v1989_v22 = vadd.f32 %v1978_v18, %v952_v15 }
 0x1f6   :  { %v957_v44 = vadd.f32 %v1507_v8, %v956_v12  ;;  %v2007_v34 = vsel %vm1140_vm2, %v1989_v22, -1e+30 }
 0x1f7   :  { %v1963_v13 = vpop.eup %1508 }
 0x1f8   :  { %v1965_v23 = vpop.permute.xlu2 %855  ;;  %v1967_v41 = vpop.permute.xlu1 %810  ;;  %v999_v17 = vmul.f32 %v1963_v13, %v1960_v6  ;;  %v961_v26 = vsel %vm1980_vm15, %v1507_v8, %v957_v44  ;;  %vm1004_vm4 = vweird.f32 %v1963_v13 }
 0x1f9   :  { %1510 = vrcp.f32 %v1965_v23  ;;  %v1970_v28 = vpop.permute.xlu0 %800  ;;  %v1054_v37 = vand.u32 2147483648, %v1965_v23  ;;  %v966_v39 = vsel %vm963_vm1, %v965_v25, %v961_v26  ;;  %v919_v43 = vand.u32 2147483648, %v1967_v41  ;;  %vm2045_vm11 = vmor %vm1003_vm3, %vm1004_vm4 }
 0x1fa   :  { %1512 = vrcp.f32 %v1967_v41  ;;  %v1000_v24 = vsub.f32 1.0, %v999_v17  ;;  %v889_v48 = vand.u32 2147483648, %v1970_v28  ;;  %v917_v52 = vand.u32 2147483647, %v1967_v41 }
 0x1fb   :  { %1514 = vrcp.f32 %v1970_v28  ;;  %v887_v59 = vand.u32 2147483647, %v1970_v28  ;;  %v967_v56 = vmul.f32 %v966_v39, %v787_v35  ;;  %vm913_vm8 = vweird.f32 %v1967_v41 }
 0x1fc   :  { %v1001_v42 = vmul.f32 %v1963_v13, %v1000_v24  ;;  %vm883_vm10 = vweird.f32 %v1970_v28  ;;  %v920_v46 = vor.u32 1.1754944e-38, %v919_v43  ;;  %v890_v0 = vor.u32 1.1754944e-38, %v889_v48 }
 0x1fd   :  { %vm2058_vm5 = vcmp.eq.f32.partialorder %v917_v52, 8.507059e+37  ;;  %vm2062_vm6 = vcmp.eq.f32.partialorder %v887_v59, 8.507059e+37  ;;  %v2067_v3 = vadd.f32 %v1978_v18, %v967_v56 }
 0x1fe   :  { %v1002_v62 = vadd.f32 %v1963_v13, %v1001_v42 }
 0x1ff   :  { %v1994_v30 = vpop.eup %1510 }
 0x200   :  { %v1997_v31 = vpop.eup %1512  ;;  %v2002_v33 = vpop.permute.xlu1 %815  ;;  %v1044_v9 = vmul.f32 %v1994_v30, %v1965_v23 }
 0x201   :  { %v2009_v36 = vpop.eup %1514  ;;  %v909_v38 = vmul.f32 %v1997_v31, %v1967_v41  ;;  %v2015_v1 = vpop.permute.xlu0 %805  ;;  %1516 = vrcp.f32 %v2002_v33  ;;  %vm914_vm9 = vweird.f32 %v1997_v31  ;;  %v934_v40 = vand.u32 2147483648, %v2002_v33 }
 0x202   :  { %v879_v45 = vmul.f32 %v2009_v36, %v1970_v28  ;;  %v2023_v47 = vpop.permute.xlu2 %870  ;;  %1518 = vrcp.f32 %v2015_v1  ;;  %v1045_v60 = vsub.f32 1.0, %v1044_v9  ;;  %vm2051_vm0 = vmor %vm913_vm8, %vm914_vm9  ;;  %v904_v50 = vand.u32 2147483648, %v2015_v1 }
 0x203   :  { %v910_v27 = vsub.f32 1.0, %v909_v38  ;;  %1520 = vrcp.f32 %v2023_v47  ;;  %vm884_vm12 = vweird.f32 %v2009_v36  ;;  %v1006_v41 = vsel %vm2045_vm11, %v1963_v13, %v1002_v62 }
 0x204   :  { %v880_v54 = vsub.f32 1.0, %v879_v45  ;;  %v1046_v11 = vmul.f32 %v1994_v30, %v1045_v60  ;;  %vm928_vm13 = vweird.f32 %v2002_v33  ;;  %v2091_v16 = vor.u32 1.1754944e-38, %v934_v40  ;;  %vm885_vm14 = vmor %vm883_vm10, %vm884_vm12 }
 0x205   :  { %v911_v58 = vmul.f32 %v1997_v31, %v910_v27  ;;  %v902_v44 = vand.u32 2147483647, %v2015_v1  ;;  %vm898_vm15 = vweird.f32 %v2015_v1  ;;  %v905_v13 = vor.u32 1.1754944e-38, %v904_v50  ;;  %v783_v50 = vld [vmem:[#allocation3] sm:$0xff] }
 0x206   :  { %v881_v61 = vmul.f32 %v2009_v36, %v880_v54  ;;  %v932_v25 = vand.u32 2147483647, %v2002_v33  ;;  %v2118_v39 = vadd.f32 %v1994_v30, %v1046_v11 }
 0x207   :  { %v912_v55 = vadd.f32 %v1997_v31, %v911_v58  ;;  %v2069_v6 = vpop.eup %1516  ;;  %vm2126_vm1 = vcmp.eq.f32.partialorder %v902_v44, 8.507059e+37 }
 0x208   :  { %v2056_v4 = vpop.permute.xlu1 %835  ;;  %v882_v53 = vadd.f32 %v2009_v36, %v881_v61  ;;  %v2079_v10 = vpop.eup %1518  ;;  %v924_v12 = vmul.f32 %v2069_v6, %v2002_v33  ;;  %vm929_vm3 = vweird.f32 %v2069_v6 }
 0x209   :  { %1522 = vrcp.f32 %v2056_v4  ;;  %v2073_v5 = vpop.permute.xlu0 %830  ;;  %v916_v7 = vsel %vm2051_vm0, %v1997_v31, %v912_v55  ;;  %v2088_v15 = vpop.eup %1520  ;;  %v894_v17 = vmul.f32 %v2079_v10, %v2015_v1  ;;  %v2108_v31 = vsel %vm2025_vm7, %v2000_v32, %v1006_v41  ;;  %vm2162_vm8 = vmor %vm928_vm13, %vm929_vm3 }
 0x20a   :  { %1524 = vrcp.f32 %v2073_v5  ;;  %v925_v19 = vsub.f32 1.0, %v924_v12  ;;  %v921_v20 = vsel %vm2058_vm5, %v920_v46, %v916_v7  ;;  %v886_v29 = vsel %vm885_vm14, %v2009_v36, %v882_v53 }
 0x20b   :  { %v895_v24 = vsub.f32 1.0, %v894_v17  ;;  %v922_v26 = vmul.f32 %v921_v20, %v784_v14  ;;  %v2112_v28 = vmul.f32 %v2088_v15, %v2023_v47  ;;  %v891_v35 = vsel %vm2062_vm6, %v890_v0, %v886_v29 }
 0x20c   :  { %v926_v38 = vmul.f32 %v2069_v6, %v925_v19  ;;  %v994_v36 = vand.u32 2147483648, %v2056_v4  ;;  %v892_v32 = vmul.f32 %v891_v35, %v782_v51  ;;  %v979_v48 = vand.u32 2147483648, %v2073_v5  ;;  %v789_v35 = vld [vmem:[#allocation3 + $0x48] sm:$0xff] }
 0x20d   :  { %v2124_v9 = vadd.f32 %v1978_v18, %v922_v26  ;;  %v896_v57 = vmul.f32 %v2079_v10, %v895_v24  ;;  %vm899_vm4 = vweird.f32 %v2079_v10  ;;  %vm988_vm7 = vweird.f32 %v2056_v4 }
 0x20e   :  { %v2145_v56 = vadd.f32 %v1978_v18, %v892_v32  ;;  %v927_v60 = vadd.f32 %v2069_v6, %v926_v38  ;;  %v992_v46 = vand.u32 2147483647, %v2056_v4  ;;  %v995_v55 = vor.u32 1.1754944e-38, %v994_v36  ;;  %vm900_vm10 = vmor %vm898_vm15, %vm899_vm4 }
 0x20f   :  { %v2120_v42 = vpop.eup %1522  ;;  %v1143_v59 = vsel %vm1140_vm2, %v2124_v9, -1e+30  ;;  %vm973_vm9 = vweird.f32 %v2073_v5  ;;  %v897_v2 = vadd.f32 %v2079_v10, %v896_v57  ;;  %v980_v33 = vor.u32 1.1754944e-38, %v979_v48 }
 0x210   :  { %v2130_v45 = vpop.eup %1524  ;;  %v984_v27 = vmul.f32 %v2120_v42, %v2056_v4  ;;  %v2137_v52 = vpop.permute.xlu1 %850  ;;  %1161 = vmax.xlane.f32.xlu0 %v1143_v59  ;;  %v1141_v63 = vsel %vm1140_vm2, %v2145_v56, -1e+30  ;;  %vm989_vm11 = vweird.f32 %v2120_v42  ;;  %v931_v49 = vsel %vm2162_vm8, %v2069_v6, %v927_v60 }
 0x211   :  { %v969_v54 = vmul.f32 %v2130_v45, %v2073_v5  ;;  %v2147_v58 = vpop.permute.xlu0 %845  ;;  %1526 = vrcp.f32 %v2137_v52  ;;  %1157 = vmax.xlane.f32.xlu1 %v1141_v63  ;;  %vm2177_vm0 = vcmp.eq.f32.partialorder %v932_v25, 8.507059e+37  ;;  %v1039_v53 = vand.u32 2147483648, %v2137_v52  ;;  %vm2197_vm12 = vmor %vm988_vm7, %vm989_vm11 }
 0x212   :  { %v985_v61 = vsub.f32 1.0, %v984_v27  ;;  %1528 = vrcp.f32 %v2147_v58  ;;  %v901_v11 = vsel %vm900_vm10, %v2079_v10, %v897_v2  ;;  %vm974_vm5 = vweird.f32 %v2130_v45 }
 0x213   :  { %v970_v62 = vsub.f32 1.0, %v969_v54  ;;  %v906_v12 = vsel %vm2126_vm1, %v905_v13, %v901_v11  ;;  %vm2188_vm6 = vcmp.eq.f32.partialorder %v992_v46, 8.507059e+37  ;;  %v977_v6 = vand.u32 2147483647, %v2073_v5  ;;  %v785_v13 = vld [vmem:[#allocation3 + $0x18] sm:$0xff]  ;;  %vm2241_vm1 = vmor %vm973_vm9, %vm974_vm5 }
 0x214   :  { %v986_v40 = vmul.f32 %v2120_v42, %v985_v61  ;;  %vm1033_vm13 = vweird.f32 %v2137_v52  ;;  %v1024_v10 = vand.u32 2147483648, %v2147_v58  ;;  %v907_v44 = vmul.f32 %v906_v12, %v783_v50  ;;  %v788_v61 = vld [vmem:[#allocation3 + $0x8] sm:$0xff] }
 0x215   :  { %v971_v7 = vmul.f32 %v2130_v45, %v970_v62  ;;  %v936_v20 = vsel %vm2177_vm0, %v2091_v16, %v931_v49  ;;  %v1037_v26 = vand.u32 2147483647, %v2137_v52  ;;  %v1040_v29 = vor.u32 1.1754944e-38, %v1039_v53  ;;  %v790_v62 = vld [vmem:[#allocation3 + $0x40] sm:$0xff] }
 0x216   :  { %v987_v1 = vadd.f32 %v2120_v42, %v986_v40  ;;  %v2222_v16 = vadd.f32 %v1978_v18, %v907_v44  ;;  %vm1018_vm14 = vweird.f32 %v2147_v58  ;;  %v937_v43 = vmul.f32 %v936_v20, %v785_v13  ;;  %v797_v20 = vld [vmem:[#allocation3 + $0x28] sm:$0xff] }
 0x217   :  { %v2193_v41 = vpop.eup %1526  ;;  %v972_v36 = vadd.f32 %v2130_v45, %v971_v7  ;;  %vm2227_vm15 = vcmp.eq.f32.partialorder %v977_v6, 8.507059e+37  ;;  %v1025_v27 = vor.u32 1.1754944e-38, %v1024_v10  ;;  %vm2247_vm4 = vcmp.eq.f32.partialorder %v1037_v26, 8.507059e+37 }
 0x218   :  { %v2203_v19 = vpop.permute.xlu1 %865  ;;  %v2208_v51 = vpop.eup %1528  ;;  %v1029_v4 = vmul.f32 %v2193_v41, %v2137_v52  ;;  %v991_v24 = vsel %vm2197_vm12, %v2120_v42, %v987_v1  ;;  %v1142_v48 = vsel %vm1140_vm2, %v2222_v16, -1e+30  ;;  %vm1034_vm3 = vweird.f32 %v2193_v41  ;;  %v792_v52 = vld [vmem:[#allocation3 + $0x10] sm:$0xff] }
 0x219   :  { %1530 = vrcp.f32 %v2203_v19  ;;  %v2213_v25 = vpop.permute.xlu0 %860  ;;  %v1014_v38 = vmul.f32 %v2208_v51, %v2147_v58  ;;  %1165 = vmax.xlane.f32.xlu1 %v2007_v34  ;;  %v996_v54 = vsel %vm2188_vm6, %v995_v55, %v991_v24  ;;  %1159 = vmax.xlane.f32.xlu2 %v1142_v48  ;;  %vm1078_vm7 = vweird.f32 %v2203_v19  ;;  %vm2272_vm10 = vmor %vm1033_vm13, %vm1034_vm3 }
 0x21a   :  { %v1030_v32 = vsub.f32 1.0, %v1029_v4  ;;  %1532 = vrcp.f32 %v2213_v25  ;;  %v997_v34 = vmul.f32 %v996_v54, %v789_v35  ;;  %v976_v5 = vsel %vm2241_vm1, %v2130_v45, %v972_v36  ;;  %v791_v35 = vld [vmem:[#allocation3 + $0x20] sm:$0xff] }
 0x21b   :  { %v1015_v57 = vsub.f32 1.0, %v1014_v38  ;;  %v1022_v46 = vand.u32 2147483647, %v2147_v58  ;;  %vm1048_vm8 = vweird.f32 %v1965_v23  ;;  %vm1049_vm9 = vweird.f32 %v1994_v30 }
 0x21c   :  { %v1031_v60 = vmul.f32 %v2193_v41, %v1030_v32  ;;  %v2260_v40 = vadd.f32 %v1978_v18, %v997_v34  ;;  %v2263_v55 = vadd.f32 %v1978_v18, %v937_v43  ;;  %v981_v2 = vsel %vm2227_vm15, %v980_v33, %v976_v5 }
 0x21d   :  { %v1016_v63 = vmul.f32 %v2208_v51, %v1015_v57  ;;  %vm1019_vm11 = vweird.f32 %v2208_v51  ;;  %v1084_v8 = vand.u32 2147483648, %v2203_v19  ;;  %v982_v7 = vmul.f32 %v981_v2, %v788_v61 }
 0x21e   :  { %v1032_v50 = vadd.f32 %v2193_v41, %v1031_v60  ;;  %v1069_v33 = vand.u32 2147483648, %v2213_v25  ;;  %v1148_v11 = vsel %vm1140_vm2, %v2260_v40, -1e+30  ;;  %v1082_v44 = vand.u32 2147483647, %v2203_v19  ;;  %vm2304_vm5 = vmor %vm1018_vm14, %vm1019_vm11 }
 0x21f   :  { %v1531_v0 = vpop.eup %1530  ;;  %v1017_v14 = vadd.f32 %v2208_v51, %v1016_v63  ;;  %v2291_v10 = vadd.f32 %v1978_v18, %v982_v7  ;;  %v1144_v13 = vsel %vm1140_vm2, %v2263_v55, -1e+30  ;;  %vm1023_vm12 = vcmp.eq.f32.partialorder %v1022_v46, 8.507059e+37  ;;  %v794_v63 = vld [vmem:[#allocation3 + $0x60] sm:$0xff] }
 0x220   :  { %v1074_v49 = vmul.f32 %v1531_v0, %v2203_v19  ;;  %v1533_v53 = vpop.eup %1532  ;;  %v1036_v12 = vsel %vm2272_vm10, %v2193_v41, %v1032_v50  ;;  %vm1079_vm0 = vweird.f32 %v1531_v0  ;;  %v1090_v57 = vsub.f32 1.0, %v2112_v28 }
 0x221   :  { %v2283_v1 = vpop.permute.xlu0 %875  ;;  %v1059_v17 = vmul.f32 %v1533_v53, %v2213_v25  ;;  %v1041_v41 = vsel %vm2247_vm4, %v1040_v29, %v1036_v12  ;;  %1171 = vmax.xlane.f32.xlu1 %v1148_v11  ;;  %v1147_v26 = vsel %vm1140_vm2, %v2291_v10, -1e+30  ;;  %vm1064_vm6 = vweird.f32 %v1533_v53  ;;  %1163 = vmax.xlane.f32.xlu2 %v1144_v13  ;;  %vm1080_vm13 = vmor %vm1078_vm7, %vm1079_vm0  ;;  %v793_v13 = vld [vmem:[#allocation3 + $0x38] sm:$0xff] }
 0x222   :  { %v1075_v6 = vsub.f32 1.0, %v1074_v49  ;;  %1534 = vrcp.f32 %v2283_v1  ;;  %v1042_v38 = vmul.f32 %v1041_v41, %v792_v52  ;;  %1169 = vmax.xlane.f32.xlu0 %v1147_v26  ;;  %v1021_v58 = vsel %vm2304_vm5, %v2208_v51, %v1017_v14  ;;  %v795_v51 = vld [vmem:[#allocation3 + $0x70] sm:$0xff]  ;;  %vm2338_vm4 = vmor %vm1048_vm8, %vm1049_vm9 }
 0x223   :  { %v1060_v24 = vsub.f32 1.0, %v1059_v17  ;;  %v1067_v29 = vand.u32 2147483647, %v2213_v25  ;;  %v1026_v43 = vsel %vm1023_vm12, %v1025_v27, %v1021_v58  ;;  %v1085_v48 = vor.u32 1.1754944e-38, %v1084_v8 }
 0x224   :  { %v1076_v4 = vmul.f32 %v1531_v0, %v1075_v6  ;;  %v2316_v32 = vadd.f32 %v1978_v18, %v1042_v38  ;;  %vm1063_vm14 = vweird.f32 %v2213_v25  ;;  %v1027_v54 = vmul.f32 %v1026_v43, %v791_v35 }
 0x225   :  { %v1061_v36 = vmul.f32 %v1533_v53, %v1060_v24  ;;  %v1070_v59 = vor.u32 1.1754944e-38, %v1069_v33  ;;  %vm1083_vm15 = vcmp.eq.f32.partialorder %v1082_v44, 8.507059e+37  ;;  %vm2324_vm1 = vmor %vm1063_vm14, %vm1064_vm6  ;;  %vm1068_vm3 = vcmp.eq.f32.partialorder %v1067_v29, 8.507059e+37 }
 0x226   :  { %v1077_v42 = vadd.f32 %v1531_v0, %v1076_v4  ;;  %v1151_v28 = vsel %vm1140_vm2, %v2316_v32, -1e+30  ;;  %v2332_v19 = vadd.f32 %v1978_v18, %v1027_v54  ;;  %v1052_v50 = vand.u32 2147483647, %v1965_v23  ;;  %v796_v54 = vld [vmem:[#allocation3 + $0x78] sm:$0xff] }
 0x227   :  { %v1062_v34 = vadd.f32 %v1533_v53, %v1061_v36  ;;  %v1055_v45 = vor.u32 1.1754944e-38, %v1054_v37  ;;  %v1146_v49 = vsel %vm1140_vm2, %v2067_v3, -1e+30  ;;  %v1091_v33 = vmul.f32 %v2088_v15, %v1090_v57 }
 0x228   :  { %v1081_v60 = vsel %vm1080_vm13, %v1531_v0, %v1077_v42  ;;  %v1535_v61 = vpop.eup %1534  ;;  %v1150_v8 = vsel %vm1140_vm2, %v2332_v19, -1e+30  ;;  %v1114_v12 = vand.u32 2147483648, %v2283_v1  ;;  %v1051_v37 = vsel %vm2338_vm4, %v1994_v30, %v2118_v39 }
 0x229   :  { %v1086_v25 = vsel %vm1083_vm15, %v1085_v48, %v1081_v60  ;;  %v1104_v46 = vmul.f32 %v1535_v61, %v2283_v1  ;;  %v1066_v2 = vsel %vm2324_vm1, %v1533_v53, %v1062_v34  ;;  %1177 = vmax.xlane.f32.xlu1 %v1151_v28  ;;  %v1012_v53 = vmul.f32 %v2108_v31, %v790_v62 }
 0x22a   :  { %v1087_v0 = vmul.f32 %v1086_v25, %v795_v51  ;;  %v1071_v7 = vsel %vm1068_vm3, %v1070_v59, %v1066_v2  ;;  %1167 = vmax.xlane.f32.xlu2 %v1146_v49  ;;  %1175 = vmax.xlane.f32.xlu0 %v1150_v8  ;;  %v1112_v14 = vand.u32 2147483647, %v2283_v1  ;;  %vm1109_vm7 = vweird.f32 %v1535_v61 }
 0x22b   :  { %v1105_v11 = vsub.f32 1.0, %v1104_v46  ;;  %v1072_v52 = vmul.f32 %v1071_v7, %v794_v63  ;;  %vm1053_vm8 = vcmp.eq.f32.partialorder %v1052_v50, 8.507059e+37  ;;  %vm1093_vm9 = vweird.f32 %v2023_v47 }
 0x22c   :  { %v2358_v23 = vadd.f32 %v1978_v18, %v1087_v0  ;;  %vm1108_vm10 = vweird.f32 %v2283_v1  ;;  %v2371_v31 = vadd.f32 %v1978_v18, %v1012_v53  ;;  %vm1094_vm11 = vweird.f32 %v2088_v15 }
 0x22d   :  { %v1106_v6 = vmul.f32 %v1535_v61, %v1105_v11  ;;  %v2366_v17 = vadd.f32 %v1978_v18, %v1072_v52  ;;  %vm1110_vm0 = vmor %vm1108_vm10, %vm1109_vm7  ;;  %v1115_v30 = vor.u32 1.1754944e-38, %v1114_v12  ;;  %v1056_v41 = vsel %vm1053_vm8, %v1055_v45, %v1051_v37 }
 0x22e   :  { %v1154_v39 = vsel %vm1140_vm2, %v2358_v23, -1e+30  ;;  %vm1113_vm5 = vcmp.eq.f32.partialorder %v1112_v14, 8.507059e+37  ;;  %v1092_v24 = vadd.f32 %v2088_v15, %v1091_v33  ;;  %v1099_v26 = vand.u32 2147483648, %v2023_v47  ;;  %vm1095_vm6 = vmor %vm1093_vm9, %vm1094_vm11 }
 0x22f   :  { %v1107_v44 = vadd.f32 %v1535_v61, %v1106_v6  ;;  %v1153_v4 = vsel %vm1140_vm2, %v2366_v17, -1e+30  ;;  %v1149_v35 = vsel %vm1140_vm2, %v2371_v31, -1e+30  ;;  %v1057_v58 = vmul.f32 %v1056_v41, %v793_v13 }
 0x230   :  { %v1097_v36 = vand.u32 2147483647, %v2023_v47  ;;  %v1096_v42 = vsel %vm1095_vm6, %v2088_v15, %v1092_v24  ;;  %v1100_v57 = vor.u32 1.1754944e-38, %v1099_v26 }
 0x231   :  { %v1111_v1 = vsel %vm1110_vm0, %v1535_v61, %v1107_v44  ;;  %1183 = vmax.xlane.f32.xlu1 %v1154_v39  ;;  %v2395_v48 = vadd.f32 %v1978_v18, %v1057_v58 }
 0x232   :  { %v1116_v38 = vsel %vm1113_vm5, %v1115_v30, %v1111_v1  ;;  %1173 = vmax.xlane.f32.xlu2 %v1149_v35  ;;  %1181 = vmax.xlane.f32.xlu0 %v1153_v4  ;;  %vm1098_vm12 = vcmp.eq.f32.partialorder %v1097_v36, 8.507059e+37 }
 0x233   :  { %v1117_v29 = vmul.f32 %v1116_v38, %v797_v20  ;;  %v1101_v51 = vsel %vm1098_vm12, %v1100_v57, %v1096_v42  ;;  %v1152_v47 = vsel %vm1140_vm2, %v2395_v48, -1e+30 }
 0x234   :  { %v1102_v60 = vmul.f32 %v1101_v51, %v796_v54 }
 0x235   :  { %v2391_v43 = vadd.f32 %v1978_v18, %v1117_v29 }
 0x236   :  { %v2404_v15 = vadd.f32 %v1978_v18, %v1102_v60 }
 0x237   :  { %v1156_v59 = vsel %vm1140_vm2, %v2391_v43, -1e+30 }
 0x238   :  { %v1155_v34 = vsel %vm1140_vm2, %v2404_v15, -1e+30 }
 0x23a   :  { %1179 = vmax.xlane.f32.xlu2 %v1152_v47  ;;  %1187 = vmax.xlane.f32.xlu0 %v1156_v59 }
 0x242   :  { %1185 = vmax.xlane.f32.xlu2 %v1155_v34 }
 0x283   :  { %v1162_v61 = vpop.xlane.xlu0 %1161 }
 0x284   :  { %v2410_v27 = vsub.f32 %v2124_v9, %v1162_v61  ;;  %v1158_v28 = vpop.xlane.xlu1 %1157 }
 0x285   :  { %v2413_v25 = vsub.f32 %v2145_v56, %v1158_v28 }
 0x286   :  { %v1209_v62 = vmul.f32 1.442695, %v2410_v27 }
 0x287   :  { %v1205_v63 = vmul.f32 1.442695, %v2413_v25 }
 0x288   :  { %1536 = vpow2.f32 %v1209_v62 }
 0x289   :  { %1538 = vpow2.f32 %v1205_v63 }
 0x28c   :  { %v1166_v18 = vpop.xlane.xlu1 %1165  ;;  %v1160_v46 = vpop.xlane.xlu2 %1159 }
 0x28d   :  { %v2418_v0 = vsub.f32 %v2222_v16, %v1160_v46  ;;  %v2423_v56 = vsub.f32 %v1989_v22, %v1166_v18 }
 0x28e   :  { %v1537_v5 = vpop.eup %1536 }
 0x28f   :  { %v1239_v9 = vsel %vm1140_vm2, %v1537_v5, 0.0  ;;  %v1539_v2 = vpop.eup %1538  ;;  %v1207_v50 = vmul.f32 1.442695, %v2418_v0  ;;  %v1213_v49 = vmul.f32 1.442695, %v2423_v56 }
 0x290   :  { %1257 = vadd.xlane.f32.xlu0 %v1239_v9  ;;  %v1237_v45 = vsel %vm1140_vm2, %v1539_v2, 0.0 }
 0x291   :  { %1253 = vadd.xlane.f32.xlu1 %v1237_v45  ;;  %1540 = vpow2.f32 %v1207_v50 }
 0x292   :  { %1542 = vpow2.f32 %v1213_v49 }
 0x294   :  { %v1172_v8 = vpop.xlane.xlu1 %1171  ;;  %v1164_v16 = vpop.xlane.xlu2 %1163 }
 0x295   :  { %v1170_v7 = vpop.xlane.xlu0 %1169  ;;  %v2430_v33 = vsub.f32 %v2263_v55, %v1164_v16  ;;  %v2433_v22 = vsub.f32 %v2260_v40, %v1172_v8 }
 0x296   :  { %v2437_v52 = vsub.f32 %v2291_v10, %v1170_v7 }
 0x297   :  { %v1541_v11 = vpop.eup %1540  ;;  %v1211_v53 = vmul.f32 1.442695, %v2430_v33  ;;  %v1219_v37 = vmul.f32 1.442695, %v2433_v22 }
 0x298   :  { %v1238_v12 = vsel %vm1140_vm2, %v1541_v11, 0.0  ;;  %v1217_v55 = vmul.f32 1.442695, %v2437_v52  ;;  %v1543_v30 = vpop.eup %1542 }
 0x299   :  { %1544 = vpow2.f32 %v1211_v53  ;;  %1255 = vadd.xlane.f32.xlu2 %v1238_v12  ;;  %v1241_v20 = vsel %vm1140_vm2, %v1543_v30, 0.0 }
 0x29a   :  { %1546 = vpow2.f32 %v1219_v37 }
 0x29b   :  { %1548 = vpow2.f32 %v1217_v55 }
 0x29c   :  { %v1178_v14 = vpop.xlane.xlu1 %1177 }
 0x29d   :  { %v1168_v6 = vpop.xlane.xlu2 %1167  ;;  %v1176_v44 = vpop.xlane.xlu0 %1175  ;;  %v2447_v10 = vsub.f32 %v2316_v32, %v1178_v14 }
 0x29e   :  { %v2444_v40 = vsub.f32 %v2067_v3, %v1168_v6  ;;  %v2451_v41 = vsub.f32 %v2332_v19, %v1176_v44 }
 0x29f   :  { %v1545_v39 = vpop.eup %1544  ;;  %v1225_v3 = vmul.f32 1.442695, %v2447_v10 }
 0x2a0   :  { %v1215_v13 = vmul.f32 1.442695, %v2444_v40  ;;  %v1240_v4 = vsel %vm1140_vm2, %v1545_v39, 0.0  ;;  %v1223_v32 = vmul.f32 1.442695, %v2451_v41  ;;  %v1547_v38 = vpop.eup %1546 }
 0x2a1   :  { %1261 = vadd.xlane.f32.xlu2 %v1241_v20  ;;  %1259 = vadd.xlane.f32.xlu1 %v1240_v4  ;;  %v1549_v35 = vpop.eup %1548  ;;  %v1244_v57 = vsel %vm1140_vm2, %v1547_v38, 0.0 }
 0x2a2   :  { %1550 = vpow2.f32 %v1215_v13 }
 0x2a3   :  { %1552 = vpow2.f32 %v1225_v3 }
 0x2a4   :  { %v1184_v1 = vpop.xlane.xlu1 %1183  ;;  %1554 = vpow2.f32 %v1223_v32 }
 0x2a5   :  { %v1174_v24 = vpop.xlane.xlu2 %1173  ;;  %v1182_v26 = vpop.xlane.xlu0 %1181  ;;  %v2463_v29 = vsub.f32 %v2358_v23, %v1184_v1 }
 0x2a6   :  { %v2460_v19 = vsub.f32 %v2371_v31, %v1174_v24  ;;  %v2467_v42 = vsub.f32 %v2366_v17, %v1182_v26  ;;  %v1243_v31 = vsel %vm1140_vm2, %v1549_v35, 0.0 }
 0x2a7   :  { %v1231_v23 = vmul.f32 1.442695, %v2463_v29 }
 0x2a8   :  { %v1551_v58 = vpop.eup %1550  ;;  %v1221_v36 = vmul.f32 1.442695, %v2460_v19  ;;  %v1229_v51 = vmul.f32 1.442695, %v2467_v42 }
 0x2a9   :  { %v1242_v54 = vsel %vm1140_vm2, %v1551_v58, 0.0  ;;  %1267 = vadd.xlane.f32.xlu2 %v1244_v57  ;;  %1265 = vadd.xlane.f32.xlu1 %v1243_v31  ;;  %v1553_v17 = vpop.eup %1552 }
 0x2aa   :  { %1556 = vpow2.f32 %v1221_v36  ;;  %1263 = vadd.xlane.f32.xlu0 %v1242_v54  ;;  %v1555_v34 = vpop.eup %1554  ;;  %v1247_v63 = vsel %vm1140_vm2, %v1553_v17, 0.0 }
 0x2ab   :  { %1558 = vpow2.f32 %v1231_v23 }
 0x2ac   :  { %1560 = vpow2.f32 %v1229_v51 }
 0x2ad   :  { %v1180_v59 = vpop.xlane.xlu2 %1179  ;;  %v1188_v60 = vpop.xlane.xlu0 %1187 }
 0x2ae   :  { %v2478_v47 = vsub.f32 %v2395_v48, %v1180_v59  ;;  %v2482_v62 = vsub.f32 %v2391_v43, %v1188_v60  ;;  %v1246_v48 = vsel %vm1140_vm2, %v1555_v34, 0.0 }
 0x2b0   :  { %v1557_v61 = vpop.eup %1556  ;;  %v1227_v28 = vmul.f32 1.442695, %v2478_v47  ;;  %v1235_v5 = vmul.f32 1.442695, %v2482_v62 }
 0x2b1   :  { %v1245_v18 = vsel %vm1140_vm2, %v1557_v61, 0.0  ;;  %1273 = vadd.xlane.f32.xlu2 %v1247_v63  ;;  %1271 = vadd.xlane.f32.xlu1 %v1246_v48  ;;  %v1559_v9 = vpop.eup %1558 }
 0x2b2   :  { %1562 = vpow2.f32 %v1227_v28  ;;  %1269 = vadd.xlane.f32.xlu0 %v1245_v18  ;;  %v1561_v2 = vpop.eup %1560  ;;  %v1250_v49 = vsel %vm1140_vm2, %v1559_v9, 0.0 }
 0x2b3   :  { %1564 = vpow2.f32 %v1235_v5  ;;  %v1249_v16 = vsel %vm1140_vm2, %v1561_v2, 0.0 }
 0x2b5   :  { %v1186_v46 = vpop.xlane.xlu2 %1185 }
 0x2b6   :  { %v2492_v43 = vsub.f32 %v2404_v15, %v1186_v46 }
 0x2b8   :  { %v1563_v50 = vpop.eup %1562  ;;  %v1233_v45 = vmul.f32 1.442695, %v2492_v43 }
 0x2b9   :  { %v1248_v8 = vsel %vm1140_vm2, %v1563_v50, 0.0  ;;  %1279 = vadd.xlane.f32.xlu2 %v1250_v49  ;;  %1277 = vadd.xlane.f32.xlu1 %v1249_v16  ;;  %v1565_v15 = vpop.eup %1564 }
 0x2ba   :  { %1566 = vpow2.f32 %v1233_v45  ;;  %1275 = vadd.xlane.f32.xlu0 %v1248_v8  ;;  %v1252_v53 = vsel %vm1140_vm2, %v1565_v15, 0.0 }
 0x2c0   :  { %v1567_v7 = vpop.eup %1566 }
 0x2c1   :  { %v1251_v11 = vsel %vm1140_vm2, %v1567_v7, 0.0  ;;  %1283 = vadd.xlane.f32.xlu1 %v1252_v53 }
 0x2c2   :  { %1281 = vadd.xlane.f32.xlu0 %v1251_v11 }
 0x303   :  { %v1258_v12 = vpop.xlane.xlu0 %1257 }
 0x304   :  { %1568 = vlog2.f32 %v1258_v12  ;;  %v1254_v37 = vpop.xlane.xlu1 %1253 }
 0x305   :  { %1570 = vlog2.f32 %v1254_v37 }
 0x30a   :  { %v1569_v14 = vpop.eup %1568 }
 0x30b   :  { %v1290_v55 = vmul.f32 0.6931472, %v1569_v14  ;;  %v1571_v6 = vpop.eup %1570 }
 0x30c   :  { %v1286_v44 = vmul.f32 0.6931472, %v1571_v6  ;;  %v1256_v39 = vpop.xlane.xlu2 %1255 }
 0x30d   :  { %v1319_v30 = vsub.f32 %v2410_v27, %v1290_v55  ;;  %1572 = vlog2.f32 %v1256_v39 }
 0x30e   :  { %v1317_v13 = vsub.f32 %v2413_v25, %v1286_v44 }
 0x30f   :  { %1335 = vst [vmem:[%s2574_s8 + $0x10] sm:$0xff] %v1319_v30 }
 0x310   :  { %1333 = vst [vmem:[%s2574_s8] sm:$0xff] %v1317_v13 }
 0x313   :  { %v1573_v21 = vpop.eup %1572 }
 0x314   :  { %v1288_v20 = vmul.f32 0.6931472, %v1573_v21  ;;  %v1260_v4 = vpop.xlane.xlu1 %1259  ;;  %v1262_v3 = vpop.xlane.xlu2 %1261 }
 0x315   :  { %1574 = vlog2.f32 %v1260_v4 }
 0x316   :  { %v1318_v1 = vsub.f32 %v2418_v0, %v1288_v20  ;;  %1576 = vlog2.f32 %v1262_v3 }
 0x318   :  { %1334 = vst [vmem:[%s2574_s8 + $0x8] sm:$0xff] %v1318_v1 }
 0x31b   :  { %v1575_v27 = vpop.eup %1574 }
 0x31c   :  { %v1577_v25 = vpop.eup %1576  ;;  %v1292_v32 = vmul.f32 0.6931472, %v1575_v27  ;;  %v1268_v24 = vpop.xlane.xlu2 %1267 }
 0x31d   :  { %v1264_v26 = vpop.xlane.xlu0 %1263  ;;  %v1294_v38 = vmul.f32 0.6931472, %v1577_v25  ;;  %1578 = vlog2.f32 %v1268_v24  ;;  %v1266_v35 = vpop.xlane.xlu1 %1265 }
 0x31e   :  { %v1320_v58 = vsub.f32 %v2430_v33, %v1292_v32  ;;  %1580 = vlog2.f32 %v1266_v35 }
 0x31f   :  { %v1321_v36 = vsub.f32 %v2423_v56, %v1294_v38  ;;  %1582 = vlog2.f32 %v1264_v26 }
 0x320   :  { %1336 = vst [vmem:[%s2574_s8 + $0x18] sm:$0xff] %v1320_v58 }
 0x321   :  { %1337 = vst [vmem:[%s2574_s8 + $0x20] sm:$0xff] %v1321_v36 }
 0x323   :  { %v1579_v0 = vpop.eup %1578 }
 0x324   :  { %v1581_v57 = vpop.eup %1580  ;;  %v1300_v54 = vmul.f32 0.6931472, %v1579_v0  ;;  %v1274_v31 = vpop.xlane.xlu2 %1273 }
 0x325   :  { %v1270_v23 = vpop.xlane.xlu0 %1269  ;;  %v1583_v51 = vpop.eup %1582  ;;  %v1298_v59 = vmul.f32 0.6931472, %v1581_v57  ;;  %1584 = vlog2.f32 %v1274_v31 }
 0x326   :  { %v1272_v33 = vpop.xlane.xlu1 %1271  ;;  %v1324_v56 = vsub.f32 %v2433_v22, %v1300_v54  ;;  %v1296_v17 = vmul.f32 0.6931472, %v1583_v51 }
 0x327   :  { %1586 = vlog2.f32 %v1272_v33  ;;  %v1323_v60 = vsub.f32 %v2437_v52, %v1298_v59 }
 0x328   :  { %1588 = vlog2.f32 %v1270_v23  ;;  %1340 = vst [vmem:[%s2574_s8 + $0x38] sm:$0xff] %v1324_v56  ;;  %v1322_v34 = vsub.f32 %v2444_v40, %v1296_v17 }
 0x329   :  { %1339 = vst [vmem:[%s2574_s8 + $0x30] sm:$0xff] %v1323_v60 }
 0x32a   :  { %1338 = vst [vmem:[%s2574_s8 + $0x28] sm:$0xff] %v1322_v34 }
 0x32b   :  { %v1585_v22 = vpop.eup %1584 }
 0x32c   :  { %v1306_v28 = vmul.f32 0.6931472, %v1585_v22  ;;  %v1280_v63 = vpop.xlane.xlu2 %1279 }
 0x32d   :  { %v1587_v61 = vpop.eup %1586  ;;  %v1276_v52 = vpop.xlane.xlu0 %1275  ;;  %1590 = vlog2.f32 %v1280_v63 }
 0x32e   :  { %v1589_v18 = vpop.eup %1588  ;;  %v1304_v48 = vmul.f32 0.6931472, %v1587_v61  ;;  %v1278_v5 = vpop.xlane.xlu1 %1277  ;;  %v1327_v46 = vsub.f32 %v2447_v10, %v1306_v28 }
 0x32f   :  { %v1302_v40 = vmul.f32 0.6931472, %v1589_v18  ;;  %1592 = vlog2.f32 %v1278_v5 }
 0x330   :  { %v1326_v9 = vsub.f32 %v2451_v41, %v1304_v48  ;;  %1594 = vlog2.f32 %v1276_v52  ;;  %1343 = vst [vmem:[%s2574_s8 + $0x50] sm:$0xff] %v1327_v46 }
 0x331   :  { %v1325_v2 = vsub.f32 %v2460_v19, %v1302_v40 }
 0x332   :  { %1342 = vst [vmem:[%s2574_s8 + $0x48] sm:$0xff] %v1326_v9 }
 0x333   :  { %1341 = vst [vmem:[%s2574_s8 + $0x40] sm:$0xff] %v1325_v2  ;;  %v1591_v10 = vpop.eup %1590 }
 0x334   :  { %v1312_v45 = vmul.f32 0.6931472, %v1591_v10 }
 0x335   :  { %v1593_v50 = vpop.eup %1592  ;;  %v1282_v49 = vpop.xlane.xlu0 %1281 }
 0x336   :  { %v1595_v41 = vpop.eup %1594  ;;  %v1310_v8 = vmul.f32 0.6931472, %v1593_v50  ;;  %v1284_v16 = vpop.xlane.xlu1 %1283  ;;  %1596 = vlog2.f32 %v1282_v49  ;;  %v1330_v15 = vsub.f32 %v2463_v29, %v1312_v45 }
 0x337   :  { %v1308_v7 = vmul.f32 0.6931472, %v1595_v41  ;;  %1598 = vlog2.f32 %v1284_v16 }
 0x338   :  { %v1329_v19 = vsub.f32 %v2467_v42, %v1310_v8  ;;  %1346 = vst [vmem:[%s2574_s8 + $0x68] sm:$0xff] %v1330_v15 }
 0x339   :  { %v1328_v11 = vsub.f32 %v2478_v47, %v1308_v7 }
 0x33a   :  { %1345 = vst [vmem:[%s2574_s8 + $0x60] sm:$0xff] %v1329_v19 }
 0x33b   :  { %1344 = vst [vmem:[%s2574_s8 + $0x58] sm:$0xff] %v1328_v11 }
 0x33c   :  { %v1597_v53 = vpop.eup %1596 }
 0x33d   :  { %v1599_v29 = vpop.eup %1598  ;;  %v1314_v12 = vmul.f32 0.6931472, %v1597_v53 }
 0x33e   :  { %v1316_v37 = vmul.f32 0.6931472, %v1599_v29 }
 0x33f   :  { %v1331_v42 = vsub.f32 %v2492_v43, %v1314_v12 }
 0x340   :  { %v1332_v14 = vsub.f32 %v2482_v62, %v1316_v37 }
 0x341   :  { %1347 = vst [vmem:[%s2574_s8 + $0x70] sm:$0xff] %v1331_v42 }
 0x342   :  { %1348 = vst [vmem:[%s2574_s8 + $0x78] sm:$0xff] %v1332_v14 }

</bundles_post_ra>
